<compile_context>
chip_gen: v7x
topology: tpu7x:2x2x1
jax: 0.10.0
libtpu: 0.0.40
codegen_flags: <defaults>
</compile_context>

<pallas_src>
import functools

import jax
import jax.numpy as jnp
from jax.experimental import pallas as pl
from jax.experimental.pallas import tpu as pltpu


def _round_up(a, b):
    return (a + b - 1) // b * b


def _cdiv(a, b):
    return (a + b - 1) // b


def _lowbias32(x):
    """Counter-based uint32 avalanche hash (lowbias32) with plain jnp ops."""
    x = x ^ (x >> jnp.uint32(16))
    x = x * jnp.uint32(0x7FEB352D)
    x = x ^ (x >> jnp.uint32(15))
    x = x * jnp.uint32(0x846CA68B)
    x = x ^ (x >> jnp.uint32(16))
    return x


def _ffwd_kernel(seed_ref, x_ref, w1_ref, b1_ref, w2_ref, b2_ref, o_ref,
                 *, training: bool, keep_prob: float):
    # seed_ref: (1,) i32 (SMEM, scalar-prefetched)
    # x_ref:  (tm, C) f32    w1_ref: (C, H) bf16   b1_ref: (1, H) f32
    # w2_ref: (H, C) bf16    b2_ref: (1, C) f32    o_ref:  (tm, C) f32
    tm, C = x_ref.shape

    x_bf16 = x_ref[...].astype(jnp.bfloat16)

    # Fused matmuls: the MXU accumulates over the full K internally (f32 acc).
    h = jnp.dot(x_bf16, w1_ref[...], preferred_element_type=jnp.float32)
    h = jnp.maximum(h + b1_ref[...], 0.0)                      # bias + ReLU, f32
    y = jnp.dot(h.astype(jnp.bfloat16), w2_ref[...],
                preferred_element_type=jnp.float32)
    y = y + b2_ref[...]

    if training and keep_prob < 1.0:
        # Inverted dropout.  Mask = stateless hash of (seed, global element
        # index): reproducible, tiling-independent, no TPU-only PRNG needed.
        # TODO(synk): cannot bit-match torch's dropout RNG stream; it is
        # functionally equivalent (Bernoulli(keep_prob) mask, 1/keep_prob scale).
        row = (jax.lax.broadcasted_iota(jnp.int32, y.shape, 0)
               + pl.program_id(0) * tm)
        col = jax.lax.broadcasted_iota(jnp.int32, y.shape, 1)
        flat = (row * C + col).astype(jnp.uint32)
        seed_mix = seed_ref[0].astype(jnp.uint32) * jnp.uint32(0x9E3779B9)
        bits = _lowbias32(flat ^ seed_mix)
        # Top 24 bits -> uniform [0, 1); avoids unsigned compare/convert paths.
        u01 = ((bits >> jnp.uint32(8)).astype(jnp.int32).astype(jnp.float32)
               * jnp.float32(1.0 / (1 << 24)))
        y = jnp.where(u01 < jnp.float32(keep_prob),
                      y * jnp.float32(1.0 / keep_prob), jnp.float32(0.0))

    o_ref[...] = y.astype(o_ref.dtype)


def _vmem_capacity_bytes():
    # Generation-aware VMEM cap (v7x: 64 MiB per TC, v5e/v6e: 128 MiB).
    try:
        return int(pltpu.get_tpu_info().vmem_capacity_bytes)
    except Exception:  # no TPU visible (interpret mode) or older jax API
        return 64 * 1024 * 1024


def _tile_footprint_bytes(tm, C, H):
    return (
        2 * tm * C * 4          # double-buffered f32 x tile
        + 2 * tm * C * 4        # double-buffered f32 out tile
        + 2 * 2 * C * H * 2     # double-buffered bf16 W1 + W2 (resident)
        + 2 * 2 * (H + C) * 4   # double-buffered f32 biases
        + tm * H * 4            # hidden activation, f32
        + tm * H * 2            # hidden activation, bf16 copy for 2nd matmul
        + tm * C * 2            # bf16 x copy
        + tm * C * 4            # f32 y before store
    )


def feed_forward(x, w1, b1, w2, b2, *, dropout_p=0.2, training=False, seed=0,
                 tm=512):
    """x: (B, T, C) float32.  w1: (C, 4C), b1: (4C,), w2: (4C, C), b2: (C,)."""
    B, T, C = x.shape
    H = w1.shape[1]
    M = B * T

    # Row tile: multiple of 8 sublanes, >= 2 grid steps (so v7x's two
    # TensorCores both get work), and a footprint below ~half of VMEM.
    vmem_cap = _vmem_capacity_bytes()
    tm_eff = min(tm, max(8, _round_up(_cdiv(M, 2), 8)))
    while tm_eff > 8 and _tile_footprint_bytes(tm_eff, C, H) > vmem_cap // 2:
        tm_eff = max(8, _round_up(tm_eff // 2, 8))
    grid = _cdiv(M, tm_eff)   # ragged last block handled by Pallas (no pad)

    # No wrapper-side pad/slice: reshape is metadata-only (no extra HBM pass).
    x2 = x.reshape(M, C)

    # bf16 weights for the MXU; biases stay f32 for the VPU path.
    w1b = w1.astype(jnp.bfloat16)
    w2b = w2.astype(jnp.bfloat16)
    b1_2 = b1.reshape(1, H).astype(jnp.float32)
    b2_2 = b2.reshape(1, C).astype(jnp.float32)
    seed_arr = jnp.array([seed], dtype=jnp.int32)

    kernel = functools.partial(_ffwd_kernel, training=training,
                               keep_prob=1.0 - float(dropout_p))

    vmem_limit = int(min(max(2 * _tile_footprint_bytes(tm_eff, C, H),
                             32 * 1024 * 1024),
                         int(0.9 * vmem_cap)))

    flops = 2 * M * (C * H + H * C)
    bytes_accessed = (M * C * 4                  # x in
                      + C * H * 2 + H * C * 2    # bf16 weights
                      + H * 4 + C * 4            # biases
                      + M * C * 4)               # output

    grid_spec = pltpu.PrefetchScalarGridSpec(
        num_scalar_prefetch=1,
        grid=(grid,),
        in_specs=[
            pl.BlockSpec((tm_eff, C), lambda i, seed: (i, 0)),   # x row tile
            pl.BlockSpec((C, H), lambda i, seed: (0, 0)),        # W1 (resident)
            pl.BlockSpec((1, H), lambda i, seed: (0, 0)),        # b1
            pl.BlockSpec((H, C), lambda i, seed: (0, 0)),        # W2 (resident)
            pl.BlockSpec((1, C), lambda i, seed: (0, 0)),        # b2
        ],
        out_specs=pl.BlockSpec((tm_eff, C), lambda i, seed: (i, 0)),
    )

    out2 = pl.pallas_call(
        kernel,
        out_shape=jax.ShapeDtypeStruct((M, C), x.dtype),
        grid_spec=grid_spec,
        compiler_params=pltpu.CompilerParams(
            dimension_semantics=("parallel",),
            vmem_limit_bytes=vmem_limit),
        cost_estimate=pl.CostEstimate(flops=flops, transcendentals=0,
                                      bytes_accessed=bytes_accessed),
    )(seed_arr, x2, w1b, b1_2, w2b, b2_2)

    return out2.reshape(B, T, C)


def init_params(key, n_embd):
    """Deterministic init mirroring nn.Linear defaults (uniform +/- 1/sqrt(fan_in))."""
    hidden = 4 * n_embd
    k1, k2, k3, k4 = jax.random.split(key, 4)
    lim1 = 1.0 / jnp.sqrt(n_embd)
    lim2 = 1.0 / jnp.sqrt(hidden)
    w1 = jax.random.uniform(k1, (n_embd, hidden), jnp.float32, -lim1, lim1)
    b1 = jax.random.uniform(k2, (hidden,), jnp.float32, -lim1, lim1)
    w2 = jax.random.uniform(k3, (hidden, n_embd), jnp.float32, -lim2, lim2)
    b2 = jax.random.uniform(k4, (n_embd,), jnp.float32, -lim2, lim2)
    return w1, b1, w2, b2


if __name__ == "__main__":
    # n_embd=384 / hidden=1536 as in the module; small B, T.
    # M = B*T = 74 exercises the ragged last row-tile and a 2-step grid.
    B, T, n_embd = 2, 37, 384
    key = jax.random.PRNGKey(0)
    kx, kp = jax.random.split(key)
    x = jax.random.normal(kx, (B, T, n_embd), dtype=jnp.float32)
    w1, b1, w2, b2 = init_params(kp, n_embd)

    # Eval-mode forward (dropout = identity), matching module.eval() semantics.
    out = feed_forward(x, w1, b1, w2, b2, dropout_p=0.2, training=False)
    out = jax.block_until_ready(out)

    # Pure-JAX f32 reference (bf16 MXU operands -> loose tolerance).
    ref = jnp.maximum(x.reshape(-1, n_embd) @ w1 + b1, 0.0) @ w2 + b2
    ref = ref.reshape(B, T, n_embd)
    assert out.shape == ref.shape
    assert jnp.allclose(out, ref, atol=2e-2, rtol=2e-2)

    # Training mode with dropout_p=0 must equal the eval path.
    out_p0 = feed_forward(x, w1, b1, w2, b2, dropout_p=0.0, training=True)
    out_p0 = jax.block_until_ready(out_p0)
    assert jnp.allclose(out_p0, out, atol=1e-6, rtol=1e-6)

    # Training mode with dropout_p=0.2: ~20% of outputs are zeroed.
    out_tr = feed_forward(x, w1, b1, w2, b2, dropout_p=0.2, training=True,
                          seed=7)
    out_tr = jax.block_until_ready(out_tr)
    assert out_tr.shape == (B, T, n_embd)
    assert bool(jnp.all(jnp.isfinite(out_tr)))
    zero_frac = float(jnp.mean(out_tr == 0.0))
    assert 0.1 < zero_frac < 0.3, zero_frac

    print("KERNEL_OK")
</pallas_src>

<mosaic_0001>
module attributes {stable_mosaic.version = 11 : i64} {
  func.func @_ffwd_kernel(%arg0: i32, %arg1: memref<1xi32, #tpu.memory_space<smem>>, %arg2: memref<40x384xf32, #tpu.memory_space<vmem>>, %arg3: memref<384x1536xbf16, #tpu.memory_space<vmem>>, %arg4: memref<1x1536xf32, #tpu.memory_space<vmem>>, %arg5: memref<1536x384xbf16, #tpu.memory_space<vmem>>, %arg6: memref<1x384xf32, #tpu.memory_space<vmem>>, %arg7: memref<40x384xf32, #tpu.memory_space<vmem>>) attributes {dimension_semantics = [#tpu.dimension_semantics<parallel>], iteration_bounds = array<i64: 2>, scalar_prefetch = 1 : i64, scratch_operands = 0 : i64, tpu.core_type = #tpu.core_type<tc>, window_params = [{transform_indices = @transform_0, window_bounds = array<i64: 40, 384>}, {pipeline_mode = #tpu.pipeline_mode<synchronous>, transform_indices = @transform_1, window_bounds = array<i64: 384, 1536>}, {pipeline_mode = #tpu.pipeline_mode<synchronous>, transform_indices = @transform_2, window_bounds = array<i64: 1, 1536>}, {pipeline_mode = #tpu.pipeline_mode<synchronous>, transform_indices = @transform_3, window_bounds = array<i64: 1536, 384>}, {pipeline_mode = #tpu.pipeline_mode<synchronous>, transform_indices = @transform_4, window_bounds = array<i64: 1, 384>}, {transform_indices = @transform_5, window_bounds = array<i64: 40, 384>}]} {
    %c0 = arith.constant 0 : index
    %c0_0 = arith.constant 0 : index
    %0 = vector.load %arg2[%c0, %c0_0] : memref<40x384xf32, #tpu.memory_space<vmem>>, vector<40x384xf32>
    %1 = arith.truncf %0 : vector<40x384xf32> to vector<40x384xbf16>
    %c0_1 = arith.constant 0 : index
    %c0_2 = arith.constant 0 : index
    %2 = vector.load %arg3[%c0_1, %c0_2] : memref<384x1536xbf16, #tpu.memory_space<vmem>>, vector<384x1536xbf16>
    %cst = arith.constant dense<0.000000e+00> : vector<40x1536xf32>
    %3 = tpu.matmul %1, %2, %cst {dimension_numbers = #tpu.dot_dimension_numbers<[1], [0], [0], [1], [0, 0, 1, 1], [], []>} : vector<40x384xbf16>, vector<384x1536xbf16>, vector<40x1536xf32> -> vector<40x1536xf32>
    %c0_3 = arith.constant 0 : index
    %c0_4 = arith.constant 0 : index
    %4 = vector.load %arg4[%c0_3, %c0_4] : memref<1x1536xf32, #tpu.memory_space<vmem>>, vector<1x1536xf32>
    %5 = vector.broadcast %4 : vector<1x1536xf32> to vector<40x1536xf32>
    %6 = arith.addf %3, %5 : vector<40x1536xf32>
    %cst_5 = arith.constant 0.000000e+00 : f32
    %7 = vector.broadcast %cst_5 : f32 to vector<40x1536xf32>
    %8 = arith.maximumf %6, %7 : vector<40x1536xf32>
    %9 = arith.truncf %8 : vector<40x1536xf32> to vector<40x1536xbf16>
    %c0_6 = arith.constant 0 : index
    %c0_7 = arith.constant 0 : index
    %10 = vector.load %arg5[%c0_6, %c0_7] : memref<1536x384xbf16, #tpu.memory_space<vmem>>, vector<1536x384xbf16>
    %cst_8 = arith.constant dense<0.000000e+00> : vector<40x384xf32>
    %11 = tpu.matmul %9, %10, %cst_8 {dimension_numbers = #tpu.dot_dimension_numbers<[1], [0], [0], [1], [0, 0, 1, 1], [], []>} : vector<40x1536xbf16>, vector<1536x384xbf16>, vector<40x384xf32> -> vector<40x384xf32>
    %c0_9 = arith.constant 0 : index
    %c0_10 = arith.constant 0 : index
    %12 = vector.load %arg6[%c0_9, %c0_10] : memref<1x384xf32, #tpu.memory_space<vmem>>, vector<1x384xf32>
    %13 = vector.broadcast %12 : vector<1x384xf32> to vector<40x384xf32>
    %14 = arith.addf %11, %13 : vector<40x384xf32>
    %c0_11 = arith.constant 0 : index
    %c0_12 = arith.constant 0 : index
    %15 = vector.load %arg7[%c0_11, %c0_12] : memref<40x384xf32, #tpu.memory_space<vmem>>, vector<40x384xf32>
    tpu.vector_store %arg7[%c0_11, %c0_12], %14 {strides = array<i32>} : memref<40x384xf32, #tpu.memory_space<vmem>>, vector<40x384xf32>,
    return
  }
  func.func @transform_0(%arg0: i32, %arg1: memref<1xi32, #tpu.memory_space<smem>>) -> (i32, i32) {
    %c0_i32 = arith.constant 0 : i32
    %c0_i32_0 = arith.constant 0 : i32
    return %arg0, %c0_i32 : i32, i32
  }
  func.func @transform_1(%arg0: i32, %arg1: memref<1xi32, #tpu.memory_space<smem>>) -> (i32, i32) {
    %c0_i32 = arith.constant 0 : i32
    %c0_i32_0 = arith.constant 0 : i32
    %c0_i32_1 = arith.constant 0 : i32
    return %c0_i32, %c0_i32_0 : i32, i32
  }
  func.func @transform_2(%arg0: i32, %arg1: memref<1xi32, #tpu.memory_space<smem>>) -> (i32, i32) {
    %c0_i32 = arith.constant 0 : i32
    %c0_i32_0 = arith.constant 0 : i32
    %c0_i32_1 = arith.constant 0 : i32
    return %c0_i32, %c0_i32_0 : i32, i32
  }
  func.func @transform_3(%arg0: i32, %arg1: memref<1xi32, #tpu.memory_space<smem>>) -> (i32, i32) {
    %c0_i32 = arith.constant 0 : i32
    %c0_i32_0 = arith.constant 0 : i32
    %c0_i32_1 = arith.constant 0 : i32
    return %c0_i32, %c0_i32_0 : i32, i32
  }
  func.func @transform_4(%arg0: i32, %arg1: memref<1xi32, #tpu.memory_space<smem>>) -> (i32, i32) {
    %c0_i32 = arith.constant 0 : i32
    %c0_i32_0 = arith.constant 0 : i32
    %c0_i32_1 = arith.constant 0 : i32
    return %c0_i32, %c0_i32_0 : i32, i32
  }
  func.func @transform_5(%arg0: i32, %arg1: memref<1xi32, #tpu.memory_space<smem>>) -> (i32, i32) {
    %c0_i32 = arith.constant 0 : i32
    %c0_i32_0 = arith.constant 0 : i32
    return %arg0, %c0_i32 : i32, i32
  }
}

</mosaic_0001>

<bundles_post_ra>
// kernel: tpu_custom_call.1
= control target key start
LH: loop header
LB: loop body
LE: loop exit
PB: predicated region body
PF: predicated region fallthrough
CT: control target
= control target key end

     0   :  { %s8573_s0 = inlined_call_operand.<no memory space> [shape: s32[1], index: 0, kind: input, shape index: {}]   ;;  %s8574_s1 = inlined_call_operand.hbm [shape: f32[74,384], index: 1, kind: input, shape index: {}]   ;;  %s8575_s2 = inlined_call_operand.hbm [shape: bf16[384,1536], index: 2, kind: input, shape index: {}]   ;;  %s8576_s3 = inlined_call_operand.hbm [shape: f32[1,1536], index: 3, kind: input, shape index: {}]   ;;  %s8577_s4 = inlined_call_operand.hbm [shape: bf16[1536,384], index: 4, kind: input, shape index: {}]   ;;  %s8578_s5 = inlined_call_operand.hbm [shape: f32[1,384], index: 5, kind: input, shape index: {}]   ;;  %s8579_s6 = inlined_call_operand.hbm [shape: f32[74,384], index: 6, kind: output, shape index: {}]  }
   0x1   :  { %8583 = sst [smem:[#allocation18_spill]] %s8575_s2 }
   0x2   :  { %12 = vsyncpa [#allocation5], 0 }
   0x3   :  { %14 = vsyncpa [#allocation5 + $0x1], 0 }
   0x4   :  { %15 = vsyncpa [#allocation8], 0 }
   0x5   :  { %16 = vsyncpa [#allocation11], 0 }
   0x6   :  { %17 = vsyncpa [#allocation6], 0 }
   0x7   :  { %19 = vsyncpa [#allocation6 + $0x1], 0  ;;  %s7912_s0 = smov 0   ;;  %s7914_s21 = smov 0  }
   0x8   :  { %s7916_s22 = smov 0   ;;  %s7918_s23 = smov 0  }
   0x9 LB: > { %s7933_s24 = sadd.s32 4294967295, %s7860_s23   ;;  %s5727_s25 = sadd.s32 4294967294, %s7860_s23   ;;  %s7860_s23 = sphi %s7918_s23, %s8604_s23   ;;  %s7856_s22 = sphi %s7916_s22, %s8603_s22   ;;  %s7852_s21 = sphi %s7914_s21, %s8602_s21   ;;  %s7848_s0 = sphi %s7912_s0, %s8601_s0  }
   0xa   : > { %p45_p0 = scmp.ne.s32.totalorder %s7852_s21, %s7848_s0  ;;  %p8580_p1 = scmp.eq.s32.totalorder %s7933_s24, 0 }
   0xb   : > { %p159_p3 = scmp.eq.s32.totalorder %s5727_s25, 1  ;;  %p5728_p5 = scmp.ge.s32.totalorder %s7860_s23, 1 }
   0xc   : > { %p7942_p4 = por %p8580_p1, %p45_p0  ;;  %p166_p7 = scmp.lt.s32.totalorder %s7860_s23, 3 }
   0xd   : > { %p7947_p6 = por %p159_p3, %p45_p0  ;;  %s7862_s29 = smov [#allocation7]  }
   0xe   : > { %s8584_s26 = scalar_select %p7942_p4, 1, 0 }
   0xf   : > { %s8585_s27 = scalar_select %p7947_p6, 1, 0 }
  0x10   : > { %p7952_p8 = pnand %p5728_p5, %p166_p7  ;;  %s178_s30 = sshll.u32 %s7862_s29, 4  ;;  %s7956_s30 = int_to_ptr.vmem [resolvable:$true] %s178_s30 }
  0x11   : > { %s7863_s8 = smov [#allocation10]   ;;  %s8588_s2 = sld [smem:[#allocation18_spill]] }
  0x12   : > { %s8586_s28 = scalar_select %p7952_p8, 1, 0 }
  0x13   : > { %p6749_p9 = pneg %p7952_p8  ;;  %s202_s9 = sshll.u32 %s7863_s8, 4  ;;  %s7967_s9 = int_to_ptr.vmem [resolvable:$true] %s202_s9 }
  0x15   : > { %p7963_p11 = pnand %p6749_p9, %p8580_p1 }
  0x17   : > { %s7644_s12 = scalar_lea.hbm %s8588_s2, 36864  ;;  %p7977_p13 = pneg %p7963_p11 }
  0x18   : > { %p7645_p12 = scmp.ne.s32.totalorder %s8588_s2, %s7644_s12  ;;  %p7651_p5 = scmp.lt.u32.totalorder %s7644_s12, %s8588_s2 }
  0x1a   : > { %p7647_p0 = pnand %p7977_p13, %p7645_p12 }
  0x1c   : > { %p7648_p3 = pneg %p7647_p0 }
  0x1e   : > { %p7653_p7 = pnand %p7651_p5, %p7648_p3 }
  0x20   : > { %7656 = shalt.err (!%p7653_p7)
}
  0x21   : > { %s7657_s18 = scalar_lea.vmem %s7956_s30, 36864  ;;  %p7665_p2 = scmp.lt.s32.totalorder %s7956_s30, %s7956_s30 }
  0x22   : > { %p7658_p9 = scmp.ne.s32.totalorder %s7956_s30, %s7657_s18  ;;  %p7666_p6 = scmp.lt.s32.totalorder %s7657_s18, %s7657_s18 }
  0x24   : > { %p7660_p10 = pnand %p7658_p9, %p7977_p13  ;;  %p7667_p12 = por %p7666_p6, %p7665_p2 }
  0x26   : > { %p7661_p1 = pneg %p7660_p10 }
  0x28   : > { %p7668_p0 = pnand %p7667_p12, %p7661_p1 }
  0x2a   : > { %7671 = shalt.err (!%p7668_p0)
}
  0x2b   : > { %s7864_s19 = smov 768   ;;  %s7865_s20 = smov 48  }
  0x2c   : > { %6752 = dma.hbm_to_vmem [thread:$0]  (!%p7963_p11), %s8588_s2, 36864, %s7956_s30, [#allocation8], %s7864_s19, %s7864_s19, %s7865_s20  }
  0x2d   : > { %s7672_s11 = scalar_lea.hbm %s8577_s4, 36864 }
  0x2e   : > { %p7673_p2 = scmp.ne.s32.totalorder %s8577_s4, %s7672_s11  ;;  %p7679_p10 = scmp.lt.u32.totalorder %s7672_s11, %s8577_s4 }
  0x30   : > { %p7675_p1 = pnand %p7673_p2, %p7977_p13 }
  0x32   : > { %p7676_p6 = pneg %p7675_p1 }
  0x34   : > { %p7681_p3 = pnand %p7679_p10, %p7676_p6 }
  0x36   : > { %7684 = shalt.err (!%p7681_p3)
}
  0x37   : > { %s7685_s30 = scalar_lea.vmem %s7967_s9, 36864  ;;  %p7693_p12 = scmp.lt.s32.totalorder %s7967_s9, %s7967_s9 }
  0x38   : > { %p7686_p5 = scmp.ne.s32.totalorder %s7967_s9, %s7685_s30  ;;  %p7694_p0 = scmp.lt.s32.totalorder %s7685_s30, %s7685_s30 }
  0x3a   : > { %p7688_p7 = pnand %p7686_p5, %p7977_p13  ;;  %p7695_p2 = por %p7694_p0, %p7693_p12 }
  0x3c   : > { %p7689_p9 = pneg %p7688_p7 }
  0x3e   : > { %p7696_p1 = pnand %p7695_p2, %p7689_p9 }
  0x40   : > { %7699 = shalt.err (!%p7696_p1)
}
  0x41   : > { %s7866_s17 = smov 192   ;;  %s7867_s18 = smov 12  }
  0x42   : > { %6758 = dma.hbm_to_vmem [thread:$0]  (!%p7963_p11), %s8577_s4, 36864, %s7967_s9, [#allocation11], %s7866_s17, %s7866_s17, %s7867_s18  }
  0x43   : > { %s7868_s25 = smov [#allocation9]   ;;  %s7869_s8 = smov [#allocation12]  }
  0x44   : > { %s192_s29 = sshll.u32 %s7868_s25, 4  ;;  %s216_s10 = sshll.u32 %s7869_s8, 4  ;;  %s193_s29 = int_to_ptr.vmem [resolvable:$true] %s192_s29  ;;  %s217_s10 = int_to_ptr.vmem [resolvable:$true] %s216_s10 }
  0x45   : > { %s7700_s13 = scalar_lea.hbm %s8576_s3, 192 }
  0x46   : > { %p7701_p6 = scmp.ne.s32.totalorder %s8576_s3, %s7700_s13  ;;  %p7707_p5 = scmp.lt.u32.totalorder %s7700_s13, %s8576_s3 }
  0x48   : > { %p7703_p10 = pnand %p7701_p6, %p7977_p13 }
  0x4a   : > { %p7704_p3 = pneg %p7703_p10 }
  0x4c   : > { %p7709_p7 = pnand %p7707_p5, %p7704_p3 }
  0x4e   : > { %7712 = shalt.err (!%p7709_p7)
}
  0x4f   : > { %s7713_s9 = scalar_lea.vmem %s193_s29, 192  ;;  %p7721_p2 = scmp.lt.s32.totalorder %s193_s29, %s193_s29 }
  0x50   : > { %p7714_p9 = scmp.ne.s32.totalorder %s193_s29, %s7713_s9  ;;  %p7722_p1 = scmp.lt.s32.totalorder %s7713_s9, %s7713_s9 }
  0x52   : > { %p7716_p12 = pnand %p7714_p9, %p7977_p13  ;;  %p7723_p4 = por %p7722_p1, %p7721_p2 }
  0x54   : > { %p7717_p0 = pneg %p7716_p12 }
  0x56   : > { %p7724_p8 = pnand %p7723_p4, %p7717_p0 }
  0x58   : > { %7727 = shalt.err (!%p7724_p8)
}
  0x59   : > { %6755 = dma.hbm_to_vmem [thread:$0]  (!%p7963_p11), %s8576_s3, 192, %s193_s29, [#allocation8]  }
  0x5a   : > { %s7728_s20 = scalar_lea.hbm %s8578_s5, 48 }
  0x5b   : > { %p7729_p6 = scmp.ne.s32.totalorder %s8578_s5, %s7728_s20  ;;  %p7735_p8 = scmp.lt.u32.totalorder %s7728_s20, %s8578_s5 }
  0x5d   : > { %p7731_p10 = pnand %p7729_p6, %p7977_p13 }
  0x5f   : > { %p7732_p4 = pneg %p7731_p10 }
  0x61   : > { %p7737_p3 = pnand %p7735_p8, %p7732_p4 }
  0x63   : > { %7740 = shalt.err (!%p7737_p3)
}
  0x64   : > { %s7741_s13 = scalar_lea.vmem %s217_s10, 48  ;;  %s7748_s29 = scalar_lea.vmem %s217_s10, 64 }
  0x65   : > { %p7742_p5 = scmp.ne.s32.totalorder %s217_s10, %s7741_s13  ;;  %p7749_p12 = scmp.lt.s32.totalorder %s217_s10, %s217_s10 }
  0x66   : > { %p7750_p0 = scmp.lt.s32.totalorder %s7748_s29, %s7741_s13 }
  0x67   : > { %p7744_p7 = pnand %p7742_p5, %p7977_p13 }
  0x68   : > { %p7751_p2 = por %p7750_p0, %p7749_p12 }
  0x69   : > { %p7745_p9 = pneg %p7744_p7 }
  0x6b   : > { %p7752_p1 = pnand %p7751_p2, %p7745_p9 }
  0x6d   : > { %7755 = shalt.err (!%p7752_p1)
}
  0x6e   : > { %6761 = dma.hbm_to_vmem [thread:$0]  (!%p7963_p11), %s8578_s5, 48, %s217_s10, [#allocation11]  }
  0x6f   : > { %s8058_s15 = sadd.s32 1, %s7860_s23   ;;  %s32_s7 = sadd.s32 1, %s7856_s22 }
  0x70   : > { %s29_s30 = ssub.s32 %s7860_s23, %s8058_s15  ;;  %p39_p6 = scmp.ne.s32.totalorder %s7856_s22, %s7852_s21 }
  0x71   : > { %p30_p13 = scmp.eq.s32.totalorder %s29_s30, 0  ;;  %p40_p10 = scmp.eq.s32.totalorder %s7860_s23, 0 }
  0x72   : > { %p6774_p4 = scmp.lt.s32.totalorder %s7860_s23, 2  ;;  %p8590_p3 = scmp.eq.s32.totalorder %s7933_s24, 1 }
  0x73   : > { %s8068_s9 = scalar_select %p30_p13, %s7856_s22, %s32_s7  }
  0x74   : > { %p41_p8 = por %p40_p10, %p39_p6  ;;  %p8072_p5 = por %p8590_p3, %p39_p6 }
  0x75   : > { %s227_s18 = sand.u32 1, %s7856_s22   ;;  %s6775_s2 = smul.u32 1920, %s7860_s23 }
  0x76   : > { %s6725_s10 = smul.u32 120, %s227_s18  ;;  %p8083_p11 = pnand %p6774_p4, %p41_p8 }
  0x77   : > { %s8081_s25 = scalar_lea.hbm %s8574_s1, %s6775_s2  ;;  %s8089_s13 = scalar_lea.sflag [#allocation5], %s227_s18 }
  0x78   : > { %s231_s11 = scalar_lea.vmem [#allocation4], %s6725_s10  ;;  %s7756_s29 = scalar_lea.hbm %s8081_s25, 1920 }
  0x79   : > { %s239_s12 = sshll.u32 %s231_s11, 4  ;;  %p7757_p7 = scmp.ne.s32.totalorder %s8081_s25, %s7756_s29  ;;  %s8087_s12 = int_to_ptr.vmem [resolvable:$true] %s239_s12 }
  0x7a   : > { %p7758_p9 = pneg %p8083_p11  ;;  %s7761_s30 = scalar_lea.hbm %s8574_s1, 3840 }
  0x7b   : > { %p7762_p2 = scmp.lt.u32.totalorder %s8081_s25, %s8574_s1  ;;  %p7763_p1 = scmp.lt.u32.totalorder %s7761_s30, %s7756_s29 }
  0x7c   : > { %p7759_p12 = pnand %p7758_p9, %p7757_p7  ;;  %p7765_p6 = scmp.lt.u32.totalorder %s7756_s29, %s8081_s25 }
  0x7d   : > { %p7764_p13 = por %p7763_p1, %p7762_p2 }
  0x7e   : > { %p7760_p0 = pneg %p7759_p12 }
  0x7f   : > { %p7766_p10 = por %p7765_p6, %p7764_p13 }
  0x81   : > { %p7767_p4 = pnand %p7766_p10, %p7760_p0 }
  0x83   : > { %7770 = shalt.err (!%p7767_p4)
}
  0x84   : > { %s7771_s18 = scalar_lea.vmem %s8087_s12, 1920  ;;  %s7870_s10 = smov [#allocation4]  }
  0x85   : > { %p7772_p8 = scmp.ne.s32.totalorder %s8087_s12, %s7771_s18  ;;  %s7776_s19 = sshll.u32 %s7870_s10, 4  ;;  %s7777_s19 = int_to_ptr.vmem [resolvable:$false] %s7776_s19 }
  0x86   : > { %s7778_s20 = scalar_lea.vmem %s7777_s19, 3840  ;;  %p7779_p12 = scmp.lt.s32.totalorder %s8087_s12, %s7777_s19 }
  0x87   : > { %p7774_p3 = pnand %p7772_p8, %p7758_p9  ;;  %p7780_p2 = scmp.lt.s32.totalorder %s7778_s20, %s7771_s18 }
  0x89   : > { %p7775_p7 = pneg %p7774_p3  ;;  %p7781_p1 = por %p7780_p2, %p7779_p12 }
  0x8b   : > { %p7782_p13 = pnand %p7781_p1, %p7775_p7 }
  0x8d   : > { %7785 = shalt.err (!%p7782_p13)
}
  0x8e   : > { %s7871_s11 = smov 384   ;;  %s7872_s29 = smov 24  }
  0x8f   : > { %6765 = dma.hbm_to_vmem [thread:$0]  (!%p8083_p11), %s8081_s25, 1920, %s8087_s12, %s8089_s13, %s7871_s11, %s7871_s11, %s7872_s29  }
  0x90   : > { %p8593_p9 = scmp.ne.s32.totalorder %s8586_s28, 0 }
  0x91   : > { %s8120_s14 = sand.u32 (!%p8593_p9), 1, %s7852_s21   ;;  %p8594_p0 = scmp.ne.s32.totalorder (!%p8593_p9), %s8584_s26, 0 }
  0x92   : > { %251 = sbr.rel (%p8593_p9) target bundleno = 1078 (0x436), region = 40  ;;  %s254_s30 = scalar_lea.sflag (!%p8593_p9), [#allocation5], %s8120_s14 }
  0x93   : > { %s6727_s16 = smul.u32 (!%p8593_p9), 120, %s8120_s14 }
  0x95   : > { %s8126_s7 = scalar_lea.vmem (!%p8593_p9), [#allocation4], %s6727_s16 }
  0x99   : > { %7831 = dma.done.wait (%p8594_p0), %s254_s30, 1920  }
  0x9a   : > { %7833 = vsyncadd (%p8594_p0), %s254_s30, 4294965376  ;;  %p8595_p11 = scmp.eq.s32.totalorder %s7933_s24, 0 }
  0x9c   : > { %7835 = dma.done.wait (%p8595_p11), [#allocation8], 37056   ;;  %p8596_p6 = pmov %p8595_p11 }
  0x9e   : > { %7837 = vsyncadd (%p8596_p6), [#allocation8], 4294930240  ;;  %p8597_p10 = pmov %p8596_p6 }
  0x9f   : > { %p8598_p4 = pmov %p8596_p6 }
  0xa0   : > { %7839 = dma.done.wait (%p8597_p10), [#allocation11], 36912  }
  0xa1   : > { %7841 = vsyncadd (%p8598_p4), [#allocation11], 4294930384  ;;  %v6827_v0 = vld [vmem:[#allocation7 + $0x4] ss:$48 sps:$4 sm:$0xff]   ;;  %v6829_v1 = vld [vmem:[#allocation7] ss:$48 sps:$4 sm:$0xff]  }
  0xa2   : > { %2119 = vmatprep.subr.bf16.mxu1 %v6827_v0  ;;  %v6830_v2 = vld [vmem:[#allocation7 + $0x64] ss:$48 sps:$4 sm:$0xff]   ;;  %v6832_v3 = vld [vmem:[#allocation7 + $0x60] ss:$48 sps:$4 sm:$0xff]   ;;  %s8501_s26 = scalar_lea.vmem [#allocation13], %s6727_s16  ;;  %s6780_s28 = smul.u32 1920, %s7933_s24 }
  0xa3   : > { %2120 = vmatpush1.bf16.msra.mxu1 %v6829_v1  ;;  %v6833_v4 = vld [vmem:[#allocation7 + $0xc4] ss:$48 sps:$4 sm:$0xff]   ;;  %v6835_v5 = vld [vmem:[#allocation7 + $0xc0] ss:$48 sps:$4 sm:$0xff]   ;;  %s5616_s25 = sshll.u32 %s8501_s26, 4  ;;  %s5602_s24 = scalar_lea.sflag [#allocation6], %s8120_s14  ;;  %s8527_s25 = int_to_ptr.vmem [resolvable:$true] %s5616_s25 }
  0xa4   : > { %2121 = vmatprep.subr.bf16.mxu1 %v6830_v2  ;;  %v6836_v6 = vld [vmem:[#allocation7 + $0x124] ss:$48 sps:$4 sm:$0xff]   ;;  %v6838_v7 = vld [vmem:[#allocation7 + $0x120] ss:$48 sps:$4 sm:$0xff]   ;;  %s8525_s13 = scalar_lea.hbm %s8579_s6, %s6780_s28  ;;  %s7786_s2 = scalar_lea.vmem %s8527_s25, 1920 }
  0xa5   : > { %v6839_v8 = vld [vmem:[#allocation7 + $0x184] ss:$48 sps:$4 sm:$0xff]   ;;  %v6841_v9 = vld [vmem:[#allocation7 + $0x180] ss:$48 sps:$4 sm:$0xff]   ;;  %p7787_p8 = scmp.ne.s32.totalorder %s8527_s25, %s7786_s2  ;;  %s7874_s18 = smov [#allocation13]  }
  0xa6   : > { %v6842_v10 = vld [vmem:[#allocation7 + $0x1e4] ss:$48 sps:$4 sm:$0xff]   ;;  %v6844_v11 = vld [vmem:[#allocation7 + $0x1e0] ss:$48 sps:$4 sm:$0xff]   ;;  %s7790_s10 = sshll.u32 %s7874_s18, 4  ;;  %s7791_s10 = int_to_ptr.vmem [resolvable:$false] %s7790_s10 }
  0xa7   : > { %2122 = vmatpush1.bf16.msra.mxu1 %v6832_v3  ;;  %v6845_v12 = vld [vmem:[#allocation7 + $0x244] ss:$48 sps:$4 sm:$0xff]   ;;  %v6847_v14 = vld [vmem:[#allocation7 + $0x240] ss:$48 sps:$4 sm:$0xff]   ;;  %p7788_p3 = pnand %p7787_p8, %p8072_p5  ;;  %s7792_s19 = scalar_lea.vmem %s7791_s10, 3840 }
  0xa8   : > { %2123 = vmatprep.subr.bf16.mxu1 %v6833_v4  ;;  %v6872_v13 = vld [vmem:[#allocation7 + $0x14] ss:$48 sps:$4 sm:$0xff]   ;;  %v6876_v16 = vld [vmem:[#allocation7 + $0x10] ss:$48 sps:$4 sm:$0xff]   ;;  %p7793_p12 = scmp.lt.s32.totalorder %s8527_s25, %s7791_s10  ;;  %p7794_p2 = scmp.lt.s32.totalorder %s7792_s19, %s7786_s2 }
  0xa9   : > { %v6848_v15 = vld [vmem:[#allocation7 + $0x2a4] ss:$48 sps:$4 sm:$0xff]   ;;  %2363 = vmatprep.subr.bf16.mxu0 %v6872_v13  ;;  %v6883_v21 = vld [vmem:[#allocation7 + $0x70] ss:$48 sps:$4 sm:$0xff]   ;;  %p7789_p7 = pneg %p7788_p3 }
  0xaa   : > { %v6878_v17 = vld [vmem:[#allocation7 + $0x74] ss:$48 sps:$4 sm:$0xff]   ;;  %2364 = vmatpush1.bf16.msra.mxu0 %v6876_v16  ;;  %v6850_v22 = vld [vmem:[#allocation7 + $0x2a0] ss:$48 sps:$4 sm:$0xff]   ;;  %p7795_p1 = por %p7794_p2, %p7793_p12 }
  0xab   : > { %2124 = vmatpush1.bf16.msra.mxu1 %v6835_v5  ;;  %v304_v18 = vld [vmem:[%s8126_s7 + $0x8] sm:$0xff]  ;;  %v307_v19 = vld [vmem:[%s8126_s7 + $0x20] sm:$0xff]  ;;  %2365 = vmatprep.subr.bf16.mxu0 %v6878_v17  ;;  %v306_v58 = vld [vmem:[%s8126_s7 + $0x18] sm:$0xff] }
  0xac   : > { %2125 = vmatprep.subr.bf16.mxu1 %v6836_v6  ;;  %v8142_v20 = vpack.c.bf16 %v307_v19, %v304_v18  ;;  %v6884_v23 = vld [vmem:[#allocation7 + $0xd4] ss:$48 sps:$4 sm:$0xff]   ;;  %v6889_v25 = vld [vmem:[#allocation7 + $0xd0] ss:$48 sps:$4 sm:$0xff]   ;;  %p7796_p13 = pnand %p7795_p1, %p7789_p7 }
  0xad   : > { %v6851_v24 = vld [vmem:[#allocation7 + $0x304] ss:$48 sps:$4 sm:$0xff]   ;;  %v6853_v27 = vld [vmem:[#allocation7 + $0x300] ss:$48 sps:$4 sm:$0xff]  }
  0xae   : > { %2151 = vmatprep.mubr.bf16.mxu1 %v8142_v20  ;;  %2366 = vmatpush1.bf16.msra.mxu0 %v6883_v21  ;;  %v6890_v26 = vld [vmem:[#allocation7 + $0x134] ss:$48 sps:$4 sm:$0xff]   ;;  %v6895_v29 = vld [vmem:[#allocation7 + $0x130] ss:$48 sps:$4 sm:$0xff]  }
  0xaf   : > { %2126 = vmatpush1.bf16.msra.mxu1 %v6838_v7  ;;  %2367 = vmatprep.subr.bf16.mxu0 %v6884_v23  ;;  %v6854_v28 = vld [vmem:[#allocation7 + $0x364] ss:$48 sps:$4 sm:$0xff]   ;;  %v6856_v31 = vld [vmem:[#allocation7 + $0x360] ss:$48 sps:$4 sm:$0xff]  }
  0xb0   : > { %2127 = vmatprep.subr.bf16.mxu1 %v6839_v8  ;;  %2395 = vmatprep.mubr.bf16.mxu0 %v8142_v20  ;;  %v6896_v30 = vld [vmem:[#allocation7 + $0x194] ss:$48 sps:$4 sm:$0xff]   ;;  %v6901_v33 = vld [vmem:[#allocation7 + $0x190] ss:$48 sps:$4 sm:$0xff]  }
  0xb1   : > { %v6857_v32 = vld [vmem:[#allocation7 + $0x3c4] ss:$48 sps:$4 sm:$0xff]   ;;  %v6859_v35 = vld [vmem:[#allocation7 + $0x3c0] ss:$48 sps:$4 sm:$0xff]  }
  0xb2   : > { %2368 = vmatpush1.bf16.msra.mxu0 %v6889_v25  ;;  %v6902_v34 = vld [vmem:[#allocation7 + $0x1f4] ss:$48 sps:$4 sm:$0xff]   ;;  %v6907_v37 = vld [vmem:[#allocation7 + $0x1f0] ss:$48 sps:$4 sm:$0xff]  }
  0xb3   : > { %2128 = vmatpush1.bf16.msra.mxu1 %v6841_v9  ;;  %2369 = vmatprep.subr.bf16.mxu0 %v6890_v26  ;;  %v6860_v36 = vld [vmem:[#allocation7 + $0x424] ss:$48 sps:$4 sm:$0xff]   ;;  %v6862_v39 = vld [vmem:[#allocation7 + $0x420] ss:$48 sps:$4 sm:$0xff]  }
  0xb4   : > { %2129 = vmatprep.subr.bf16.mxu1 %v6842_v10  ;;  %v6908_v38 = vld [vmem:[#allocation7 + $0x254] ss:$48 sps:$4 sm:$0xff]   ;;  %v6913_v41 = vld [vmem:[#allocation7 + $0x250] ss:$48 sps:$4 sm:$0xff]  }
  0xb5   : > { %v6863_v40 = vld [vmem:[#allocation7 + $0x484] ss:$48 sps:$4 sm:$0xff]   ;;  %v6865_v43 = vld [vmem:[#allocation7 + $0x480] ss:$48 sps:$4 sm:$0xff]  }
  0xb6   : > { %2370 = vmatpush1.bf16.msra.mxu0 %v6895_v29  ;;  %v6914_v42 = vld [vmem:[#allocation7 + $0x2b4] ss:$48 sps:$4 sm:$0xff]   ;;  %v6919_v45 = vld [vmem:[#allocation7 + $0x2b0] ss:$48 sps:$4 sm:$0xff]  }
  0xb7   : > { %2130 = vmatpush1.bf16.msra.mxu1 %v6844_v11  ;;  %2371 = vmatprep.subr.bf16.mxu0 %v6896_v30  ;;  %v6866_v44 = vld [vmem:[#allocation7 + $0x4e4] ss:$48 sps:$4 sm:$0xff]   ;;  %v6868_v47 = vld [vmem:[#allocation7 + $0x4e0] ss:$48 sps:$4 sm:$0xff]   ;;  %v7873_v30 = vmov 0  }
  0xb8   : > { %2131 = vmatprep.subr.bf16.mxu1 %v6845_v12  ;;  %v6920_v46 = vld [vmem:[#allocation7 + $0x314] ss:$48 sps:$4 sm:$0xff]   ;;  %v6925_v49 = vld [vmem:[#allocation7 + $0x310] ss:$48 sps:$4 sm:$0xff]  }
  0xb9   : > { %v6869_v48 = vld [vmem:[#allocation7 + $0x544] ss:$48 sps:$4 sm:$0xff]   ;;  %v6871_v51 = vld [vmem:[#allocation7 + $0x540] ss:$48 sps:$4 sm:$0xff]  }
  0xba   : > { %2372 = vmatpush1.bf16.msra.mxu0 %v6901_v33  ;;  %v6926_v50 = vld [vmem:[#allocation7 + $0x374] ss:$48 sps:$4 sm:$0xff]   ;;  %v6931_v53 = vld [vmem:[#allocation7 + $0x370] ss:$48 sps:$4 sm:$0xff]  }
  0xbb   : > { %2132 = vmatpush1.bf16.msra.mxu1 %v6847_v14  ;;  %2373 = vmatprep.subr.bf16.mxu0 %v6902_v34  ;;  %v6874_v52 = vld [vmem:[#allocation7 + $0x5a4] ss:$48 sps:$4 sm:$0xff]   ;;  %v6877_v54 = vld [vmem:[#allocation7 + $0x5a0] ss:$48 sps:$4 sm:$0xff]  }
  0xbc   : > { %2133 = vmatprep.subr.bf16.mxu1 %v6848_v15  ;;  %v6932_v55 = vld [vmem:[#allocation7 + $0x3d4] ss:$48 sps:$4 sm:$0xff]   ;;  %v6937_v61 = vld [vmem:[#allocation7 + $0x3d0] ss:$48 sps:$4 sm:$0xff]  }
  0xbd   : > { %v6882_v56 = vld [vmem:[#allocation7 + $0x604] ss:$48 sps:$4 sm:$0xff]   ;;  %v6880_v0 = vld [vmem:[#allocation7 + $0x600] ss:$48 sps:$4 sm:$0xff]  }
  0xbe   : > { %2374 = vmatpush1.bf16.msra.mxu0 %v6907_v37  ;;  %v303_v57 = vld [vmem:[%s8126_s7] sm:$0xff]  ;;  %v310_v59 = vld [vmem:[%s8126_s7 + $0x38] sm:$0xff]  ;;  %v313_v60 = vld [vmem:[%s8126_s7 + $0x50] sm:$0xff] }
  0xbf   : > { %2134 = vmatpush1.bf16.msra.mxu1 %v6850_v22  ;;  %2375 = vmatprep.subr.bf16.mxu0 %v6908_v38  ;;  %v6938_v62 = vld [vmem:[#allocation7 + $0x434] ss:$48 sps:$4 sm:$0xff]   ;;  %v8150_v63 = vpack.c.bf16 %v306_v58, %v303_v57  ;;  %v8152_v1 = vpack.c.bf16 %v313_v60, %v310_v59  ;;  %v6943_v3 = vld [vmem:[#allocation7 + $0x430] ss:$48 sps:$4 sm:$0xff]   ;;  %v6948_v57 = vld [vmem:[#allocation7 + $0x12c] ss:$48 sps:$4 sm:$0xff]  }
  0xc0   : > { %2135 = vmatprep.subr.bf16.mxu1 %v6851_v24  ;;  %v6888_v2 = vld [vmem:[#allocation7 + $0x664] ss:$48 sps:$4 sm:$0xff]   ;;  %v6886_v4 = vld [vmem:[#allocation7 + $0x660] ss:$48 sps:$4 sm:$0xff]   ;;  %v6946_v60 = vld [vmem:[#allocation7 + $0x128] ss:$48 sps:$4 sm:$0xff]  }
  0xc1   : > { %v6944_v5 = vld [vmem:[#allocation7 + $0x494] ss:$48 sps:$4 sm:$0xff]   ;;  %v6949_v10 = vld [vmem:[#allocation7 + $0x490] ss:$48 sps:$4 sm:$0xff]  }
  0xc2   : > { %2376 = vmatpush1.bf16.msra.mxu0 %v6913_v41  ;;  %v6894_v6 = vld [vmem:[#allocation7 + $0x6c4] ss:$48 sps:$4 sm:$0xff]   ;;  %v6892_v13 = vld [vmem:[#allocation7 + $0x6c0] ss:$48 sps:$4 sm:$0xff]   ;;  %v6930_v41 = vld [vmem:[#allocation7 + $0xc] ss:$48 sps:$4 sm:$0xff]  }
  0xc3   : > { %2136 = vmatpush1.bf16.msra.mxu1 %v6853_v27  ;;  %2377 = vmatprep.subr.bf16.mxu0 %v6914_v42  ;;  %v309_v7 = vld [vmem:[%s8126_s7 + $0x30] sm:$0xff]  ;;  %v312_v8 = vld [vmem:[%s8126_s7 + $0x48] sm:$0xff]  ;;  %v315_v19 = vld [vmem:[%s8126_s7 + $0x60] sm:$0xff] }
  0xc4   : > { %2137 = vmatprep.subr.bf16.mxu1 %v6854_v28  ;;  %v316_v9 = vld [vmem:[%s8126_s7 + $0x68] sm:$0xff]  ;;  %v8159_v12 = vpack.c.bf16 %v312_v8, %v309_v7  ;;  %v8166_v24 = vpack.c.bf16 %v315_v19, %v315_v19 }
  0xc5   : > { %v6950_v11 = vld [vmem:[#allocation7 + $0x4f4] ss:$48 sps:$4 sm:$0xff]   ;;  %v8161_v14 = vpack.c.bf16 %v316_v9, %v316_v9  ;;  %v6955_v16 = vld [vmem:[#allocation7 + $0x4f0] ss:$48 sps:$4 sm:$0xff]   ;;  %v6958_v8 = vld [vmem:[#allocation7 + $0x1e8] ss:$48 sps:$4 sm:$0xff]  }
  0xc6   : > { %2378 = vmatpush1.bf16.msra.mxu0 %v6919_v45  ;;  %v6900_v15 = vld [vmem:[#allocation7 + $0x724] ss:$48 sps:$4 sm:$0xff]   ;;  %v6898_v18 = vld [vmem:[#allocation7 + $0x720] ss:$48 sps:$4 sm:$0xff]   ;;  %v6928_v45 = vld [vmem:[#allocation7 + $0x8] ss:$48 sps:$4 sm:$0xff]  }
  0xc7   : > { %2138 = vmatpush1.bf16.msra.mxu1 %v6856_v31  ;;  %2379 = vmatprep.subr.bf16.mxu0 %v6920_v46  ;;  %v6956_v17 = vld [vmem:[#allocation7 + $0x554] ss:$48 sps:$4 sm:$0xff]   ;;  %v6961_v22 = vld [vmem:[#allocation7 + $0x550] ss:$48 sps:$4 sm:$0xff]   ;;  %v6936_v46 = vld [vmem:[#allocation7 + $0x6c] ss:$48 sps:$4 sm:$0xff]  }
  0xc8   : > { %2139 = vmatprep.subr.bf16.mxu1 %v6857_v32  ;;  %v6906_v21 = vld [vmem:[#allocation7 + $0x784] ss:$48 sps:$4 sm:$0xff]   ;;  %v6904_v25 = vld [vmem:[#allocation7 + $0x780] ss:$48 sps:$4 sm:$0xff]   ;;  %v6966_v9 = vld [vmem:[#allocation7 + $0x24c] ss:$48 sps:$4 sm:$0xff]  }
  0xc9   : > { %v6962_v23 = vld [vmem:[#allocation7 + $0x5b4] ss:$48 sps:$4 sm:$0xff]   ;;  %v6967_v27 = vld [vmem:[#allocation7 + $0x5b0] ss:$48 sps:$4 sm:$0xff]   ;;  %v6979_v19 = vld [vmem:[#allocation7 + $0x30c] ss:$48 sps:$4 sm:$0xff]  }
  0xca   : > { %2380 = vmatpush1.bf16.msra.mxu0 %v6925_v49  ;;  %v6912_v26 = vld [vmem:[#allocation7 + $0x7e4] ss:$48 sps:$4 sm:$0xff]   ;;  %v6910_v29 = vld [vmem:[#allocation7 + $0x7e0] ss:$48 sps:$4 sm:$0xff]   ;;  %v6934_v49 = vld [vmem:[#allocation7 + $0x68] ss:$48 sps:$4 sm:$0xff]  }
  0xcb   : > { %2140 = vmatpush1.bf16.msra.mxu1 %v6859_v35  ;;  %2381 = vmatprep.subr.bf16.mxu0 %v6926_v50  ;;  %v6970_v28 = vld [vmem:[#allocation7 + $0x614] ss:$48 sps:$4 sm:$0xff]   ;;  %v6968_v32 = vld [vmem:[#allocation7 + $0x610] ss:$48 sps:$4 sm:$0xff]  }
  0xcc   : > { %2141 = vmatprep.subr.bf16.mxu1 %v6860_v36  ;;  %v6918_v31 = vld [vmem:[#allocation7 + $0x844] ss:$48 sps:$4 sm:$0xff]   ;;  %v6916_v34 = vld [vmem:[#allocation7 + $0x840] ss:$48 sps:$4 sm:$0xff]  }
  0xcd   : > { %v6976_v33 = vld [vmem:[#allocation7 + $0x674] ss:$48 sps:$4 sm:$0xff]   ;;  %v6974_v36 = vld [vmem:[#allocation7 + $0x670] ss:$48 sps:$4 sm:$0xff]  }
  0xce   : > { %2382 = vmatpush1.bf16.msra.mxu0 %v6931_v53  ;;  %v6924_v35 = vld [vmem:[#allocation7 + $0x8a4] ss:$48 sps:$4 sm:$0xff]   ;;  %v6922_v38 = vld [vmem:[#allocation7 + $0x8a0] ss:$48 sps:$4 sm:$0xff]  }
  0xcf   : > { %2142 = vmatpush1.bf16.msra.mxu1 %v6862_v39  ;;  %2383 = vmatprep.subr.bf16.mxu0 %v6932_v55  ;;  %v6982_v37 = vld [vmem:[#allocation7 + $0x6d4] ss:$48 sps:$4 sm:$0xff]   ;;  %v6980_v42 = vld [vmem:[#allocation7 + $0x6d0] ss:$48 sps:$4 sm:$0xff]  }
  0xd0   : > { %2143 = vmatprep.subr.bf16.mxu1 %v6863_v40  ;;  %v305_v39 = vld [vmem:[%s8126_s7 + $0x10] sm:$0xff]  ;;  %v308_v40 = vld [vmem:[%s8126_s7 + $0x28] sm:$0xff]  ;;  %v311_v50 = vld [vmem:[%s8126_s7 + $0x40] sm:$0xff] }
  0xd1   : > { %v6992_v53 = vld [vmem:[#allocation7 + $0x790] ss:$48 sps:$4 sm:$0xff]   ;;  %v7006_v59 = vld [vmem:[#allocation7 + $0x854] ss:$48 sps:$4 sm:$0xff]  }
  0xd2   : > { %2384 = vmatpush1.bf16.msra.mxu0 %v6937_v61  ;;  %v6998_v58 = vld [vmem:[#allocation7 + $0x7f0] ss:$48 sps:$4 sm:$0xff]   ;;  %v7018_v7 = vld [vmem:[#allocation7 + $0x24] ss:$48 sps:$4 sm:$0xff]  }
  0xd3   : > { %2144 = vmatpush1.bf16.msra.mxu1 %v6865_v43  ;;  %2385 = vmatprep.subr.bf16.mxu0 %v6938_v62  ;;  %v6988_v43 = vld [vmem:[#allocation7 + $0x734] ss:$48 sps:$4 sm:$0xff]   ;;  %v6954_v62 = vld [vmem:[#allocation7 + $0x18c] ss:$48 sps:$4 sm:$0xff]  }
  0xd4   : > { %2145 = vmatprep.subr.bf16.mxu1 %v6866_v44  ;;  %v8174_v44 = vpack.c.bf16 %v308_v40, %v305_v39  ;;  %v317_v61 = vld [vmem:[%s8126_s7 + $0x70] sm:$0xff] }
  0xd5   : > { %v7052_v39 = vld [vmem:[#allocation7 + $0x260] ss:$48 sps:$4 sm:$0xff]   ;;  %v7060_v40 = vld [vmem:[#allocation7 + $0x2c4] ss:$48 sps:$4 sm:$0xff]  }
  0xd6   : > { %2386 = vmatpush1.bf16.msra.mxu0 %v6943_v3  ;;  %v8189_v3 = vpack.c.bf16 %v317_v61, %v317_v61  ;;  %v7082_v61 = vld [vmem:[#allocation7 + $0x440] ss:$48 sps:$4 sm:$0xff]  }
  0xd7   : > { %2146 = vmatpush1.bf16.msra.mxu1 %v6868_v47  ;;  %2387 = vmatprep.subr.bf16.mxu0 %v6944_v5  ;;  %v6986_v47 = vld [vmem:[#allocation7 + $0x730] ss:$48 sps:$4 sm:$0xff]   ;;  %v6960_v5 = vld [vmem:[#allocation7 + $0x1ec] ss:$48 sps:$4 sm:$0xff]  }
  0xd8   : > { %2147 = vmatprep.subr.bf16.mxu1 %v6869_v48  ;;  %v6994_v48 = vld [vmem:[#allocation7 + $0x794] ss:$48 sps:$4 sm:$0xff]  }
  0xda   : > { %2388 = vmatpush1.bf16.msra.mxu0 %v6949_v10  ;;  %v7016_v10 = vld [vmem:[#allocation7 + $0x20] ss:$48 sps:$4 sm:$0xff]  }
  0xdb   : > { %2148 = vmatpush1.bf16.msra.mxu1 %v6871_v51  ;;  %2389 = vmatprep.subr.bf16.mxu0 %v6950_v11  ;;  %v314_v51 = vld [vmem:[%s8126_s7 + $0x58] sm:$0xff] }
  0xdc   : > { %2149 = vmatprep.subr.bf16.mxu1 %v6874_v52  ;;  %v6942_v52 = vld [vmem:[#allocation7 + $0xcc] ss:$48 sps:$4 sm:$0xff]   ;;  %v8182_v55 = vpack.c.bf16 %v314_v51, %v311_v50  ;;  %v7024_v11 = vld [vmem:[#allocation7 + $0x84] ss:$48 sps:$4 sm:$0xff]   ;;  %v7013_v50 = vld [vmem:[#allocation7 + $0x548] ss:$48 sps:$4 sm:$0xff]  }
  0xdd   : > { %v7021_v51 = vld [vmem:[#allocation7 + $0x5ac] ss:$48 sps:$4 sm:$0xff]  }
  0xde   : > { %2390 = vmatpush1.bf16.msra.mxu0 %v6955_v16  ;;  %v7022_v16 = vld [vmem:[#allocation7 + $0x80] ss:$48 sps:$4 sm:$0xff]  }
  0xdf   : > { %2150 = vmatpush1.bf16.msra.mxu1 %v6877_v54  ;;  %2391 = vmatprep.subr.bf16.mxu0 %v6956_v17  ;;  %v7000_v54 = vld [vmem:[#allocation7 + $0x7f4] ss:$48 sps:$4 sm:$0xff]  }
  0xe0   : > { %2180 = vmatprep.subr.bf16.mxu1 %v6882_v56  ;;  %v6940_v56 = vld [vmem:[#allocation7 + $0xc8] ss:$48 sps:$4 sm:$0xff]   ;;  %v7030_v17 = vld [vmem:[#allocation7 + $0xe4] ss:$48 sps:$4 sm:$0xff]  }
  0xe2   : > { %2152 = vmatmul.mubr.bf16.vlgmr.msra.gmra.mrb[0].mxu1 %v8150_v63  ;;  %2392 = vmatpush1.bf16.msra.mxu0 %v6961_v22  ;;  %v7036_v22 = vld [vmem:[#allocation7 + $0x144] ss:$48 sps:$4 sm:$0xff]  }
  0xe3   : > { %2181 = vmatpush1.bf16.msra.mxu1 %v6880_v0  ;;  %2161 = vmatprep.mubr.bf16.mxu1 %v8152_v1  ;;  %v7004_v0 = vld [vmem:[#allocation7 + $0x850] ss:$48 sps:$4 sm:$0xff]  }
  0xe4   : > { %2182 = vmatprep.subr.bf16.mxu1 %v6888_v2  ;;  %2393 = vmatprep.subr.bf16.mxu0 %v6962_v23  ;;  %v7012_v2 = vld [vmem:[#allocation7 + $0x8b4] ss:$48 sps:$4 sm:$0xff]   ;;  %v6977_v23 = vld [vmem:[#allocation7 + $0x308] ss:$48 sps:$4 sm:$0xff]  }
  0xe6   : > { %2394 = vmatpush1.bf16.msra.mxu0 %v6967_v27  ;;  %v7042_v27 = vld [vmem:[#allocation7 + $0x1a4] ss:$48 sps:$4 sm:$0xff]  }
  0xe7   : > { %2183 = vmatpush1.bf16.msra.mxu1 %v6886_v4  ;;  %2424 = vmatprep.subr.bf16.mxu0 %v6970_v28  ;;  %v6952_v4 = vld [vmem:[#allocation7 + $0x188] ss:$48 sps:$4 sm:$0xff]  }
  0xe8   : > { %2184 = vmatprep.subr.bf16.mxu1 %v6894_v6  ;;  %v7010_v6 = vld [vmem:[#allocation7 + $0x8b0] ss:$48 sps:$4 sm:$0xff]   ;;  %v6983_v28 = vld [vmem:[#allocation7 + $0x368] ss:$48 sps:$4 sm:$0xff]  }
  0xe9   : > { %2396 = vmatmul.mubr.bf16.vlgmr.msra.gmra.mrb[0].mxu0 %v8150_v63 }
  0xea   : > { %2162 = vmatmul.mubr.bf16.gmra.mrb[4].mxu1 %v8159_v12  ;;  %2425 = vmatpush1.bf16.msra.mxu0 %v6968_v32  ;;  %v7048_v32 = vld [vmem:[#allocation7 + $0x204] ss:$48 sps:$4 sm:$0xff]  }
  0xeb   : > { %2185 = vmatpush1.bf16.msra.mxu1 %v6892_v13  ;;  %2171 = vmatprep.mubr.bf16.mxu1 %v8161_v14  ;;  %v6964_v13 = vld [vmem:[#allocation7 + $0x248] ss:$48 sps:$4 sm:$0xff]  }
  0xec   : > { %2186 = vmatprep.subr.bf16.mxu1 %v6900_v15  ;;  %2426 = vmatprep.subr.bf16.mxu0 %v6976_v33  ;;  %v6973_v15 = vld [vmem:[#allocation7 + $0x2ac] ss:$48 sps:$4 sm:$0xff]   ;;  %v6989_v33 = vld [vmem:[#allocation7 + $0x3c8] ss:$48 sps:$4 sm:$0xff]  }
  0xed   : > { %2405 = vmatprep.mubr.bf16.mxu0 %v8152_v1 }
  0xee   : > { %2427 = vmatpush1.bf16.msra.mxu0 %v6974_v36  ;;  %v7054_v36 = vld [vmem:[#allocation7 + $0x264] ss:$48 sps:$4 sm:$0xff]  }
  0xef   : > { %2187 = vmatpush1.bf16.msra.mxu1 %v6898_v18  ;;  %2428 = vmatprep.subr.bf16.mxu0 %v6982_v37  ;;  %v6971_v18 = vld [vmem:[#allocation7 + $0x2a8] ss:$48 sps:$4 sm:$0xff]  }
  0xf0   : > { %2188 = vmatprep.subr.bf16.mxu1 %v6906_v21  ;;  %v7028_v21 = vld [vmem:[#allocation7 + $0xe0] ss:$48 sps:$4 sm:$0xff]   ;;  %v6995_v37 = vld [vmem:[#allocation7 + $0x428] ss:$48 sps:$4 sm:$0xff]  }
  0xf1   : > { %2406 = vmatmul.mubr.bf16.gmra.mrb[4].mxu0 %v8159_v12 }
  0xf2   : > { %2172 = vmatmul.mubr.bf16.gmra.mrb[8].mxu1 %v8166_v24  ;;  %2429 = vmatpush1.bf16.msra.mxu0 %v6980_v42  ;;  %v7009_v42 = vld [vmem:[#allocation7 + $0x4ec] ss:$48 sps:$4 sm:$0xff]  }
  0xf3   : > { %2189 = vmatpush1.bf16.msra.mxu1 %v6904_v25  ;;  %2212 = vmatprep.mubr.bf16.mxu1 %v7873_v30  ;;  %v6985_v25 = vld [vmem:[#allocation7 + $0x36c] ss:$48 sps:$4 sm:$0xff]  }
  0xf4   : > { %2190 = vmatprep.subr.bf16.mxu1 %v6912_v26  ;;  %2430 = vmatprep.subr.bf16.mxu0 %v6988_v43  ;;  %v7034_v26 = vld [vmem:[#allocation7 + $0x140] ss:$48 sps:$4 sm:$0xff]  }
  0xf5   : > { %2415 = vmatprep.mubr.bf16.mxu0 %v8161_v14  ;;  %v7058_v43 = vld [vmem:[#allocation7 + $0x2c0] ss:$48 sps:$4 sm:$0xff]  }
  0xf6   : > { %2431 = vmatpush1.bf16.msra.mxu0 %v6986_v47  ;;  %v7015_v47 = vld [vmem:[#allocation7 + $0x54c] ss:$48 sps:$4 sm:$0xff]  }
  0xf7   : > { %2191 = vmatpush1.bf16.msra.mxu1 %v6910_v29  ;;  %2432 = vmatprep.subr.bf16.mxu0 %v6994_v48  ;;  %v6991_v29 = vld [vmem:[#allocation7 + $0x3cc] ss:$48 sps:$4 sm:$0xff]   ;;  %v7064_v48 = vld [vmem:[#allocation7 + $0x320] ss:$48 sps:$4 sm:$0xff]  }
  0xf8   : > { %2192 = vmatprep.subr.bf16.mxu1 %v6918_v31  ;;  %v7040_v31 = vld [vmem:[#allocation7 + $0x1a0] ss:$48 sps:$4 sm:$0xff]  }
  0xf9   : > { %2416 = vmatmul.mubr.bf16.gmra.mrb[8].mxu0 %v8166_v24 }
  0xfa   : > { %2433 = vmatpush1.bf16.msra.mxu0 %v6992_v53  ;;  %2456 = vmatprep.mubr.bf16.mxu0 %v7873_v30  ;;  %v7078_v53 = vld [vmem:[#allocation7 + $0x3e4] ss:$48 sps:$4 sm:$0xff]  }
  0xfb   : > { %2193 = vmatpush1.bf16.msra.mxu1 %v6916_v34  ;;  %2434 = vmatprep.subr.bf16.mxu0 %v7000_v54  ;;  %v6997_v34 = vld [vmem:[#allocation7 + $0x42c] ss:$48 sps:$4 sm:$0xff]   ;;  %v7019_v54 = vld [vmem:[#allocation7 + $0x5a8] ss:$48 sps:$4 sm:$0xff]  }
  0xfc   : > { %2194 = vmatprep.subr.bf16.mxu1 %v6924_v35  ;;  %v7046_v35 = vld [vmem:[#allocation7 + $0x200] ss:$48 sps:$4 sm:$0xff]  }
  0xfe   : > { %2435 = vmatpush1.bf16.msra.mxu0 %v6998_v58  ;;  %v7084_v58 = vld [vmem:[#allocation7 + $0x444] ss:$48 sps:$4 sm:$0xff]  }
  0xff   : > { %2195 = vmatpush1.bf16.msra.mxu1 %v6922_v38  ;;  %2436 = vmatprep.subr.bf16.mxu0 %v7006_v59  ;;  %v7003_v38 = vld [vmem:[#allocation7 + $0x48c] ss:$48 sps:$4 sm:$0xff]   ;;  %v7025_v59 = vld [vmem:[#allocation7 + $0x608] ss:$48 sps:$4 sm:$0xff]  }
 0x100   : > { %2241 = vmatprep.subr.bf16.mxu1 %v6930_v41  ;;  %v7001_v41 = vld [vmem:[#allocation7 + $0x488] ss:$48 sps:$4 sm:$0xff]  }
 0x102   : > { %2213 = vmatmul.mubr.bf16.vlgmr.msra.gmra.mrb[0].mxu1 %v8174_v44  ;;  %2437 = vmatpush1.bf16.msra.mxu0 %v7004_v0  ;;  %v7031_v0 = vld [vmem:[#allocation7 + $0x668] ss:$48 sps:$4 sm:$0xff]  }
 0x103   : > { %2242 = vmatpush1.bf16.msra.mxu1 %v6928_v45  ;;  %2222 = vmatprep.mubr.bf16.mxu1 %v7873_v30  ;;  %v7066_v45 = vld [vmem:[#allocation7 + $0x324] ss:$48 sps:$4 sm:$0xff]  }
 0x104   : > { %2243 = vmatprep.subr.bf16.mxu1 %v6936_v46  ;;  %2438 = vmatprep.subr.bf16.mxu0 %v7012_v2  ;;  %v7007_v46 = vld [vmem:[#allocation7 + $0x4e8] ss:$48 sps:$4 sm:$0xff]   ;;  %v7039_v2 = vld [vmem:[#allocation7 + $0x6cc] ss:$48 sps:$4 sm:$0xff]  }
 0x106   : > { %2439 = vmatpush1.bf16.msra.mxu0 %v7010_v6  ;;  %v7037_v6 = vld [vmem:[#allocation7 + $0x6c8] ss:$48 sps:$4 sm:$0xff]  }
 0x107   : > { %2244 = vmatpush1.bf16.msra.mxu1 %v6934_v49  ;;  %2607 = vmatprep.subr.bf16.mxu0 %v7018_v7  ;;  %v7072_v49 = vld [vmem:[#allocation7 + $0x384] ss:$48 sps:$4 sm:$0xff]   ;;  %v7045_v7 = vld [vmem:[#allocation7 + $0x72c] ss:$48 sps:$4 sm:$0xff]  }
 0x108   : > { %2245 = vmatprep.subr.bf16.mxu1 %v6942_v52  ;;  %v7070_v52 = vld [vmem:[#allocation7 + $0x380] ss:$48 sps:$4 sm:$0xff]  }
 0x109   : > { %2457 = vmatmul.mubr.bf16.vlgmr.msra.gmra.mrb[0].mxu0 %v8174_v44 }
 0x10a   : > { %2223 = vmatmul.mubr.bf16.gmra.mrb[4].mxu1 %v8182_v55  ;;  %2608 = vmatpush1.bf16.msra.mxu0 %v7016_v10  ;;  %v7043_v10 = vld [vmem:[#allocation7 + $0x728] ss:$48 sps:$4 sm:$0xff]  }
 0x10b   : > { %2246 = vmatpush1.bf16.msra.mxu1 %v6940_v56  ;;  %2232 = vmatprep.mubr.bf16.mxu1 %v7873_v30  ;;  %v7027_v56 = vld [vmem:[#allocation7 + $0x60c] ss:$48 sps:$4 sm:$0xff]  }
 0x10c   : > { %2247 = vmatprep.subr.bf16.mxu1 %v6948_v57  ;;  %2609 = vmatprep.subr.bf16.mxu0 %v7024_v11  ;;  %v7076_v57 = vld [vmem:[#allocation7 + $0x3e0] ss:$48 sps:$4 sm:$0xff]   ;;  %v7051_v11 = vld [vmem:[#allocation7 + $0x78c] ss:$48 sps:$4 sm:$0xff]  }
 0x10d   : > { %2466 = vmatprep.mubr.bf16.mxu0 %v7873_v30 }
 0x10e   : > { %2610 = vmatpush1.bf16.msra.mxu0 %v7022_v16  ;;  %v7049_v16 = vld [vmem:[#allocation7 + $0x788] ss:$48 sps:$4 sm:$0xff]  }
 0x10f   : > { %2248 = vmatpush1.bf16.msra.mxu1 %v6946_v60  ;;  %2611 = vmatprep.subr.bf16.mxu0 %v7030_v17  ;;  %v7033_v60 = vld [vmem:[#allocation7 + $0x66c] ss:$48 sps:$4 sm:$0xff]  }
 0x110   : > { %2249 = vmatprep.subr.bf16.mxu1 %v6954_v62  ;;  %v7090_v62 = vld [vmem:[#allocation7 + $0x4a4] ss:$48 sps:$4 sm:$0xff]   ;;  %v7057_v17 = vld [vmem:[#allocation7 + $0x7ec] ss:$48 sps:$4 sm:$0xff]  }
 0x111   : > { %2467 = vmatmul.mubr.bf16.gmra.mrb[4].mxu0 %v8182_v55 }
 0x112   : > { %2233 = vmatmul.mubr.bf16.gmra.mrb[8].mxu1 %v8189_v3  ;;  %2612 = vmatpush1.bf16.msra.mxu0 %v7028_v21  ;;  %v7055_v21 = vld [vmem:[#allocation7 + $0x7e8] ss:$48 sps:$4 sm:$0xff]  }
 0x113   : > { %2250 = vmatpush1.bf16.msra.mxu1 %v6952_v4  ;;  %2273 = vmatprep.mubr.bf16.mxu1 %v8142_v20  ;;  %v7088_v4 = vld [vmem:[#allocation7 + $0x4a0] ss:$48 sps:$4 sm:$0xff]  }
 0x114   : > { %2251 = vmatprep.subr.bf16.mxu1 %v6960_v5  ;;  %2613 = vmatprep.subr.bf16.mxu0 %v7036_v22  ;;  %v7096_v5 = vld [vmem:[#allocation7 + $0x504] ss:$48 sps:$4 sm:$0xff]   ;;  %v7063_v22 = vld [vmem:[#allocation7 + $0x84c] ss:$48 sps:$4 sm:$0xff]  }
 0x115   : > { %2476 = vmatprep.mubr.bf16.mxu0 %v7873_v30 }
 0x116   : > { %2614 = vmatpush1.bf16.msra.mxu0 %v7034_v26  ;;  %v7061_v26 = vld [vmem:[#allocation7 + $0x848] ss:$48 sps:$4 sm:$0xff]  }
 0x117   : > { %2252 = vmatpush1.bf16.msra.mxu1 %v6958_v8  ;;  %2615 = vmatprep.subr.bf16.mxu0 %v7042_v27  ;;  %v7094_v8 = vld [vmem:[#allocation7 + $0x500] ss:$48 sps:$4 sm:$0xff]   ;;  %v7069_v27 = vld [vmem:[#allocation7 + $0x8ac] ss:$48 sps:$4 sm:$0xff]  }
 0x118   : > { %2253 = vmatprep.subr.bf16.mxu1 %v6966_v9  ;;  %v7102_v9 = vld [vmem:[#allocation7 + $0x564] ss:$48 sps:$4 sm:$0xff]  }
 0x119   : > { %2477 = vmatmul.mubr.bf16.gmra.mrb[8].mxu0 %v8189_v3 }
 0x11a   : > { %2616 = vmatpush1.bf16.msra.mxu0 %v7040_v31  ;;  %2639 = vmatprep.mubr.bf16.mxu0 %v8142_v20  ;;  %v7067_v31 = vld [vmem:[#allocation7 + $0x8a8] ss:$48 sps:$4 sm:$0xff]  }
 0x11b   : > { %2254 = vmatpush1.bf16.msra.mxu1 %v6964_v13  ;;  %2617 = vmatprep.subr.bf16.mxu0 %v7048_v32  ;;  %v7100_v13 = vld [vmem:[#allocation7 + $0x560] ss:$48 sps:$4 sm:$0xff]   ;;  %v7075_v32 = vld [vmem:[#allocation7 + $0x1c] ss:$48 sps:$4 sm:$0xff]  }
 0x11c   : > { %2255 = vmatprep.subr.bf16.mxu1 %v6973_v15  ;;  %v7108_v15 = vld [vmem:[#allocation7 + $0x5c4] ss:$48 sps:$4 sm:$0xff]  }
 0x11e   : > { %2618 = vmatpush1.bf16.msra.mxu0 %v7046_v35  ;;  %v7073_v35 = vld [vmem:[#allocation7 + $0x18] ss:$48 sps:$4 sm:$0xff]  }
 0x11f   : > { %2256 = vmatpush1.bf16.msra.mxu1 %v6971_v18  ;;  %2619 = vmatprep.subr.bf16.mxu0 %v7054_v36  ;;  %v7106_v18 = vld [vmem:[#allocation7 + $0x5c0] ss:$48 sps:$4 sm:$0xff]   ;;  %v7081_v36 = vld [vmem:[#allocation7 + $0x7c] ss:$48 sps:$4 sm:$0xff]  }
 0x120   : > { %2257 = vmatprep.subr.bf16.mxu1 %v6979_v19  ;;  %v7114_v19 = vld [vmem:[#allocation7 + $0x624] ss:$48 sps:$4 sm:$0xff]  }
 0x122   : > { %2620 = vmatpush1.bf16.msra.mxu0 %v7052_v39  ;;  %v7079_v39 = vld [vmem:[#allocation7 + $0x78] ss:$48 sps:$4 sm:$0xff]  }
 0x123   : > { %2258 = vmatpush1.bf16.msra.mxu1 %v6977_v23  ;;  %2621 = vmatprep.subr.bf16.mxu0 %v7060_v40  ;;  %v7112_v23 = vld [vmem:[#allocation7 + $0x620] ss:$48 sps:$4 sm:$0xff]   ;;  %v7087_v40 = vld [vmem:[#allocation7 + $0xdc] ss:$48 sps:$4 sm:$0xff]  }
 0x124   : > { %2259 = vmatprep.subr.bf16.mxu1 %v6985_v25  ;;  %v7120_v25 = vld [vmem:[#allocation7 + $0x684] ss:$48 sps:$4 sm:$0xff]  }
 0x126   : > { %2622 = vmatpush1.bf16.msra.mxu0 %v7058_v43  ;;  %v7085_v43 = vld [vmem:[#allocation7 + $0xd8] ss:$48 sps:$4 sm:$0xff]  }
 0x127   : > { %2260 = vmatpush1.bf16.msra.mxu1 %v6983_v28  ;;  %2623 = vmatprep.subr.bf16.mxu0 %v7066_v45  ;;  %v7118_v28 = vld [vmem:[#allocation7 + $0x680] ss:$48 sps:$4 sm:$0xff]   ;;  %v7093_v45 = vld [vmem:[#allocation7 + $0x13c] ss:$48 sps:$4 sm:$0xff]  }
 0x128   : > { %2261 = vmatprep.subr.bf16.mxu1 %v6991_v29  ;;  %v7126_v29 = vld [vmem:[#allocation7 + $0x6e4] ss:$48 sps:$4 sm:$0xff]  }
 0x12a   : > { %2624 = vmatpush1.bf16.msra.mxu0 %v7064_v48  ;;  %v7150_v48 = vld [vmem:[#allocation7 + $0x864] ss:$48 sps:$4 sm:$0xff]  }
 0x12b   : > { %2262 = vmatpush1.bf16.msra.mxu1 %v6989_v33  ;;  %2625 = vmatprep.subr.bf16.mxu0 %v7072_v49  ;;  %v7124_v33 = vld [vmem:[#allocation7 + $0x6e0] ss:$48 sps:$4 sm:$0xff]   ;;  %v7099_v49 = vld [vmem:[#allocation7 + $0x19c] ss:$48 sps:$4 sm:$0xff]  }
 0x12c   : > { %2263 = vmatprep.subr.bf16.mxu1 %v6997_v34  ;;  %v7132_v34 = vld [vmem:[#allocation7 + $0x744] ss:$48 sps:$4 sm:$0xff]  }
 0x12e   : > { %2626 = vmatpush1.bf16.msra.mxu0 %v7070_v52  ;;  %v7156_v52 = vld [vmem:[#allocation7 + $0x8c4] ss:$48 sps:$4 sm:$0xff]  }
 0x12f   : > { %2264 = vmatpush1.bf16.msra.mxu1 %v6995_v37  ;;  %2627 = vmatprep.subr.bf16.mxu0 %v7078_v53  ;;  %v7130_v37 = vld [vmem:[#allocation7 + $0x740] ss:$48 sps:$4 sm:$0xff]   ;;  %v7105_v53 = vld [vmem:[#allocation7 + $0x1fc] ss:$48 sps:$4 sm:$0xff]  }
 0x130   : > { %2265 = vmatprep.subr.bf16.mxu1 %v7003_v38  ;;  %v7138_v38 = vld [vmem:[#allocation7 + $0x7a4] ss:$48 sps:$4 sm:$0xff]  }
 0x132   : > { %2628 = vmatpush1.bf16.msra.mxu0 %v7076_v57  ;;  %v7103_v57 = vld [vmem:[#allocation7 + $0x1f8] ss:$48 sps:$4 sm:$0xff]  }
 0x133   : > { %2266 = vmatpush1.bf16.msra.mxu1 %v7001_v41  ;;  %2629 = vmatprep.subr.bf16.mxu0 %v7084_v58  ;;  %v7136_v41 = vld [vmem:[#allocation7 + $0x7a0] ss:$48 sps:$4 sm:$0xff]   ;;  %v7111_v58 = vld [vmem:[#allocation7 + $0x25c] ss:$48 sps:$4 sm:$0xff]  }
 0x134   : > { %2267 = vmatprep.subr.bf16.mxu1 %v7009_v42  ;;  %v7144_v42 = vld [vmem:[#allocation7 + $0x804] ss:$48 sps:$4 sm:$0xff]  }
 0x136   : > { %2630 = vmatpush1.bf16.msra.mxu0 %v7082_v61  ;;  %v7109_v61 = vld [vmem:[#allocation7 + $0x258] ss:$48 sps:$4 sm:$0xff]  }
 0x137   : > { %2268 = vmatpush1.bf16.msra.mxu1 %v7007_v46  ;;  %2631 = vmatprep.subr.bf16.mxu0 %v7090_v62  ;;  %v7142_v46 = vld [vmem:[#allocation7 + $0x800] ss:$48 sps:$4 sm:$0xff]   ;;  %v7117_v62 = vld [vmem:[#allocation7 + $0x2bc] ss:$48 sps:$4 sm:$0xff]  }
 0x138   : > { %2269 = vmatprep.subr.bf16.mxu1 %v7015_v47  ;;  %v7091_v47 = vld [vmem:[#allocation7 + $0x138] ss:$48 sps:$4 sm:$0xff]  }
 0x13a   : > { %2632 = vmatpush1.bf16.msra.mxu0 %v7088_v4  ;;  %v7115_v4 = vld [vmem:[#allocation7 + $0x2b8] ss:$48 sps:$4 sm:$0xff]  }
 0x13b   : > { %2270 = vmatpush1.bf16.msra.mxu1 %v7013_v50  ;;  %2633 = vmatprep.subr.bf16.mxu0 %v7096_v5  ;;  %v7148_v50 = vld [vmem:[#allocation7 + $0x860] ss:$48 sps:$4 sm:$0xff]   ;;  %v7123_v5 = vld [vmem:[#allocation7 + $0x31c] ss:$48 sps:$4 sm:$0xff]  }
 0x13c   : > { %2271 = vmatprep.subr.bf16.mxu1 %v7021_v51  ;;  %v7097_v51 = vld [vmem:[#allocation7 + $0x198] ss:$48 sps:$4 sm:$0xff]  }
 0x13e   : > { %2634 = vmatpush1.bf16.msra.mxu0 %v7094_v8  ;;  %v7121_v8 = vld [vmem:[#allocation7 + $0x318] ss:$48 sps:$4 sm:$0xff]  }
 0x13f   : > { %2272 = vmatpush1.bf16.msra.mxu1 %v7019_v54  ;;  %2635 = vmatprep.subr.bf16.mxu0 %v7102_v9  ;;  %v7154_v54 = vld [vmem:[#allocation7 + $0x8c0] ss:$48 sps:$4 sm:$0xff]   ;;  %v7129_v9 = vld [vmem:[#allocation7 + $0x37c] ss:$48 sps:$4 sm:$0xff]  }
 0x140   : > { %2302 = vmatprep.subr.bf16.mxu1 %v7027_v56  ;;  %v7165_v56 = vld [vmem:[#allocation10 + $0x4] ss:$12 sps:$4 sm:$0xff]  }
 0x142   : > { %2274 = vmatmul.mubr.bf16.vlgmr.msra.gmra.mrb[12].mxu1 %v8150_v63  ;;  %2636 = vmatpush1.bf16.msra.mxu0 %v7100_v13  ;;  %v7127_v13 = vld [vmem:[#allocation7 + $0x378] ss:$48 sps:$4 sm:$0xff]  }
 0x143   : > { %2303 = vmatpush1.bf16.msra.mxu1 %v7025_v59  ;;  %2283 = vmatprep.mubr.bf16.mxu1 %v8152_v1  ;;  %v7163_v59 = vld [vmem:[#allocation10] ss:$12 sps:$4 sm:$0xff]  }
 0x144   : > { %2304 = vmatprep.subr.bf16.mxu1 %v7033_v60  ;;  %2637 = vmatprep.subr.bf16.mxu0 %v7108_v15  ;;  %v7171_v60 = vld [vmem:[#allocation10 + $0x1c] ss:$12 sps:$4 sm:$0xff]   ;;  %v7135_v15 = vld [vmem:[#allocation7 + $0x3dc] ss:$48 sps:$4 sm:$0xff]  }
 0x146   : > { %2638 = vmatpush1.bf16.msra.mxu0 %v7106_v18  ;;  %v7133_v18 = vld [vmem:[#allocation7 + $0x3d8] ss:$48 sps:$4 sm:$0xff]  }
 0x147   : > { %2305 = vmatpush1.bf16.msra.mxu1 %v7031_v0  ;;  %2668 = vmatprep.subr.bf16.mxu0 %v7114_v19  ;;  %v7169_v0 = vld [vmem:[#allocation10 + $0x18] ss:$12 sps:$4 sm:$0xff]   ;;  %v7141_v19 = vld [vmem:[#allocation7 + $0x43c] ss:$48 sps:$4 sm:$0xff]  }
 0x148   : > { %2306 = vmatprep.subr.bf16.mxu1 %v7039_v2  ;;  %v7177_v2 = vld [vmem:[#allocation10 + $0x34] ss:$12 sps:$4 sm:$0xff]  }
 0x149   : > { %2640 = vmatmul.mubr.bf16.vlgmr.msra.gmra.mrb[12].mxu0 %v8150_v63 }
 0x14a   : > { %2284 = vmatmul.mubr.bf16.gmra.mrb[16].mxu1 %v8159_v12  ;;  %2669 = vmatpush1.bf16.msra.mxu0 %v7112_v23  ;;  %v7139_v23 = vld [vmem:[#allocation7 + $0x438] ss:$48 sps:$4 sm:$0xff]  }
 0x14b   : > { %2307 = vmatpush1.bf16.msra.mxu1 %v7037_v6  ;;  %2293 = vmatprep.mubr.bf16.mxu1 %v8161_v14  ;;  %v7175_v6 = vld [vmem:[#allocation10 + $0x30] ss:$12 sps:$4 sm:$0xff]  }
 0x14c   : > { %2308 = vmatprep.subr.bf16.mxu1 %v7045_v7  ;;  %2670 = vmatprep.subr.bf16.mxu0 %v7120_v25  ;;  %v7183_v7 = vld [vmem:[#allocation10 + $0x4c] ss:$12 sps:$4 sm:$0xff]   ;;  %v7147_v25 = vld [vmem:[#allocation7 + $0x49c] ss:$48 sps:$4 sm:$0xff]  }
 0x14d   : > { %2649 = vmatprep.mubr.bf16.mxu0 %v8152_v1 }
 0x14e   : > { %2671 = vmatpush1.bf16.msra.mxu0 %v7118_v28  ;;  %v7145_v28 = vld [vmem:[#allocation7 + $0x498] ss:$48 sps:$4 sm:$0xff]  }
 0x14f   : > { %2309 = vmatpush1.bf16.msra.mxu1 %v7043_v10  ;;  %2672 = vmatprep.subr.bf16.mxu0 %v7126_v29  ;;  %v7181_v10 = vld [vmem:[#allocation10 + $0x48] ss:$12 sps:$4 sm:$0xff]   ;;  %v7153_v29 = vld [vmem:[#allocation7 + $0x4fc] ss:$48 sps:$4 sm:$0xff]  }
 0x150   : > { %2310 = vmatprep.subr.bf16.mxu1 %v7051_v11  ;;  %v7189_v11 = vld [vmem:[#allocation10 + $0x64] ss:$12 sps:$4 sm:$0xff]  }
 0x151   : > { %2650 = vmatmul.mubr.bf16.gmra.mrb[16].mxu0 %v8159_v12 }
 0x152   : > { %2294 = vmatmul.mubr.bf16.gmra.mrb[20].mxu1 %v8166_v24  ;;  %2673 = vmatpush1.bf16.msra.mxu0 %v7124_v33  ;;  %v7151_v33 = vld [vmem:[#allocation7 + $0x4f8] ss:$48 sps:$4 sm:$0xff]  }
 0x153   : > { %2311 = vmatpush1.bf16.msra.mxu1 %v7049_v16  ;;  %2334 = vmatprep.mubr.bf16.mxu1 %v7873_v30  ;;  %v7187_v16 = vld [vmem:[#allocation10 + $0x60] ss:$12 sps:$4 sm:$0xff]  }
 0x154   : > { %2312 = vmatprep.subr.bf16.mxu1 %v7057_v17  ;;  %2674 = vmatprep.subr.bf16.mxu0 %v7132_v34  ;;  %v7195_v17 = vld [vmem:[#allocation10 + $0x7c] ss:$12 sps:$4 sm:$0xff]   ;;  %v7159_v34 = vld [vmem:[#allocation7 + $0x55c] ss:$48 sps:$4 sm:$0xff]  }
 0x155   : > { %2659 = vmatprep.mubr.bf16.mxu0 %v8161_v14 }
 0x156   : > { %2675 = vmatpush1.bf16.msra.mxu0 %v7130_v37  ;;  %v7157_v37 = vld [vmem:[#allocation7 + $0x558] ss:$48 sps:$4 sm:$0xff]  }
 0x157   : > { %2313 = vmatpush1.bf16.msra.mxu1 %v7055_v21  ;;  %2676 = vmatprep.subr.bf16.mxu0 %v7138_v38  ;;  %v7193_v21 = vld [vmem:[#allocation10 + $0x78] ss:$12 sps:$4 sm:$0xff]   ;;  %v7162_v38 = vld [vmem:[#allocation7 + $0x5bc] ss:$48 sps:$4 sm:$0xff]  }
 0x158   : > { %2314 = vmatprep.subr.bf16.mxu1 %v7063_v22  ;;  %v7201_v22 = vld [vmem:[#allocation10 + $0x94] ss:$12 sps:$4 sm:$0xff]  }
 0x159   : > { %2660 = vmatmul.mubr.bf16.gmra.mrb[20].mxu0 %v8166_v24 }
 0x15a   : > { %2677 = vmatpush1.bf16.msra.mxu0 %v7136_v41  ;;  %2700 = vmatprep.mubr.bf16.mxu0 %v7873_v30  ;;  %v7160_v41 = vld [vmem:[#allocation7 + $0x5b8] ss:$48 sps:$4 sm:$0xff]  }
 0x15b   : > { %2315 = vmatpush1.bf16.msra.mxu1 %v7061_v26  ;;  %2678 = vmatprep.subr.bf16.mxu0 %v7144_v42  ;;  %v7199_v26 = vld [vmem:[#allocation10 + $0x90] ss:$12 sps:$4 sm:$0xff]  }
 0x15c   : > { %2316 = vmatprep.subr.bf16.mxu1 %v7069_v27  ;;  %v7207_v27 = vld [vmem:[#allocation10 + $0xac] ss:$12 sps:$4 sm:$0xff]   ;;  %v7168_v42 = vld [vmem:[#allocation7 + $0x61c] ss:$48 sps:$4 sm:$0xff]  }
 0x15e   : > { %2679 = vmatpush1.bf16.msra.mxu0 %v7142_v46  ;;  %v7231_v46 = vld [vmem:[#allocation10 + $0x10c] ss:$12 sps:$4 sm:$0xff]  }
 0x15f   : > { %2317 = vmatpush1.bf16.msra.mxu1 %v7067_v31  ;;  %2680 = vmatprep.subr.bf16.mxu0 %v7150_v48  ;;  %v7205_v31 = vld [vmem:[#allocation10 + $0xa8] ss:$12 sps:$4 sm:$0xff]  }
 0x160   : > { %2485 = vmatprep.subr.bf16.mxu1 %v7075_v32  ;;  %v7213_v32 = vld [vmem:[#allocation10 + $0xc4] ss:$12 sps:$4 sm:$0xff]   ;;  %v7229_v48 = vld [vmem:[#allocation10 + $0x108] ss:$12 sps:$4 sm:$0xff]  }
 0x162   : > { %2335 = vmatmul.mubr.bf16.vlgmr.msra.gmra.mrb[12].mxu1 %v8174_v44  ;;  %2681 = vmatpush1.bf16.msra.mxu0 %v7148_v50  ;;  %v7172_v50 = vld [vmem:[#allocation7 + $0x678] ss:$48 sps:$4 sm:$0xff]  }
 0x163   : > { %2486 = vmatpush1.bf16.msra.mxu1 %v7073_v35  ;;  %2344 = vmatprep.mubr.bf16.mxu1 %v7873_v30  ;;  %v7211_v35 = vld [vmem:[#allocation10 + $0xc0] ss:$12 sps:$4 sm:$0xff]  }
 0x164   : > { %2487 = vmatprep.subr.bf16.mxu1 %v7081_v36  ;;  %2682 = vmatprep.subr.bf16.mxu0 %v7156_v52  ;;  %v7219_v36 = vld [vmem:[#allocation10 + $0xdc] ss:$12 sps:$4 sm:$0xff]   ;;  %v7235_v52 = vld [vmem:[#allocation10 + $0x120] ss:$12 sps:$4 sm:$0xff]  }
 0x166   : > { %2683 = vmatpush1.bf16.msra.mxu0 %v7154_v54  ;;  %v7178_v54 = vld [vmem:[#allocation7 + $0x6d8] ss:$48 sps:$4 sm:$0xff]  }
 0x167   : > { %2488 = vmatpush1.bf16.msra.mxu1 %v7079_v39  ;;  %4884 = vmatprep.subr.bf16.mxu0 %v7165_v56  ;;  %v7217_v39 = vld [vmem:[#allocation10 + $0xd8] ss:$12 sps:$4 sm:$0xff]   ;;  %v7186_v56 = vld [vmem:[#allocation7 + $0x73c] ss:$48 sps:$4 sm:$0xff]  }
 0x168   : > { %2489 = vmatprep.subr.bf16.mxu1 %v7087_v40  ;;  %v7225_v40 = vld [vmem:[#allocation10 + $0xf4] ss:$12 sps:$4 sm:$0xff]  }
 0x169   : > { %2701 = vmatmul.mubr.bf16.vlgmr.msra.gmra.mrb[12].mxu0 %v8174_v44 }
 0x16a   : > { %2345 = vmatmul.mubr.bf16.gmra.mrb[16].mxu1 %v8182_v55  ;;  %4885 = vmatpush1.bf16.msra.mxu0 %v7163_v59  ;;  %v7184_v59 = vld [vmem:[#allocation7 + $0x738] ss:$48 sps:$4 sm:$0xff]  }
 0x16b   : > { %2490 = vmatpush1.bf16.msra.mxu1 %v7085_v43  ;;  %2354 = vmatprep.mubr.bf16.mxu1 %v7873_v30  ;;  %v7223_v43 = vld [vmem:[#allocation10 + $0xf0] ss:$12 sps:$4 sm:$0xff]  }
 0x16c   : > { %2491 = vmatprep.subr.bf16.mxu1 %v7093_v45  ;;  %4886 = vmatprep.subr.bf16.mxu0 %v7171_v60  ;;  %v7166_v45 = vld [vmem:[#allocation7 + $0x618] ss:$48 sps:$4 sm:$0xff]   ;;  %v7192_v60 = vld [vmem:[#allocation7 + $0x79c] ss:$48 sps:$4 sm:$0xff]  }
 0x16d   : > { %2710 = vmatprep.mubr.bf16.mxu0 %v7873_v30 }
 0x16e   : > { %4887 = vmatpush1.bf16.msra.mxu0 %v7169_v0  ;;  %v7190_v0 = vld [vmem:[#allocation7 + $0x798] ss:$48 sps:$4 sm:$0xff]  }
 0x16f   : > { %2492 = vmatpush1.bf16.msra.mxu1 %v7091_v47  ;;  %4888 = vmatprep.subr.bf16.mxu0 %v7177_v2  ;;  %v7174_v47 = vld [vmem:[#allocation7 + $0x67c] ss:$48 sps:$4 sm:$0xff]  }
 0x170   : > { %2493 = vmatprep.subr.bf16.mxu1 %v7099_v49  ;;  %v7237_v49 = vld [vmem:[#allocation10 + $0x124] ss:$12 sps:$4 sm:$0xff]  }
 0x171   : > { %2711 = vmatmul.mubr.bf16.gmra.mrb[16].mxu0 %v8182_v55  ;;  %v7198_v2 = vld [vmem:[#allocation7 + $0x7fc] ss:$48 sps:$4 sm:$0xff]  }
 0x172   : > { %2355 = vmatmul.mubr.bf16.gmra.mrb[20].mxu1 %v8189_v3  ;;  %4889 = vmatpush1.bf16.msra.mxu0 %v7175_v6  ;;  %v7196_v6 = vld [vmem:[#allocation7 + $0x7f8] ss:$48 sps:$4 sm:$0xff]  }
 0x173   : > { %2494 = vmatpush1.bf16.msra.mxu1 %v7097_v51  ;;  %2517 = vmatprep.mubr.bf16.mxu1 %v8142_v20  ;;  %v7180_v51 = vld [vmem:[#allocation7 + $0x6dc] ss:$48 sps:$4 sm:$0xff]  }
 0x174   : > { %2495 = vmatprep.subr.bf16.mxu1 %v7105_v53  ;;  %4890 = vmatprep.subr.bf16.mxu0 %v7183_v7  ;;  %v7243_v53 = vld [vmem:[#allocation10 + $0x13c] ss:$12 sps:$4 sm:$0xff]   ;;  %v7204_v7 = vld [vmem:[#allocation7 + $0x85c] ss:$48 sps:$4 sm:$0xff]  }
 0x175   : > { %2720 = vmatprep.mubr.bf16.mxu0 %v7873_v30 }
 0x176   : > { %4891 = vmatpush1.bf16.msra.mxu0 %v7181_v10  ;;  %v7208_v10 = vld [vmem:[#allocation7 + $0x8b8] ss:$48 sps:$4 sm:$0xff]  }
 0x177   : > { %2496 = vmatpush1.bf16.msra.mxu1 %v7103_v57  ;;  %4892 = vmatprep.subr.bf16.mxu0 %v7189_v11  ;;  %v7241_v57 = vld [vmem:[#allocation10 + $0x138] ss:$12 sps:$4 sm:$0xff]   ;;  %v7216_v11 = vld [vmem:[#allocation7 + $0x2c] ss:$48 sps:$4 sm:$0xff]  }
 0x178   : > { %2497 = vmatprep.subr.bf16.mxu1 %v7111_v58  ;;  %v7249_v58 = vld [vmem:[#allocation10 + $0x154] ss:$12 sps:$4 sm:$0xff]  }
 0x179   : > { %2721 = vmatmul.mubr.bf16.gmra.mrb[20].mxu0 %v8189_v3 }
 0x17a   : > { %4893 = vmatpush1.bf16.msra.mxu0 %v7187_v16  ;;  %v7220_v16 = vld [vmem:[#allocation7 + $0x88] ss:$48 sps:$4 sm:$0xff]  }
 0x17b   : > { %2498 = vmatpush1.bf16.msra.mxu1 %v7109_v61  ;;  %4894 = vmatprep.subr.bf16.mxu0 %v7195_v17  ;;  %v7247_v61 = vld [vmem:[#allocation10 + $0x150] ss:$12 sps:$4 sm:$0xff]  }
 0x17c   : > { %2499 = vmatprep.subr.bf16.mxu1 %v7117_v62  ;;  %v7255_v62 = vld [vmem:[#allocation10 + $0x16c] ss:$12 sps:$4 sm:$0xff]   ;;  %v7228_v17 = vld [vmem:[#allocation7 + $0xec] ss:$48 sps:$4 sm:$0xff]  }
 0x17e   : > { %4895 = vmatpush1.bf16.msra.mxu0 %v7193_v21  ;;  %v7234_v21 = vld [vmem:[#allocation7 + $0x14c] ss:$48 sps:$4 sm:$0xff]  }
 0x17f   : > { %2500 = vmatpush1.bf16.msra.mxu1 %v7115_v4  ;;  %4896 = vmatprep.subr.bf16.mxu0 %v7201_v22  ;;  %v7253_v4 = vld [vmem:[#allocation10 + $0x168] ss:$12 sps:$4 sm:$0xff]  }
 0x180   : > { %2501 = vmatprep.subr.bf16.mxu1 %v7123_v5  ;;  %v7285_v5 = vld [vmem:[#allocation10 + $0x184] ss:$12 sps:$4 sm:$0xff]  }
 0x182   : > { %4897 = vmatpush1.bf16.msra.mxu0 %v7199_v26  ;;  %v7238_v26 = vld [vmem:[#allocation7 + $0x1a8] ss:$48 sps:$4 sm:$0xff]  }
 0x183   : > { %2502 = vmatpush1.bf16.msra.mxu1 %v7121_v8  ;;  %4898 = vmatprep.subr.bf16.mxu0 %v7207_v27  ;;  %v7202_v8 = vld [vmem:[#allocation7 + $0x858] ss:$48 sps:$4 sm:$0xff]   ;;  %v8234_v27 = vld [vmem:[#allocation9] sm:$0xff] }
 0x184   : > { %2503 = vmatprep.subr.bf16.mxu1 %v7129_v9  ;;  %v7210_v9 = vld [vmem:[#allocation7 + $0x8bc] ss:$48 sps:$4 sm:$0xff]  }
 0x186   : > { %4899 = vmatpush1.bf16.msra.mxu0 %v7205_v31 }
 0x187   : > { %2504 = vmatpush1.bf16.msra.mxu1 %v7127_v13  ;;  %4900 = vmatprep.subr.bf16.mxu0 %v7213_v32  ;;  %v7214_v13 = vld [vmem:[#allocation7 + $0x28] ss:$48 sps:$4 sm:$0xff]  }
 0x188   : > { %2505 = vmatprep.subr.bf16.mxu1 %v7135_v15  ;;  %v7222_v15 = vld [vmem:[#allocation7 + $0x8c] ss:$48 sps:$4 sm:$0xff]  }
 0x18a   : > { %4901 = vmatpush1.bf16.msra.mxu0 %v7211_v35 }
 0x18b   : > { %2506 = vmatpush1.bf16.msra.mxu1 %v7133_v18  ;;  %4902 = vmatprep.subr.bf16.mxu0 %v7219_v36  ;;  %v619_v18 = vlaneseq }
 0x18c   : > { %2507 = vmatprep.subr.bf16.mxu1 %v7141_v19  ;;  %v7226_v19 = vld [vmem:[#allocation7 + $0xe8] ss:$48 sps:$4 sm:$0xff]  }
 0x18d   : > { %v8230_v22 = vshrl.u32 %v619_v18, 7 }
 0x18e   : > { %4903 = vmatpush1.bf16.msra.mxu0 %v7217_v39  ;;  %v7250_v39 = vld [vmem:[#allocation7 + $0x268] ss:$48 sps:$4 sm:$0xff]  }
 0x18f   : > { %2508 = vmatpush1.bf16.msra.mxu1 %v7139_v23  ;;  %4904 = vmatprep.subr.bf16.mxu0 %v7225_v40  ;;  %v7232_v23 = vld [vmem:[#allocation7 + $0x148] ss:$48 sps:$4 sm:$0xff]   ;;  %v8240_v31 = vsub.s32 1, %v8230_v22  ;;  %v7258_v40 = vld [vmem:[#allocation7 + $0x2cc] ss:$48 sps:$4 sm:$0xff]  }
 0x190   : > { %2509 = vmatprep.subr.bf16.mxu1 %v7147_v25  ;;  %v7240_v25 = vld [vmem:[#allocation7 + $0x1ac] ss:$48 sps:$4 sm:$0xff]  }
 0x191   : > { %v8249_v35 = vrot.slane %v8234_v27, %v8240_v31 }
 0x192   : > { %4905 = vmatpush1.bf16.msra.mxu0 %v7223_v43 }
 0x193   : > { %2510 = vmatpush1.bf16.msra.mxu1 %v7145_v28  ;;  %4906 = vmatprep.subr.bf16.mxu0 %v7231_v46  ;;  %v8237_v28 = vsub.s32 0, %v8230_v22 }
 0x194   : > { %2511 = vmatprep.subr.bf16.mxu1 %v7153_v29  ;;  %v7246_v29 = vld [vmem:[#allocation7 + $0x20c] ss:$48 sps:$4 sm:$0xff]  }
 0x195   : > { %v8244_v32 = vrot.slane %v8234_v27, %v8237_v28 }
 0x196   : > { %4907 = vmatpush1.bf16.msra.mxu0 %v7229_v48 }
 0x197   : > { %2512 = vmatpush1.bf16.msra.mxu1 %v7151_v33  ;;  %4908 = vmatprep.subr.bf16.mxu0 %v7237_v49  ;;  %v7244_v33 = vld [vmem:[#allocation7 + $0x208] ss:$48 sps:$4 sm:$0xff]  }
 0x198   : > { %2513 = vmatprep.subr.bf16.mxu1 %v7159_v34  ;;  %v7252_v34 = vld [vmem:[#allocation7 + $0x26c] ss:$48 sps:$4 sm:$0xff]  }
 0x19a   : > { %4909 = vmatpush1.bf16.msra.mxu0 %v7235_v52 }
 0x19b   : > { %2514 = vmatpush1.bf16.msra.mxu1 %v7157_v37  ;;  %4910 = vmatprep.subr.bf16.mxu0 %v7243_v53 }
 0x19c   : > { %2515 = vmatprep.subr.bf16.mxu1 %v7162_v38 }
 0x19e   : > { %4911 = vmatpush1.bf16.msra.mxu0 %v7241_v57  ;;  %v7283_v57 = vld [vmem:[#allocation10 + $0x180] ss:$12 sps:$4 sm:$0xff]  }
 0x19f   : > { %2516 = vmatpush1.bf16.msra.mxu1 %v7160_v41  ;;  %4912 = vmatprep.subr.bf16.mxu0 %v7249_v58 }
 0x1a0   : > { %2546 = vmatprep.subr.bf16.mxu1 %v7168_v42 }
 0x1a2   : > { %2518 = vmatmul.mubr.bf16.vlgmr.msra.gmra.mrb[24].mxu1 %v8150_v63  ;;  %4913 = vmatpush1.bf16.msra.mxu0 %v7247_v61  ;;  %v7291_v61 = vld [vmem:[#allocation10 + $0x19c] ss:$12 sps:$4 sm:$0xff]  }
 0x1a3   : > { %2547 = vmatpush1.bf16.msra.mxu1 %v7166_v45  ;;  %2527 = vmatprep.mubr.bf16.mxu1 %v8152_v1 }
 0x1a4   : > { %2548 = vmatprep.subr.bf16.mxu1 %v7174_v47  ;;  %4914 = vmatprep.subr.bf16.mxu0 %v7255_v62  ;;  %v7256_v47 = vld [vmem:[#allocation7 + $0x2c8] ss:$48 sps:$4 sm:$0xff]  }
 0x1a6   : > { %4915 = vmatpush1.bf16.msra.mxu0 %v7253_v4 }
 0x1a7   : > { %2549 = vmatpush1.bf16.msra.mxu1 %v7172_v50  ;;  %4945 = vmatprep.subr.bf16.mxu0 %v7285_v5  ;;  %v7261_v50 = vld [vmem:[#allocation7 + $0x32c] ss:$48 sps:$4 sm:$0xff]  }
 0x1a8   : > { %2550 = vmatprep.subr.bf16.mxu1 %v7180_v51 }
 0x1aa   : > { %2528 = vmatmul.mubr.bf16.gmra.mrb[28].mxu1 %v8159_v12 }
 0x1ab   : > { %2551 = vmatpush1.bf16.msra.mxu1 %v7178_v54  ;;  %2537 = vmatprep.mubr.bf16.mxu1 %v8161_v14 }
 0x1ac   : > { %2552 = vmatprep.subr.bf16.mxu1 %v7186_v56  ;;  %v7259_v56 = vld [vmem:[#allocation7 + $0x328] ss:$48 sps:$4 sm:$0xff]  }
 0x1af   : > { %2553 = vmatpush1.bf16.msra.mxu1 %v7184_v59 }
 0x1b0   : > { %2554 = vmatprep.subr.bf16.mxu1 %v7192_v60  ;;  %v7264_v60 = vld [vmem:[#allocation7 + $0x38c] ss:$48 sps:$4 sm:$0xff]  }
 0x1b2   : > { %2538 = vmatmul.mubr.bf16.gmra.mrb[32].mxu1 %v8166_v24 }
 0x1b3   : > { %2555 = vmatpush1.bf16.msra.mxu1 %v7190_v0  ;;  %2578 = vmatprep.mubr.bf16.mxu1 %v7873_v30 }
 0x1b4   : > { %2556 = vmatprep.subr.bf16.mxu1 %v7198_v2 }
 0x1b7   : > { %2557 = vmatpush1.bf16.msra.mxu1 %v7196_v6  ;;  %v7262_v6 = vld [vmem:[#allocation7 + $0x388] ss:$48 sps:$4 sm:$0xff]  }
 0x1b8   : > { %2558 = vmatprep.subr.bf16.mxu1 %v7204_v7  ;;  %v7289_v7 = vld [vmem:[#allocation10 + $0x198] ss:$12 sps:$4 sm:$0xff]  }
 0x1bb   : > { %2559 = vmatpush1.bf16.msra.mxu1 %v7202_v8 }
 0x1bc   : > { %2560 = vmatprep.subr.bf16.mxu1 %v7210_v9 }
 0x1bf   : > { %2561 = vmatpush1.bf16.msra.mxu1 %v7208_v10  ;;  %v7267_v10 = vld [vmem:[#allocation7 + $0x3ec] ss:$48 sps:$4 sm:$0xff]  }
 0x1c0   : > { %2729 = vmatprep.subr.bf16.mxu1 %v7216_v11  ;;  %v7297_v11 = vld [vmem:[#allocation10 + $0x1b4] ss:$12 sps:$4 sm:$0xff]  }
 0x1c2   : > { %2579 = vmatmul.mubr.bf16.vlgmr.msra.gmra.mrb[24].mxu1 %v8174_v44 }
 0x1c3   : > { %2730 = vmatpush1.bf16.msra.mxu1 %v7214_v13  ;;  %2588 = vmatprep.mubr.bf16.mxu1 %v7873_v30  ;;  %v637_v13 = vsub.s32 4, %v8230_v22 }
 0x1c4   : > { %2731 = vmatprep.subr.bf16.mxu1 %v7222_v15 }
 0x1c7   : > { %2732 = vmatpush1.bf16.msra.mxu1 %v7220_v16 }
 0x1c8   : > { %2733 = vmatprep.subr.bf16.mxu1 %v7228_v17  ;;  %v641_v17 = vsub.s32 5, %v8230_v22 }
 0x1ca   : > { %2589 = vmatmul.mubr.bf16.gmra.mrb[28].mxu1 %v8182_v55 }
 0x1cb   : > { %2734 = vmatpush1.bf16.msra.mxu1 %v7226_v19  ;;  %2598 = vmatprep.mubr.bf16.mxu1 %v7873_v30 }
 0x1cc   : > { %2735 = vmatprep.subr.bf16.mxu1 %v7234_v21 }
 0x1cf   : > { %2736 = vmatpush1.bf16.msra.mxu1 %v7232_v23  ;;  %v7265_v23 = vld [vmem:[#allocation7 + $0x3e8] ss:$48 sps:$4 sm:$0xff]  }
 0x1d0   : > { %2737 = vmatprep.subr.bf16.mxu1 %v7240_v25  ;;  %v7295_v25 = vld [vmem:[#allocation10 + $0x1b0] ss:$12 sps:$4 sm:$0xff]  }
 0x1d2   : > { %2599 = vmatmul.mubr.bf16.gmra.mrb[32].mxu1 %v8189_v3 }
 0x1d3   : > { %2738 = vmatpush1.bf16.msra.mxu1 %v7238_v26  ;;  %2761 = vmatprep.mubr.bf16.mxu1 %v8142_v20 }
 0x1d4   : > { %2739 = vmatprep.subr.bf16.mxu1 %v7246_v29 }
 0x1d5   : > { %v2214_v36 = vpop.f32.mrb[0].mxu1 }
 0x1d6   : > { %v6523_v37 = vadd.f32 %v2214_v36, %v8244_v32  ;;  %v2216_v38 = vpop.f32.mrb[1].mxu1 }
 0x1d7   : > { %v6524_v41 = vadd.f32 %v2216_v38, %v8249_v35  ;;  %v2218_v42 = vpop.f32.mrb[2].mxu1  ;;  %2740 = vmatpush1.bf16.msra.mxu1 %v7244_v33  ;;  %v7270_v33 = vld [vmem:[#allocation7 + $0x44c] ss:$48 sps:$4 sm:$0xff]   ;;  %v8276_v38 = vrot.slane %v8234_v27, %v637_v13 }
 0x1d8   : > { %v6525_v43 = vadd.f32 %v2218_v42, %v8244_v32  ;;  %v2220_v45 = vpop.f32.mrb[3].mxu1  ;;  %2741 = vmatprep.subr.bf16.mxu1 %v7252_v34  ;;  %v2851_v48 = vmax.f32 %v6523_v37, 0.0  ;;  %v7303_v34 = vld [vmem:[#allocation10 + $0x1cc] ss:$12 sps:$4 sm:$0xff]   ;;  %v7301_v42 = vld [vmem:[#allocation10 + $0x1c8] ss:$12 sps:$4 sm:$0xff]  }
 0x1d9   : > { %v6526_v46 = vadd.f32 %v2220_v45, %v8249_v35  ;;  %v2852_v20 = vmax.f32 %v6524_v41, 0.0  ;;  %v7268_v41 = vld [vmem:[#allocation7 + $0x448] ss:$48 sps:$4 sm:$0xff]  }
 0x1da   : > { %v2863_v49 = vmax.f32 %v6525_v43, 0.0 }
 0x1db   : > { %v2864_v51 = vmax.f32 %v6526_v46, 0.0  ;;  %2742 = vmatpush1.bf16.msra.mxu1 %v7250_v39 }
 0x1dc   : > { %v8256_v52 = vpack.c.bf16 %v2863_v49, %v2851_v48  ;;  %2743 = vmatprep.subr.bf16.mxu1 %v7258_v40  ;;  %v8280_v40 = vrot.slane %v8234_v27, %v641_v17  ;;  %v2458_v45 = vpop.f32.mrb[0].mxu0 }
 0x1dd   : > { %v8258_v53 = vpack.c.bf16 %v2864_v51, %v2852_v20  ;;  %v2224_v54 = vpop.f32.mrb[4].mxu1  ;;  %v6543_v48 = vadd.f32 %v2458_v45, %v8276_v38  ;;  %v2460_v20 = vpop.f32.mrb[1].mxu0  ;;  %v7307_v51 = vld [vmem:[#allocation10 + $0x1e0] ss:$12 sps:$4 sm:$0xff]   ;;  %v7333_v45 = vld [vmem:[#allocation10 + $0x244] ss:$12 sps:$4 sm:$0xff]  }
 0x1de   : > { %v6527_v58 = vadd.f32 %v2224_v54, %v8244_v32  ;;  %v2226_v59 = vpop.f32.mrb[5].mxu1  ;;  %v6544_v49 = vadd.f32 %v2460_v20, %v8280_v40 }
 0x1df   : > { %v6528_v62 = vadd.f32 %v2226_v59, %v8249_v35  ;;  %v2228_v0 = vpop.f32.mrb[6].mxu1  ;;  %2744 = vmatpush1.bf16.msra.mxu1 %v7256_v47  ;;  %4916 = vmatprep.mubr.bf16.mxu0 %v8258_v53  ;;  %v7273_v47 = vld [vmem:[#allocation7 + $0x4ac] ss:$48 sps:$4 sm:$0xff]   ;;  %v2855_v54 = vmax.f32 %v6543_v48, 0.0  ;;  %v7271_v59 = vld [vmem:[#allocation7 + $0x4a8] ss:$48 sps:$4 sm:$0xff]  }
 0x1e0   : > { %v6529_v2 = vadd.f32 %v2228_v0, %v8244_v32  ;;  %v2230_v4 = vpop.f32.mrb[7].mxu1  ;;  %4917 = vmatmul.mubr.bf16.vlgmr.msra.gmra.mrb[24].mxu0 %v8256_v52  ;;  %2745 = vmatprep.subr.bf16.mxu1 %v7261_v50  ;;  %v2875_v8 = vmax.f32 %v6527_v58, 0.0  ;;  %v2462_v50 = vpop.f32.mrb[2].mxu0  ;;  %v7276_v0 = vld [vmem:[#allocation7 + $0x50c] ss:$48 sps:$4 sm:$0xff]  }
 0x1e1   : > { %v6530_v5 = vadd.f32 %v2230_v4, %v8249_v35  ;;  %4946 = vmatpush1.bf16.msra.mxu0 %v7283_v57  ;;  %v2876_v15 = vmax.f32 %v6528_v62, 0.0  ;;  %v2464_v57 = vpop.f32.mrb[3].mxu0  ;;  %v7315_v62 = vld [vmem:[#allocation10 + $0x1fc] ss:$12 sps:$4 sm:$0xff]  }
 0x1e2   : > { %v2887_v9 = vmax.f32 %v6529_v2, 0.0  ;;  %4947 = vmatprep.subr.bf16.mxu0 %v7291_v61  ;;  %v6546_v61 = vadd.f32 %v2464_v57, %v8280_v40  ;;  %v7294_v57 = vld [vmem:[#allocation7 + $0x68c] ss:$48 sps:$4 sm:$0xff]  }
 0x1e3   : > { %v2888_v16 = vmax.f32 %v6530_v5, 0.0  ;;  %2746 = vmatpush1.bf16.msra.mxu1 %v7259_v56  ;;  %v6545_v56 = vadd.f32 %v2462_v50, %v8276_v38  ;;  %v7331_v50 = vld [vmem:[#allocation10 + $0x240] ss:$12 sps:$4 sm:$0xff]  }
 0x1e4   : > { %v8268_v18 = vpack.c.bf16 %v2887_v9, %v2875_v8  ;;  %2747 = vmatprep.subr.bf16.mxu1 %v7264_v60  ;;  %v2856_v60 = vmax.f32 %v6544_v49, 0.0  ;;  %v2868_v4 = vmax.f32 %v6546_v61, 0.0  ;;  %v7321_v9 = vld [vmem:[#allocation10 + $0x214] ss:$12 sps:$4 sm:$0xff]  }
 0x1e5   : > { %v8270_v19 = vpack.c.bf16 %v2888_v16, %v2876_v15  ;;  %v2234_v21 = vpop.f32.mrb[8].mxu1  ;;  %4948 = vmatpush1.bf16.msra.mxu0 %v7289_v7  ;;  %v2867_v2 = vmax.f32 %v6545_v56, 0.0  ;;  %v7274_v7 = vld [vmem:[#allocation7 + $0x508] ss:$48 sps:$4 sm:$0xff]   ;;  %v7300_v61 = vld [vmem:[#allocation7 + $0x6ec] ss:$48 sps:$4 sm:$0xff]  }
 0x1e6   : > { %v6531_v26 = vadd.f32 %v2234_v21, %v8244_v32  ;;  %v2236_v29 = vpop.f32.mrb[9].mxu1  ;;  %4949 = vmatprep.subr.bf16.mxu0 %v7297_v11  ;;  %v8294_v8 = vpack.c.bf16 %v2868_v4, %v2856_v60  ;;  %v7279_v11 = vld [vmem:[#allocation7 + $0x56c] ss:$48 sps:$4 sm:$0xff]   ;;  %v7277_v21 = vld [vmem:[#allocation7 + $0x568] ss:$48 sps:$4 sm:$0xff]  }
 0x1e7   : > { %v6532_v36 = vadd.f32 %v2236_v29, %v8249_v35  ;;  %v2238_v37 = vpop.f32.mrb[10].mxu1  ;;  %2748 = vmatpush1.bf16.msra.mxu1 %v7262_v6  ;;  %4926 = vmatprep.mubr.bf16.mxu0 %v8270_v19  ;;  %v7309_v35 = vld [vmem:[#allocation10 + $0x1e4] ss:$12 sps:$4 sm:$0xff]   ;;  %v8292_v5 = vpack.c.bf16 %v2867_v2, %v2855_v54  ;;  %v7286_v54 = vld [vmem:[#allocation7 + $0x628] ss:$48 sps:$4 sm:$0xff]  }
 0x1e8   : > { %v2239_v39 = vpop.f32.mrb[11].mxu1  ;;  %4927 = vmatmul.mubr.bf16.gmra.mrb[28].mxu0 %v8268_v18  ;;  %2749 = vmatprep.subr.bf16.mxu1 %v7267_v10  ;;  %v2899_v43 = vmax.f32 %v6531_v26, 0.0  ;;  %v7313_v6 = vld [vmem:[#allocation10 + $0x1f8] ss:$12 sps:$4 sm:$0xff]   ;;  %v2468_v10 = vpop.f32.mrb[4].mxu0 }
 0x1e9   : > { %v2900_v32 = vmax.f32 %v6532_v36, 0.0  ;;  %4950 = vmatpush1.bf16.msra.mxu0 %v7295_v25  ;;  %v6547_v13 = vadd.f32 %v2468_v10, %v8276_v38  ;;  %v2470_v15 = vpop.f32.mrb[5].mxu0  ;;  %v7337_v56 = vld [vmem:[#allocation10 + $0x25c] ss:$12 sps:$4 sm:$0xff]   ;;  %v7347_v4 = vld [vmem:[#allocation10 + $0x28c] ss:$12 sps:$4 sm:$0xff]  }
 0x1ea   : > { %4951 = vmatprep.subr.bf16.mxu0 %v7303_v34  ;;  %v8288_v58 = vpack.c.bf16 %v2899_v43, %v2899_v43  ;;  %v6548_v16 = vadd.f32 %v2470_v15, %v8280_v40  ;;  %v2472_v17 = vpop.f32.mrb[6].mxu0  ;;  %v7327_v34 = vld [vmem:[#allocation10 + $0x22c] ss:$12 sps:$4 sm:$0xff]   ;;  %v7352_v10 = vld [vmem:[#allocation10 + $0x2a4] ss:$12 sps:$4 sm:$0xff]  }
 0x1eb   : > { %v8282_v46 = vpack.c.bf16 %v2900_v32, %v2900_v32  ;;  %2750 = vmatpush1.bf16.msra.mxu1 %v7265_v23  ;;  %v7319_v23 = vld [vmem:[#allocation10 + $0x210] ss:$12 sps:$4 sm:$0xff]   ;;  %v2879_v25 = vmax.f32 %v6547_v13, 0.0  ;;  %v6549_v26 = vadd.f32 %v2472_v17, %v8276_v38  ;;  %v2474_v29 = vpop.f32.mrb[7].mxu0 }
 0x1ec   : > { %2751 = vmatprep.subr.bf16.mxu1 %v7270_v33  ;;  %v7282_v33 = vld [vmem:[#allocation7 + $0x5cc] ss:$48 sps:$4 sm:$0xff]   ;;  %v2880_v36 = vmax.f32 %v6548_v16, 0.0  ;;  %v6550_v37 = vadd.f32 %v2474_v29, %v8280_v40  ;;  %v8304_v48 = vpop.f32.mrb[8].mxu0  ;;  %v7292_v60 = vld [vmem:[#allocation7 + $0x688] ss:$48 sps:$4 sm:$0xff]  }
 0x1ed   : > { %4936 = vmatprep.mubr.bf16.mxu0 %v8282_v46  ;;  %4952 = vmatpush1.bf16.msra.mxu0 %v7301_v42  ;;  %v2891_v39 = vmax.f32 %v6549_v26, 0.0  ;;  %v7325_v42 = vld [vmem:[#allocation10 + $0x228] ss:$12 sps:$4 sm:$0xff]   ;;  %v8306_v20 = vpop.f32.mrb[9].mxu0  ;;  %v7298_v2 = vld [vmem:[#allocation7 + $0x6e8] ss:$48 sps:$4 sm:$0xff]  }
 0x1ee   : > { %4953 = vmatprep.subr.bf16.mxu0 %v7309_v35  ;;  %v2892_v32 = vmax.f32 %v6550_v37, 0.0  ;;  %v7288_v35 = vld [vmem:[#allocation7 + $0x62c] ss:$48 sps:$4 sm:$0xff]   ;;  %v2482_v49 = vpop.f32.mrb[10].mxu0  ;;  %v7357_v13 = vld [vmem:[#allocation10 + $0x2bc] ss:$12 sps:$4 sm:$0xff]  }
 0x1ef   : > { %2752 = vmatpush1.bf16.msra.mxu1 %v7268_v41  ;;  %v7280_v41 = vld [vmem:[#allocation7 + $0x5c8] ss:$48 sps:$4 sm:$0xff]   ;;  %v8300_v43 = vpack.c.bf16 %v2891_v39, %v2879_v25  ;;  %v7318_v15 = vld [vmem:[#allocation7 + $0x80c] ss:$48 sps:$4 sm:$0xff]   ;;  %v7355_v16 = vld [vmem:[#allocation10 + $0x2b8] ss:$12 sps:$4 sm:$0xff]  }
 0x1f0   : > { %4937 = vmatmul.mubr.bf16.gmra.mrb[32].mxu0 %v8288_v58  ;;  %2753 = vmatprep.subr.bf16.mxu1 %v7273_v47  ;;  %v8302_v47 = vpack.c.bf16 %v2892_v32, %v2880_v36  ;;  %v7316_v17 = vld [vmem:[#allocation7 + $0x808] ss:$48 sps:$4 sm:$0xff]   ;;  %v7330_v26 = vld [vmem:[#allocation7 + $0x8cc] ss:$48 sps:$4 sm:$0xff]   ;;  %v7365_v29 = vld [vmem:[#allocation10 + $0x2e8] ss:$12 sps:$4 sm:$0xff]  }
 0x1f1   : > { %4954 = vmatpush1.bf16.msra.mxu0 %v7307_v51  ;;  %v2483_v51 = vpop.f32.mrb[11].mxu0  ;;  %v7367_v25 = vld [vmem:[#allocation10 + $0x2ec] ss:$12 sps:$4 sm:$0xff]   ;;  %v7338_v36 = vld [vmem:[#allocation10 + $0x8] ss:$12 sps:$4 sm:$0xff]  }
 0x1f2   : > { %4955 = vmatprep.subr.bf16.mxu0 %v7315_v62  ;;  %v7342_v62 = vld [vmem:[#allocation10 + $0x274] ss:$12 sps:$4 sm:$0xff]   ;;  %v7344_v32 = vld [vmem:[#allocation10 + $0xf8] ss:$12 sps:$4 sm:$0xff]  }
 0x1f3   : > { %2754 = vmatpush1.bf16.msra.mxu1 %v7271_v59  ;;  %v7335_v59 = vld [vmem:[#allocation10 + $0x258] ss:$12 sps:$4 sm:$0xff]   ;;  %v7339_v37 = vld [vmem:[#allocation10 + $0xe0] ss:$12 sps:$4 sm:$0xff]   ;;  %v7358_v49 = vld [vmem:[#allocation10 + $0x68] ss:$12 sps:$4 sm:$0xff]  }
 0x1f4   : > { %2755 = vmatprep.subr.bf16.mxu1 %v7276_v0  ;;  %v7340_v0 = vld [vmem:[#allocation10 + $0x270] ss:$12 sps:$4 sm:$0xff]   ;;  %v7343_v39 = vld [vmem:[#allocation10 + $0x20] ss:$12 sps:$4 sm:$0xff]  }
 0x1f5   : > { %4956 = vmatpush1.bf16.msra.mxu0 %v7313_v6  ;;  %v7306_v6 = vld [vmem:[#allocation7 + $0x74c] ss:$48 sps:$4 sm:$0xff]  }
 0x1f6   : > { %4957 = vmatprep.subr.bf16.mxu0 %v7321_v9  ;;  %v7304_v9 = vld [vmem:[#allocation7 + $0x748] ss:$48 sps:$4 sm:$0xff]  }
 0x1f7   : > { %2756 = vmatpush1.bf16.msra.mxu1 %v7274_v7  ;;  %v7345_v7 = vld [vmem:[#allocation10 + $0x288] ss:$12 sps:$4 sm:$0xff]   ;;  %v7359_v51 = vld [vmem:[#allocation10 + $0x140] ss:$12 sps:$4 sm:$0xff]  }
 0x1f8   : > { %2757 = vmatprep.subr.bf16.mxu1 %v7279_v11  ;;  %v7310_v11 = vld [vmem:[#allocation7 + $0x7a8] ss:$48 sps:$4 sm:$0xff]  }
 0x1f9   : > { %4958 = vmatpush1.bf16.msra.mxu0 %v7319_v23  ;;  %v7322_v23 = vld [vmem:[#allocation7 + $0x868] ss:$48 sps:$4 sm:$0xff]  }
 0x1fa   : > { %4959 = vmatprep.subr.bf16.mxu0 %v7327_v34  ;;  %v7334_v34 = vld [vmem:[#allocation10 + $0xc8] ss:$12 sps:$4 sm:$0xff]  }
 0x1fb   : > { %2758 = vmatpush1.bf16.msra.mxu1 %v7277_v21  ;;  %v7360_v21 = vld [vmem:[#allocation10 + $0x2d0] ss:$12 sps:$4 sm:$0xff]  }
 0x1fc   : > { %2759 = vmatprep.subr.bf16.mxu1 %v7282_v33  ;;  %v7328_v33 = vld [vmem:[#allocation7 + $0x8c8] ss:$48 sps:$4 sm:$0xff]  }
 0x1fd   : > { %4960 = vmatpush1.bf16.msra.mxu0 %v7325_v42  ;;  %v7349_v42 = vld [vmem:[#allocation10 + $0x110] ss:$12 sps:$4 sm:$0xff]  }
 0x1fe   : > { %4961 = vmatprep.subr.bf16.mxu0 %v7333_v45  ;;  %v7354_v45 = vld [vmem:[#allocation10 + $0x128] ss:$12 sps:$4 sm:$0xff]  }
 0x1ff   : > { %2760 = vmatpush1.bf16.msra.mxu1 %v7280_v41  ;;  %v7348_v41 = vld [vmem:[#allocation10 + $0x38] ss:$12 sps:$4 sm:$0xff]  }
 0x200   : > { %2790 = vmatprep.subr.bf16.mxu1 %v7288_v35  ;;  %v7353_v35 = vld [vmem:[#allocation10 + $0x50] ss:$12 sps:$4 sm:$0xff]  }
 0x201   : > { %4962 = vmatpush1.bf16.msra.mxu0 %v7331_v50  ;;  %v633_v50 = vsub.s32 3, %v8230_v22 }
 0x202   : > { %2762 = vmatmul.mubr.bf16.vlgmr.msra.gmra.mrb[36].mxu1 %v8150_v63  ;;  %4963 = vmatprep.subr.bf16.mxu0 %v7337_v56  ;;  %v7312_v63 = vld [vmem:[#allocation7 + $0x7ac] ss:$48 sps:$4 sm:$0xff]   ;;  %v7364_v56 = vld [vmem:[#allocation10 + $0x158] ss:$12 sps:$4 sm:$0xff]  }
 0x203   : > { %2791 = vmatpush1.bf16.msra.mxu1 %v7286_v54  ;;  %2771 = vmatprep.mubr.bf16.mxu1 %v8152_v1  ;;  %v7350_v1 = vld [vmem:[#allocation10 + $0x2a0] ss:$12 sps:$4 sm:$0xff]  }
 0x204   : > { %2792 = vmatprep.subr.bf16.mxu1 %v7294_v57  ;;  %v7363_v54 = vld [vmem:[#allocation10 + $0x80] ss:$12 sps:$4 sm:$0xff]  }
 0x205   : > { %4964 = vmatpush1.bf16.msra.mxu0 %v7335_v59 }
 0x206   : > { %4965 = vmatprep.subr.bf16.mxu0 %v7342_v62  ;;  %v7368_v62 = vld [vmem:[#allocation10 + $0x98] ss:$12 sps:$4 sm:$0xff]  }
 0x207   : > { %2793 = vmatpush1.bf16.msra.mxu1 %v7292_v60 }
 0x208   : > { %2794 = vmatprep.subr.bf16.mxu1 %v7300_v61 }
 0x209   : > { %4966 = vmatpush1.bf16.msra.mxu0 %v7340_v0 }
 0x20a   : > { %2772 = vmatmul.mubr.bf16.gmra.mrb[40].mxu1 %v8159_v12  ;;  %4967 = vmatprep.subr.bf16.mxu0 %v7347_v4  ;;  %v7362_v12 = vld [vmem:[#allocation10 + $0x2d4] ss:$12 sps:$4 sm:$0xff]  }
 0x20b   : > { %2795 = vmatpush1.bf16.msra.mxu1 %v7298_v2  ;;  %2781 = vmatprep.mubr.bf16.mxu1 %v8161_v14  ;;  %v7324_v14 = vld [vmem:[#allocation7 + $0x86c] ss:$48 sps:$4 sm:$0xff]  }
 0x20c   : > { %2796 = vmatprep.subr.bf16.mxu1 %v7306_v6  ;;  %v7369_v2 = vld [vmem:[#allocation10 + $0x170] ss:$12 sps:$4 sm:$0xff]  }
 0x20d   : > { %4968 = vmatpush1.bf16.msra.mxu0 %v7345_v7 }
 0x20e   : > { %4969 = vmatprep.subr.bf16.mxu0 %v7352_v10 }
 0x20f   : > { %2797 = vmatpush1.bf16.msra.mxu1 %v7304_v9 }
 0x210   : > { %2798 = vmatprep.subr.bf16.mxu1 %v7312_v63  ;;  %v7373_v63 = vld [vmem:[#allocation10 + $0xb0] ss:$12 sps:$4 sm:$0xff]  }
 0x211   : > { %4970 = vmatpush1.bf16.msra.mxu0 %v7350_v1  ;;  %v7374_v1 = vld [vmem:[#allocation10 + $0x248] ss:$12 sps:$4 sm:$0xff]  }
 0x212   : > { %2782 = vmatmul.mubr.bf16.gmra.mrb[44].mxu1 %v8166_v24  ;;  %4971 = vmatprep.subr.bf16.mxu0 %v7357_v13  ;;  %v7372_v24 = vld [vmem:[#allocation10 + $0x304] ss:$12 sps:$4 sm:$0xff]  }
 0x213   : > { %2799 = vmatpush1.bf16.msra.mxu1 %v7310_v11  ;;  %2822 = vmatprep.mubr.bf16.mxu1 %v7873_v30 }
 0x214   : > { %2800 = vmatprep.subr.bf16.mxu1 %v7318_v15  ;;  %v7370_v15 = vld [vmem:[#allocation10 + $0x300] ss:$12 sps:$4 sm:$0xff]  }
 0x215   : > { %4972 = vmatpush1.bf16.msra.mxu0 %v7355_v16 }
 0x216   : > { %4973 = vmatprep.subr.bf16.mxu0 %v7362_v12  ;;  %v7377_v12 = vld [vmem:[#allocation10 + $0x31c] ss:$12 sps:$4 sm:$0xff]  }
 0x217   : > { %2801 = vmatpush1.bf16.msra.mxu1 %v7316_v17 }
 0x218   : > { %2802 = vmatprep.subr.bf16.mxu1 %v7324_v14 }
 0x219   : > { %4974 = vmatpush1.bf16.msra.mxu0 %v7360_v21 }
 0x21a   : > { %4975 = vmatprep.subr.bf16.mxu0 %v7367_v25 }
 0x21b   : > { %2803 = vmatpush1.bf16.msra.mxu1 %v7322_v23  ;;  %v7378_v23 = vld [vmem:[#allocation10 + $0x188] ss:$12 sps:$4 sm:$0xff]  }
 0x21c   : > { %2804 = vmatprep.subr.bf16.mxu1 %v7330_v26 }
 0x21d   : > { %4976 = vmatpush1.bf16.msra.mxu0 %v7365_v29  ;;  %v7379_v29 = vld [vmem:[#allocation10 + $0x260] ss:$12 sps:$4 sm:$0xff]  }
 0x21e   : > { %5006 = vmatprep.subr.bf16.mxu0 %v7372_v24  ;;  %v7375_v24 = vld [vmem:[#allocation10 + $0x318] ss:$12 sps:$4 sm:$0xff]  }
 0x21f   : > { %2805 = vmatpush1.bf16.msra.mxu1 %v7328_v33 }
 0x220   : > { %6319 = vmatprep.subr.bf16.mxu1 %v7334_v34 }
 0x222   : > { %2823 = vmatmul.mubr.bf16.vlgmr.msra.gmra.mrb[36].mxu1 %v8174_v44  ;;  %v8319_v44 = vsub.s32 2, %v8230_v22 }
 0x223   : > { %6320 = vmatpush3.bf16.msra.mxu1 %v7338_v36  ;;  %2832 = vmatprep.mubr.bf16.mxu1 %v7873_v30 }
 0x224   : > { %6321 = vmatprep.subr.bf16.mxu1 %v7339_v37  ;;  %v7382_v37 = vld [vmem:[#allocation10 + $0x334] ss:$12 sps:$4 sm:$0xff]  }
 0x227   : > { %6322 = vmatpush3.bf16.msra.mxu1 %v7343_v39 }
 0x228   : > { %6323 = vmatprep.subr.bf16.mxu1 %v7344_v32 }
 0x22a   : > { %2833 = vmatmul.mubr.bf16.gmra.mrb[40].mxu1 %v8182_v55  ;;  %v8325_v55 = vrot.slane %v8234_v27, %v8319_v44 }
 0x22b   : > { %6324 = vmatpush3.bf16.msra.mxu1 %v7348_v41  ;;  %2842 = vmatprep.mubr.bf16.mxu1 %v7873_v30  ;;  %v8331_v30 = vrot.slane %v8234_v27, %v633_v50  ;;  %v7383_v41 = vld [vmem:[#allocation10 + $0x1a0] ss:$12 sps:$4 sm:$0xff]  }
 0x22c   : > { %6325 = vmatprep.subr.bf16.mxu1 %v7349_v42 }
 0x22f   : > { %6326 = vmatpush3.bf16.msra.mxu1 %v7353_v35  ;;  %v7384_v35 = vld [vmem:[#allocation10 + $0x278] ss:$12 sps:$4 sm:$0xff]  }
 0x230   : > { %6327 = vmatprep.subr.bf16.mxu1 %v7354_v45  ;;  %v8351_v45 = vld [vmem:[#allocation9 + $0x8] sm:$0xf] }
 0x232   : > { %2843 = vmatmul.mubr.bf16.gmra.mrb[44].mxu1 %v8189_v3 }
 0x233   : > { %6328 = vmatpush3.bf16.msra.mxu1 %v7358_v49  ;;  %5282 = vmatprep.mubr.bf16.mxu1 %v8258_v53 }
 0x234   : > { %6329 = vmatprep.subr.bf16.mxu1 %v7359_v51 }
 0x235   : > { %v2336_v57 = vpop.f32.mrb[12].mxu1 }
 0x236   : > { %v6533_v59 = vadd.f32 %v2336_v57, %v8325_v55  ;;  %v2338_v60 = vpop.f32.mrb[13].mxu1  ;;  %v7387_v57 = vld [vmem:[#allocation10 + $0x34c] ss:$12 sps:$4 sm:$0xff]  }
 0x237   : > { %v6534_v3 = vadd.f32 %v2338_v60, %v8331_v30  ;;  %v2340_v61 = vpop.f32.mrb[14].mxu1  ;;  %6330 = vmatpush3.bf16.msra.mxu1 %v7363_v54  ;;  %v7380_v54 = vld [vmem:[#allocation10 + $0x330] ss:$12 sps:$4 sm:$0xff]   ;;  %v7388_v60 = vld [vmem:[#allocation10 + $0x1b8] ss:$12 sps:$4 sm:$0xff]  }
 0x238   : > { %v6535_v0 = vadd.f32 %v2340_v61, %v8325_v55  ;;  %v2342_v53 = vpop.f32.mrb[15].mxu1  ;;  %6331 = vmatprep.subr.bf16.mxu1 %v7364_v56  ;;  %v2853_v4 = vmax.f32 %v6533_v59, 0.0 }
 0x239   : > { %v6536_v27 = vadd.f32 %v2342_v53, %v8331_v30  ;;  %v2854_v7 = vmax.f32 %v6534_v3, 0.0  ;;  %v8360_v3 = vrot.slane %v8351_v45, %v8237_v28 }
 0x23a   : > { %v2865_v6 = vmax.f32 %v6535_v0, 0.0 }
 0x23b   : > { %v2866_v9 = vmax.f32 %v6536_v27, 0.0  ;;  %6332 = vmatpush3.bf16.msra.mxu1 %v7368_v62  ;;  %v7389_v62 = vld [vmem:[#allocation10 + $0x290] ss:$12 sps:$4 sm:$0xff]  }
 0x23c   : > { %v8337_v10 = vpack.c.bf16 %v2865_v6, %v2853_v4  ;;  %6333 = vmatprep.subr.bf16.mxu1 %v7369_v2  ;;  %v7392_v2 = vld [vmem:[#allocation10 + $0x364] ss:$12 sps:$4 sm:$0xff]   ;;  %v2702_v27 = vpop.f32.mrb[12].mxu0 }
 0x23d   : > { %v8339_v11 = vpack.c.bf16 %v2866_v9, %v2854_v7  ;;  %v2346_v13 = vpop.f32.mrb[16].mxu1  ;;  %v7393_v6 = vld [vmem:[#allocation10 + $0x1d0] ss:$12 sps:$4 sm:$0xff]   ;;  %v6563_v7 = vadd.f32 %v2702_v27, %v8360_v3  ;;  %v2704_v9 = vpop.f32.mrb[13].mxu0 }
 0x23e   : > { %v6537_v16 = vadd.f32 %v2346_v13, %v8325_v55  ;;  %v2348_v17 = vpop.f32.mrb[17].mxu1  ;;  %v2706_v13 = vpop.f32.mrb[14].mxu0 }
 0x23f   : > { %v6538_v14 = vadd.f32 %v2348_v17, %v8331_v30  ;;  %v2350_v21 = vpop.f32.mrb[18].mxu1  ;;  %4977 = vmatprep.mubr.bf16.mxu0 %v8339_v11  ;;  %6334 = vmatpush3.bf16.msra.mxu1 %v7373_v63  ;;  %v7394_v63 = vld [vmem:[#allocation10 + $0x2a8] ss:$12 sps:$4 sm:$0xff]   ;;  %v2708_v17 = vpop.f32.mrb[15].mxu0 }
 0x240   : > { %v6539_v25 = vadd.f32 %v2350_v21, %v8325_v55  ;;  %v2352_v26 = vpop.f32.mrb[19].mxu1  ;;  %4978 = vmatmul.mubr.bf16.vlgmr.msra.gmra.mrb[24].mxu0 %v8337_v10  ;;  %6353 = vmatprep.subr.bf16.mxu1 %v7374_v1  ;;  %v2877_v34 = vmax.f32 %v6537_v16, 0.0  ;;  %v6565_v16 = vadd.f32 %v2706_v13, %v8360_v3  ;;  %v7410_v13 = vld [vmem:[#allocation10 + $0x3c0] ss:$12 sps:$4 sm:$0xff]  }
 0x241   : > { %v6540_v33 = vadd.f32 %v2352_v26, %v8331_v30  ;;  %5007 = vmatpush1.bf16.msra.mxu0 %v7370_v15  ;;  %v2878_v39 = vmax.f32 %v6538_v14, 0.0  ;;  %v2859_v15 = vmax.f32 %v6563_v7, 0.0  ;;  %v7399_v26 = vld [vmem:[#allocation10 + $0x2c0] ss:$12 sps:$4 sm:$0xff]   ;;  %v7413_v7 = vld [vmem:[#allocation10 + $0x230] ss:$12 sps:$4 sm:$0xff]  }
 0x242   : > { %v2889_v36 = vmax.f32 %v6539_v25, 0.0  ;;  %5283 = vmatmul.mubr.bf16.vlgmr.msra.gmra.mrb[48].mxu1 %v8256_v52  ;;  %5008 = vmatprep.subr.bf16.mxu0 %v7377_v12  ;;  %v2871_v25 = vmax.f32 %v6565_v16, 0.0  ;;  %v7418_v16 = vld [vmem:[#allocation10 + $0x308] ss:$12 sps:$4 sm:$0xff]  }
 0x243   : > { %v2890_v32 = vmax.f32 %v6540_v33, 0.0  ;;  %5290 = vmatprep.mubr.bf16.mxu1 %v8270_v19  ;;  %6354 = vmatpush3.bf16.msra.mxu1 %v7378_v23  ;;  %v7398_v23 = vld [vmem:[#allocation10 + $0x1e8] ss:$12 sps:$4 sm:$0xff]   ;;  %v7395_v33 = vld [vmem:[#allocation10 + $0x378] ss:$12 sps:$4 sm:$0xff]  }
 0x244   : > { %v8349_v42 = vpack.c.bf16 %v2889_v36, %v2877_v34  ;;  %6355 = vmatprep.subr.bf16.mxu1 %v7379_v29  ;;  %v7402_v34 = vld [vmem:[#allocation10 + $0x394] ss:$12 sps:$4 sm:$0xff]  }
 0x245   : > { %v8353_v49 = vpack.c.bf16 %v2890_v32, %v2878_v39  ;;  %5009 = vmatpush1.bf16.msra.mxu0 %v7375_v24  ;;  %v2356_v51 = vpop.f32.mrb[20].mxu1  ;;  %v8380_v24 = vpack.c.bf16 %v2871_v25, %v2859_v15  ;;  %v7403_v39 = vld [vmem:[#allocation10 + $0x200] ss:$12 sps:$4 sm:$0xff]   ;;  %v7417_v15 = vld [vmem:[#allocation10 + $0x3dc] ss:$12 sps:$4 sm:$0xff]  }
 0x246   : > { %v6541_v52 = vadd.f32 %v2356_v51, %v8325_v55  ;;  %v2358_v56 = vpop.f32.mrb[21].mxu1  ;;  %5010 = vmatprep.subr.bf16.mxu0 %v7382_v37  ;;  %v8365_v55 = vrot.slane %v8351_v45, %v8240_v31  ;;  %v2712_v37 = vpop.f32.mrb[16].mxu0  ;;  %v7420_v25 = vld [vmem:[#allocation10 + $0x3f0] ss:$12 sps:$4 sm:$0xff]  }
 0x247   : > { %v6542_v19 = vadd.f32 %v2358_v56, %v8331_v30  ;;  %v2360_v59 = vpop.f32.mrb[22].mxu1  ;;  %4987 = vmatprep.mubr.bf16.mxu0 %v8353_v49  ;;  %6356 = vmatpush3.bf16.msra.mxu1 %v7383_v41  ;;  %v7385_v30 = vld [vmem:[#allocation10 + $0x348] ss:$12 sps:$4 sm:$0xff]   ;;  %v6567_v32 = vadd.f32 %v2712_v37, %v8360_v3  ;;  %v2714_v41 = vpop.f32.mrb[17].mxu0 }
 0x248   : > { %v2361_v61 = vpop.f32.mrb[23].mxu1  ;;  %4988 = vmatmul.mubr.bf16.gmra.mrb[28].mxu0 %v8349_v42  ;;  %6357 = vmatprep.subr.bf16.mxu1 %v7384_v35  ;;  %v2901_v53 = vmax.f32 %v6541_v52, 0.0  ;;  %v6564_v1 = vadd.f32 %v2704_v9, %v8365_v55  ;;  %v6566_v21 = vadd.f32 %v2708_v17, %v8365_v55  ;;  %v7404_v35 = vld [vmem:[#allocation10 + $0x2d8] ss:$12 sps:$4 sm:$0xff]   ;;  %v6568_v51 = vadd.f32 %v2714_v41, %v8365_v55  ;;  %v7400_v52 = vld [vmem:[#allocation10 + $0x390] ss:$12 sps:$4 sm:$0xff]  }
 0x249   : > { %v2902_v0 = vmax.f32 %v6542_v19, 0.0  ;;  %5011 = vmatpush1.bf16.msra.mxu0 %v7380_v54  ;;  %v2716_v54 = vpop.f32.mrb[18].mxu0  ;;  %v7407_v19 = vld [vmem:[#allocation10 + $0x3ac] ss:$12 sps:$4 sm:$0xff]   ;;  %v7434_v37 = vld [vmem:[#allocation10 + $0x428] ss:$12 sps:$4 sm:$0xff]  }
 0x24a   : > { %5291 = vmatmul.mubr.bf16.gmra.mrb[52].mxu1 %v8268_v18  ;;  %5012 = vmatprep.subr.bf16.mxu0 %v7387_v57  ;;  %v7390_v18 = vld [vmem:[#allocation10 + $0x360] ss:$12 sps:$4 sm:$0xff]   ;;  %v8375_v12 = vpack.c.bf16 %v2901_v53, %v2901_v53  ;;  %v2860_v14 = vmax.f32 %v6564_v1, 0.0  ;;  %v2872_v29 = vmax.f32 %v6566_v21, 0.0  ;;  %v6569_v56 = vadd.f32 %v2716_v54, %v8360_v3  ;;  %v2718_v57 = vpop.f32.mrb[19].mxu0 }
 0x24b   : > { %v8368_v4 = vpack.c.bf16 %v2902_v0, %v2902_v0  ;;  %5298 = vmatprep.mubr.bf16.mxu1 %v8282_v46  ;;  %6358 = vmatpush3.bf16.msra.mxu1 %v7388_v60  ;;  %v7397_v46 = vld [vmem:[#allocation10 + $0x37c] ss:$12 sps:$4 sm:$0xff]   ;;  %v2884_v59 = vmax.f32 %v6568_v51, 0.0  ;;  %v7408_v60 = vld [vmem:[#allocation10 + $0x218] ss:$12 sps:$4 sm:$0xff]  }
 0x24c   : > { %6359 = vmatprep.subr.bf16.mxu1 %v7389_v62  ;;  %v8383_v36 = vpack.c.bf16 %v2872_v29, %v2860_v14  ;;  %v2895_v61 = vmax.f32 %v6569_v56, 0.0  ;;  %v7409_v62 = vld [vmem:[#allocation10 + $0x2f0] ss:$12 sps:$4 sm:$0xff]   ;;  %v7419_v17 = vld [vmem:[#allocation10 + $0x3e0] ss:$12 sps:$4 sm:$0xff]  }
 0x24d   : > { %5013 = vmatpush1.bf16.msra.mxu0 %v7385_v30  ;;  %4997 = vmatprep.mubr.bf16.mxu0 %v8368_v4  ;;  %v7405_v30 = vld [vmem:[#allocation10 + $0x3a8] ss:$12 sps:$4 sm:$0xff]   ;;  %v7423_v21 = vld [vmem:[#allocation10 + $0x320] ss:$12 sps:$4 sm:$0xff]   ;;  %v7428_v29 = vld [vmem:[#allocation10 + $0x338] ss:$12 sps:$4 sm:$0xff]  }
 0x24e   : > { %5014 = vmatprep.subr.bf16.mxu0 %v7392_v2  ;;  %v7412_v2 = vld [vmem:[#allocation10 + $0x3c4] ss:$12 sps:$4 sm:$0xff]   ;;  %v7422_v14 = vld [vmem:[#allocation10 + $0x3f4] ss:$12 sps:$4 sm:$0xff]  }
 0x24f   : > { %6360 = vmatpush3.bf16.msra.mxu1 %v7393_v6  ;;  %v8394_v6 = vpop.f32.mrb[20].mxu0  ;;  %v7438_v41 = vld [vmem:[#allocation10 + $0x368] ss:$12 sps:$4 sm:$0xff]   ;;  %v7435_v51 = vld [vmem:[#allocation10 + $0x438] ss:$12 sps:$4 sm:$0xff]  }
 0x250   : > { %4998 = vmatmul.mubr.bf16.gmra.mrb[32].mxu0 %v8375_v12  ;;  %6361 = vmatprep.subr.bf16.mxu1 %v7394_v63  ;;  %v8396_v9 = vpop.f32.mrb[21].mxu0  ;;  %v7414_v63 = vld [vmem:[#allocation10 + $0x3c8] ss:$12 sps:$4 sm:$0xff]   ;;  %v7444_v54 = vld [vmem:[#allocation10 + $0x458] ss:$12 sps:$4 sm:$0xff]  }
 0x251   : > { %5015 = vmatpush1.bf16.msra.mxu0 %v7390_v18  ;;  %5038 = vmatprep.mubr.bf16.mxu0 %v8294_v8  ;;  %v2726_v1 = vpop.f32.mrb[22].mxu0  ;;  %v7448_v56 = vld [vmem:[#allocation10 + $0x398] ss:$12 sps:$4 sm:$0xff]  }
 0x252   : > { %5299 = vmatmul.mubr.bf16.gmra.mrb[56].mxu1 %v8288_v58  ;;  %5016 = vmatprep.subr.bf16.mxu0 %v7397_v46  ;;  %v2883_v58 = vmax.f32 %v6567_v32, 0.0  ;;  %v2727_v18 = vpop.f32.mrb[23].mxu0  ;;  %v7415_v46 = vld [vmem:[#allocation10 + $0x3d8] ss:$12 sps:$4 sm:$0xff]   ;;  %v7437_v32 = vld [vmem:[#allocation10 + $0x43c] ss:$12 sps:$4 sm:$0xff]   ;;  %v6551_v1 = vadd.f32 %v8304_v48, %v8276_v38 }
 0x253   : > { %6362 = vmatpush3.bf16.msra.mxu1 %v7398_v23  ;;  %5338 = vmatprep.mubr.bf16.mxu1 %v8339_v11  ;;  %v6570_v11 = vadd.f32 %v2718_v57, %v8365_v55  ;;  %v7424_v23 = vld [vmem:[#allocation10 + $0x3f8] ss:$12 sps:$4 sm:$0xff]   ;;  %v7449_v57 = vld [vmem:[#allocation10 + $0x470] ss:$12 sps:$4 sm:$0xff]   ;;  %v7474_v48 = vld [vmem:[#allocation10 + $0x5a8] ss:$12 sps:$4 sm:$0xff]  }
 0x254   : > { %6363 = vmatprep.subr.bf16.mxu1 %v7399_v26  ;;  %v8390_v53 = vpack.c.bf16 %v2895_v61, %v2883_v58  ;;  %v7427_v26 = vld [vmem:[#allocation10 + $0x40c] ss:$12 sps:$4 sm:$0xff]   ;;  %v6552_v61 = vadd.f32 %v8306_v20, %v8280_v40  ;;  %v7460_v20 = vld [vmem:[#allocation10 + $0x4b0] ss:$12 sps:$4 sm:$0xff]  }
 0x255   : > { %5017 = vmatpush1.bf16.msra.mxu0 %v7395_v33  ;;  %v2896_v0 = vmax.f32 %v6570_v11, 0.0  ;;  %v7429_v33 = vld [vmem:[#allocation10 + $0x410] ss:$12 sps:$4 sm:$0xff]   ;;  %v7447_v58 = vld [vmem:[#allocation10 + $0x46c] ss:$12 sps:$4 sm:$0xff]  }
 0x256   : > { %5018 = vmatprep.subr.bf16.mxu0 %v7402_v34  ;;  %v7425_v34 = vld [vmem:[#allocation10 + $0x408] ss:$12 sps:$4 sm:$0xff]   ;;  %v7464_v40 = vld [vmem:[#allocation10 + $0x578] ss:$12 sps:$4 sm:$0xff]   ;;  %v7473_v38 = vld [vmem:[#allocation10 + $0x4d0] ss:$12 sps:$4 sm:$0xff]  }
 0x257   : > { %6364 = vmatpush3.bf16.msra.mxu1 %v7403_v39  ;;  %v8392_v27 = vpack.c.bf16 %v2896_v0, %v2884_v59  ;;  %v7430_v39 = vld [vmem:[#allocation10 + $0x420] ss:$12 sps:$4 sm:$0xff]   ;;  %v7453_v59 = vld [vmem:[#allocation10 + $0x3b0] ss:$12 sps:$4 sm:$0xff]   ;;  %v7454_v11 = vld [vmem:[#allocation10 + $0x548] ss:$12 sps:$4 sm:$0xff]  }
 0x258   : > { %6365 = vmatprep.subr.bf16.mxu1 %v7404_v35  ;;  %v7439_v35 = vld [vmem:[#allocation10 + $0x440] ss:$12 sps:$4 sm:$0xff]  }
 0x259   : > { %5019 = vmatpush1.bf16.msra.mxu0 %v7400_v52  ;;  %v7440_v52 = vld [vmem:[#allocation10 + $0x450] ss:$12 sps:$4 sm:$0xff]   ;;  %v7459_v0 = vld [vmem:[#allocation10 + $0x560] ss:$12 sps:$4 sm:$0xff]  }
 0x25a   : > { %5020 = vmatprep.subr.bf16.mxu0 %v7407_v19  ;;  %v7445_v19 = vld [vmem:[#allocation10 + $0x468] ss:$12 sps:$4 sm:$0xff]  }
 0x25b   : > { %6366 = vmatpush3.bf16.msra.mxu1 %v7408_v60  ;;  %v7457_v60 = vld [vmem:[#allocation10 + $0x49c] ss:$12 sps:$4 sm:$0xff]  }
 0x25c   : > { %6367 = vmatprep.subr.bf16.mxu1 %v7409_v62  ;;  %v7458_v62 = vld [vmem:[#allocation10 + $0x488] ss:$12 sps:$4 sm:$0xff]  }
 0x25d   : > { %5021 = vmatpush1.bf16.msra.mxu0 %v7405_v30  ;;  %v7455_v30 = vld [vmem:[#allocation10 + $0x498] ss:$12 sps:$4 sm:$0xff]  }
 0x25e   : > { %5022 = vmatprep.subr.bf16.mxu0 %v7412_v2  ;;  %v7462_v2 = vld [vmem:[#allocation10 + $0x4b4] ss:$12 sps:$4 sm:$0xff]  }
 0x25f   : > { %6368 = vmatpush3.bf16.msra.mxu1 %v7413_v7  ;;  %v2904_v7 = vmax.f32 %v6552_v61, 0.0 }
 0x260   : > { %6387 = vmatprep.subr.bf16.mxu1 %v7414_v63  ;;  %v7463_v63 = vld [vmem:[#allocation10 + $0x4a0] ss:$12 sps:$4 sm:$0xff]  }
 0x261   : > { %5023 = vmatpush1.bf16.msra.mxu0 %v7410_v13  ;;  %v7467_v13 = vld [vmem:[#allocation10 + $0x4cc] ss:$12 sps:$4 sm:$0xff]   ;;  %v2940_v18 = vpack.c.bf16 %v2904_v7, %v2904_v7 }
 0x262   : > { %5339 = vmatmul.mubr.bf16.vlgmr.msra.gmra.mrb[60].mxu1 %v8337_v10  ;;  %5024 = vmatprep.subr.bf16.mxu0 %v7417_v15  ;;  %v7432_v10 = vld [vmem:[#allocation10 + $0x424] ss:$12 sps:$4 sm:$0xff]  }
 0x263   : > { %5346 = vmatprep.mubr.bf16.mxu1 %v8353_v49  ;;  %6388 = vmatpush3.bf16.msra.mxu1 %v7418_v16  ;;  %v7433_v49 = vld [vmem:[#allocation10 + $0x350] ss:$12 sps:$4 sm:$0xff]   ;;  %v7468_v15 = vld [vmem:[#allocation10 + $0x4b8] ss:$12 sps:$4 sm:$0xff]   ;;  %v2903_v16 = vmax.f32 %v6551_v1, 0.0 }
 0x264   : > { %6389 = vmatprep.subr.bf16.mxu1 %v7419_v17  ;;  %v7472_v17 = vld [vmem:[#allocation10 + $0x4e4] ss:$12 sps:$4 sm:$0xff]   ;;  %v7497_v1 = vld [vmem:[#allocation10 + $0x55c] ss:$12 sps:$4 sm:$0xff]  }
 0x265   : > { %5025 = vmatpush1.bf16.msra.mxu0 %v7415_v46  ;;  %v7470_v46 = vld [vmem:[#allocation10 + $0x4e0] ss:$12 sps:$4 sm:$0xff]  }
 0x266   : > { %5026 = vmatprep.subr.bf16.mxu0 %v7422_v14  ;;  %v2939_v14 = vpack.c.bf16 %v2903_v16, %v2903_v16 }
 0x267   : > { %6390 = vmatpush3.bf16.msra.mxu1 %v7423_v21  ;;  %v7477_v21 = vld [vmem:[#allocation10 + $0x4fc] ss:$12 sps:$4 sm:$0xff]  }
 0x268   : > { %6391 = vmatprep.subr.bf16.mxu1 %v7424_v23  ;;  %v645_v23 = vsub.s32 6, %v8230_v22 }
 0x269   : > { %5027 = vmatpush1.bf16.msra.mxu0 %v7420_v25  ;;  %v7478_v25 = vld [vmem:[#allocation10 + $0x4e8] ss:$12 sps:$4 sm:$0xff]  }
 0x26a   : > { %5347 = vmatmul.mubr.bf16.gmra.mrb[64].mxu1 %v8349_v42  ;;  %5028 = vmatprep.subr.bf16.mxu0 %v7427_v26  ;;  %v7442_v42 = vld [vmem:[#allocation10 + $0x454] ss:$12 sps:$4 sm:$0xff]   ;;  %v649_v26 = vsub.s32 7, %v8230_v22  ;;  %v7597_v22 = vld [vmem:[#allocation10 + $0x784] ss:$12 sps:$4 sm:$0xff]  }
 0x26b   : > { %5354 = vmatprep.mubr.bf16.mxu1 %v8368_v4  ;;  %6392 = vmatpush3.bf16.msra.mxu1 %v7428_v29  ;;  %v7443_v4 = vld [vmem:[#allocation10 + $0x380] ss:$12 sps:$4 sm:$0xff]   ;;  %v7475_v29 = vld [vmem:[#allocation10 + $0x4f8] ss:$12 sps:$4 sm:$0xff]  }
 0x26c   : > { %6393 = vmatprep.subr.bf16.mxu1 %v7429_v33  ;;  %v7643_v33 = vld [vmem:[#allocation9] sm:$0xff] }
 0x26d   : > { %5029 = vmatpush1.bf16.msra.mxu0 %v7425_v34  ;;  %v8416_v34 = vrot.slane %v7643_v33, %v645_v23 }
 0x26e   : > { %5030 = vmatprep.subr.bf16.mxu0 %v7432_v10  ;;  %v7482_v10 = vld [vmem:[#allocation10 + $0x514] ss:$12 sps:$4 sm:$0xff]  }
 0x26f   : > { %6394 = vmatpush3.bf16.msra.mxu1 %v7433_v49  ;;  %v8418_v49 = vrot.slane %v7643_v33, %v649_v26  ;;  %v7500_v33 = vld [vmem:[#allocation10 + $0x570] ss:$12 sps:$4 sm:$0xff]  }
 0x270   : > { %6395 = vmatprep.subr.bf16.mxu1 %v7434_v37  ;;  %v7483_v37 = vld [vmem:[#allocation10 + $0x500] ss:$12 sps:$4 sm:$0xff]  }
 0x271   : > { %5031 = vmatpush1.bf16.msra.mxu0 %v7430_v39  ;;  %v7484_v39 = vld [vmem:[#allocation10 + $0x5d8] ss:$12 sps:$4 sm:$0xff]  }
 0x272   : > { %5355 = vmatmul.mubr.bf16.gmra.mrb[68].mxu1 %v8375_v12  ;;  %5032 = vmatprep.subr.bf16.mxu0 %v7437_v32  ;;  %v7452_v12 = vld [vmem:[#allocation10 + $0x484] ss:$12 sps:$4 sm:$0xff]  }
 0x273   : > { %6396 = vmatpush3.bf16.msra.mxu1 %v7438_v41  ;;  %5394 = vmatprep.mubr.bf16.mxu1 %v8294_v8  ;;  %v7450_v8 = vld [vmem:[#allocation10 + $0x480] ss:$12 sps:$4 sm:$0xff]   ;;  %v7480_v41 = vld [vmem:[#allocation10 + $0x510] ss:$12 sps:$4 sm:$0xff]  }
 0x274   : > { %6397 = vmatprep.subr.bf16.mxu1 %v7439_v35 }
 0x275   : > { %5033 = vmatpush1.bf16.msra.mxu0 %v7435_v51 }
 0x276   : > { %5034 = vmatprep.subr.bf16.mxu0 %v7442_v42  ;;  %v7487_v42 = vld [vmem:[#allocation10 + $0x52c] ss:$12 sps:$4 sm:$0xff]  }
 0x277   : > { %6398 = vmatpush3.bf16.msra.mxu1 %v7443_v4 }
 0x278   : > { %6399 = vmatprep.subr.bf16.mxu1 %v7444_v54 }
 0x279   : > { %5035 = vmatpush1.bf16.msra.mxu0 %v7440_v52  ;;  %v7488_v52 = vld [vmem:[#allocation10 + $0x518] ss:$12 sps:$4 sm:$0xff]  }
 0x27a   : > { %5036 = vmatprep.subr.bf16.mxu0 %v7447_v58 }
 0x27b   : > { %6400 = vmatpush3.bf16.msra.mxu1 %v7448_v56 }
 0x27c   : > { %6401 = vmatprep.subr.bf16.mxu1 %v7449_v57 }
 0x27d   : > { %5037 = vmatpush1.bf16.msra.mxu0 %v7445_v19  ;;  %v7489_v19 = vld [vmem:[#allocation10 + $0x5f0] ss:$12 sps:$4 sm:$0xff]  }
 0x27e   : > { %5067 = vmatprep.subr.bf16.mxu0 %v7452_v12 }
 0x27f   : > { %6402 = vmatpush3.bf16.msra.mxu1 %v7453_v59  ;;  %v7485_v59 = vld [vmem:[#allocation10 + $0x528] ss:$12 sps:$4 sm:$0xff]  }
 0x280   : > { %5039 = vmatmul.mubr.bf16.vlgmr.msra.gmra.mrb[24].mxu0 %v8292_v5  ;;  %6421 = vmatprep.subr.bf16.mxu1 %v7454_v11 }
 0x281   : > { %5048 = vmatprep.mubr.bf16.mxu0 %v8302_v47  ;;  %5068 = vmatpush1.bf16.msra.mxu0 %v7450_v8  ;;  %v7492_v8 = vld [vmem:[#allocation10 + $0x544] ss:$12 sps:$4 sm:$0xff]  }
 0x282   : > { %5395 = vmatmul.mubr.bf16.vlgmr.msra.gmra.mrb[72].mxu1 %v8292_v5  ;;  %5069 = vmatprep.subr.bf16.mxu0 %v7457_v60  ;;  %v7469_v5 = vld [vmem:[#allocation10 + $0x590] ss:$12 sps:$4 sm:$0xff]  }
 0x283   : > { %5402 = vmatprep.mubr.bf16.mxu1 %v8302_v47  ;;  %6422 = vmatpush3.bf16.msra.mxu1 %v7458_v62  ;;  %v7465_v47 = vld [vmem:[#allocation10 + $0x4c8] ss:$12 sps:$4 sm:$0xff]   ;;  %v7493_v62 = vld [vmem:[#allocation10 + $0x530] ss:$12 sps:$4 sm:$0xff]  }
 0x284   : > { %6423 = vmatprep.subr.bf16.mxu1 %v7459_v0 }
 0x285   : > { %5070 = vmatpush1.bf16.msra.mxu0 %v7455_v30  ;;  %v7494_v30 = vld [vmem:[#allocation10 + $0x6c8] ss:$12 sps:$4 sm:$0xff]  }
 0x286   : > { %5071 = vmatprep.subr.bf16.mxu0 %v7462_v2 }
 0x287   : > { %6424 = vmatpush3.bf16.msra.mxu1 %v7463_v63  ;;  %v7490_v63 = vld [vmem:[#allocation10 + $0x540] ss:$12 sps:$4 sm:$0xff]  }
 0x288   : > { %5049 = vmatmul.mubr.bf16.gmra.mrb[28].mxu0 %v8300_v43  ;;  %6425 = vmatprep.subr.bf16.mxu1 %v7464_v40 }
 0x289   : > { %5058 = vmatprep.mubr.bf16.mxu0 %v2940_v18  ;;  %5072 = vmatpush1.bf16.msra.mxu0 %v7460_v20 }
 0x28a   : > { %5403 = vmatmul.mubr.bf16.gmra.mrb[76].mxu1 %v8300_v43  ;;  %5073 = vmatprep.subr.bf16.mxu0 %v7467_v13  ;;  %v7479_v43 = vld [vmem:[#allocation10 + $0x5c0] ss:$12 sps:$4 sm:$0xff]  }
 0x28b   : > { %5410 = vmatprep.mubr.bf16.mxu1 %v2940_v18  ;;  %6426 = vmatpush3.bf16.msra.mxu1 %v7468_v15  ;;  %v7498_v15 = vld [vmem:[#allocation10 + $0x608] ss:$12 sps:$4 sm:$0xff]  }
 0x28c   : > { %6427 = vmatprep.subr.bf16.mxu1 %v7469_v5 }
 0x28d   : > { %5074 = vmatpush1.bf16.msra.mxu0 %v7465_v47 }
 0x28e   : > { %5075 = vmatprep.subr.bf16.mxu0 %v7472_v17  ;;  %v7499_v17 = vld [vmem:[#allocation10 + $0x6e0] ss:$12 sps:$4 sm:$0xff]  }
 0x28f   : > { %6428 = vmatpush3.bf16.msra.mxu1 %v7473_v38 }
 0x290   : > { %5059 = vmatmul.mubr.bf16.gmra.mrb[32].mxu0 %v2939_v14  ;;  %6429 = vmatprep.subr.bf16.mxu1 %v7474_v48 }
 0x291   : > { %5076 = vmatpush1.bf16.msra.mxu0 %v7470_v46  ;;  %v7495_v46 = vld [vmem:[#allocation10 + $0x558] ss:$12 sps:$4 sm:$0xff]  }
 0x292   : > { %5411 = vmatmul.mubr.bf16.gmra.mrb[80].mxu1 %v2939_v14  ;;  %5077 = vmatprep.subr.bf16.mxu0 %v7477_v21  ;;  %v7502_v21 = vld [vmem:[#allocation10 + $0x574] ss:$12 sps:$4 sm:$0xff]  }
 0x293   : > { %6430 = vmatpush3.bf16.msra.mxu1 %v7478_v25  ;;  %v7503_v25 = vld [vmem:[#allocation10 + $0x620] ss:$12 sps:$4 sm:$0xff]  }
 0x294   : > { %6431 = vmatprep.subr.bf16.mxu1 %v7479_v43  ;;  %v7504_v43 = vld [vmem:[#allocation10 + $0x6f8] ss:$12 sps:$4 sm:$0xff]  }
 0x295   : > { %5078 = vmatpush1.bf16.msra.mxu0 %v7475_v29  ;;  %v2580_v32 = vpop.f32.mrb[24].mxu1 }
 0x296   : > { %v6553_v35 = vadd.f32 %v2580_v32, %v8416_v34  ;;  %v2582_v51 = vpop.f32.mrb[25].mxu1  ;;  %5079 = vmatprep.subr.bf16.mxu0 %v7482_v10  ;;  %v7507_v32 = vld [vmem:[#allocation10 + $0x58c] ss:$12 sps:$4 sm:$0xff]  }
 0x297   : > { %v6554_v4 = vadd.f32 %v2582_v51, %v8418_v49  ;;  %v2584_v54 = vpop.f32.mrb[26].mxu1  ;;  %6432 = vmatpush3.bf16.msra.mxu1 %v7483_v37 }
 0x298   : > { %v2857_v58 = vmax.f32 %v6553_v35, 0.0  ;;  %v6555_v56 = vadd.f32 %v2584_v54, %v8416_v34  ;;  %v2586_v57 = vpop.f32.mrb[27].mxu1  ;;  %6433 = vmatprep.subr.bf16.mxu1 %v7484_v39  ;;  %v7508_v35 = vld [vmem:[#allocation10 + $0x638] ss:$12 sps:$4 sm:$0xff]  }
 0x299   : > { %v6556_v12 = vadd.f32 %v2586_v57, %v8418_v49  ;;  %5080 = vmatpush1.bf16.msra.mxu0 %v7480_v41  ;;  %v2858_v60 = vmax.f32 %v6554_v4, 0.0  ;;  %v7509_v4 = vld [vmem:[#allocation10 + $0x710] ss:$12 sps:$4 sm:$0xff]  }
 0x29a   : > { %v2869_v11 = vmax.f32 %v6555_v56, 0.0  ;;  %5081 = vmatprep.subr.bf16.mxu0 %v7487_v42  ;;  %v7513_v57 = vld [vmem:[#allocation10 + $0x650] ss:$12 sps:$4 sm:$0xff]  }
 0x29b   : > { %v2870_v61 = vmax.f32 %v6556_v12, 0.0  ;;  %6434 = vmatpush3.bf16.msra.mxu1 %v7488_v52  ;;  %v7505_v52 = vld [vmem:[#allocation10 + $0x588] ss:$12 sps:$4 sm:$0xff]  }
 0x29c   : > { %v8424_v0 = vpack.c.bf16 %v2869_v11, %v2857_v58  ;;  %6435 = vmatprep.subr.bf16.mxu1 %v7489_v19  ;;  %v7514_v19 = vld [vmem:[#allocation10 + $0x728] ss:$12 sps:$4 sm:$0xff]  }
 0x29d   : > { %v2918_v2 = vpack.c.bf16 %v2870_v61, %v2858_v60  ;;  %5082 = vmatpush1.bf16.msra.mxu0 %v7485_v59  ;;  %v2590_v7 = vpop.f32.mrb[28].mxu1  ;;  %v7517_v59 = vld [vmem:[#allocation10 + $0x5bc] ss:$12 sps:$4 sm:$0xff]   ;;  %v7515_v60 = vld [vmem:[#allocation10 + $0x5b8] ss:$12 sps:$4 sm:$0xff]  }
 0x29e   : > { %v6557_v40 = vadd.f32 %v2590_v7, %v8416_v34  ;;  %5083 = vmatprep.subr.bf16.mxu0 %v7492_v8  ;;  %v2592_v20 = vpop.f32.mrb[29].mxu1  ;;  %v7518_v11 = vld [vmem:[#allocation10 + $0x668] ss:$12 sps:$4 sm:$0xff]   ;;  %v7519_v8 = vld [vmem:[#allocation10 + $0x740] ss:$12 sps:$4 sm:$0xff]  }
 0x29f   : > { %5099 = vmatprep.mubr.bf16.mxu0 %v2918_v2  ;;  %6436 = vmatpush3.bf16.msra.mxu1 %v7493_v62  ;;  %v6558_v13 = vadd.f32 %v2592_v20, %v8418_v49  ;;  %v2594_v18 = vpop.f32.mrb[30].mxu1  ;;  %v7522_v61 = vld [vmem:[#allocation10 + $0x5d4] ss:$12 sps:$4 sm:$0xff]   ;;  %v7527_v7 = vld [vmem:[#allocation10 + $0x5ec] ss:$12 sps:$4 sm:$0xff]  }
 0x2a0   : > { %v2881_v5 = vmax.f32 %v6557_v40, 0.0  ;;  %5450 = vmatprep.mubr.bf16.mxu1 %v2918_v2  ;;  %v6559_v47 = vadd.f32 %v2594_v18, %v8416_v34  ;;  %v2596_v16 = vpop.f32.mrb[31].mxu1  ;;  %6455 = vmatprep.subr.bf16.mxu1 %v7494_v30  ;;  %v7523_v62 = vld [vmem:[#allocation10 + $0x680] ss:$12 sps:$4 sm:$0xff]   ;;  %v7524_v30 = vld [vmem:[#allocation10 + $0x758] ss:$12 sps:$4 sm:$0xff]  }
 0x2a1   : > { %v2882_v38 = vmax.f32 %v6558_v13, 0.0  ;;  %5084 = vmatpush1.bf16.msra.mxu0 %v7490_v63  ;;  %v6560_v48 = vadd.f32 %v2596_v16, %v8418_v49  ;;  %v7520_v2 = vld [vmem:[#allocation10 + $0x5d0] ss:$12 sps:$4 sm:$0xff]   ;;  %v7528_v63 = vld [vmem:[#allocation10 + $0x698] ss:$12 sps:$4 sm:$0xff]  }
 0x2a2   : > { %v2893_v14 = vmax.f32 %v6559_v47, 0.0  ;;  %5451 = vmatmul.mubr.bf16.vlgmr.msra.gmra.mrb[84].mxu1 %v8424_v0  ;;  %5085 = vmatprep.subr.bf16.mxu0 %v7497_v1  ;;  %v7529_v40 = vld [vmem:[#allocation10 + $0x770] ss:$12 sps:$4 sm:$0xff]   ;;  %v7525_v20 = vld [vmem:[#allocation10 + $0x5e8] ss:$12 sps:$4 sm:$0xff]  }
 0x2a3   : > { %v2894_v23 = vmax.f32 %v6560_v48, 0.0  ;;  %6456 = vmatpush3.bf16.msra.mxu1 %v7498_v15  ;;  %v7532_v1 = vld [vmem:[#allocation10 + $0x604] ss:$12 sps:$4 sm:$0xff]   ;;  %v7558_v18 = vld [vmem:[#allocation10 + $0x848] ss:$12 sps:$4 sm:$0xff]  }
 0x2a4   : > { %v8431_v26 = vpack.c.bf16 %v2893_v14, %v2881_v5  ;;  %6457 = vmatprep.subr.bf16.mxu1 %v7499_v17  ;;  %v7533_v13 = vld [vmem:[#allocation10 + $0x6b0] ss:$12 sps:$4 sm:$0xff]   ;;  %v7530_v15 = vld [vmem:[#allocation10 + $0x600] ss:$12 sps:$4 sm:$0xff]   ;;  %v7559_v47 = vld [vmem:[#allocation10 + $0x788] ss:$12 sps:$4 sm:$0xff]   ;;  %v6572_v17 = vadd.f32 %v8396_v9, %v8365_v55  ;;  %v6571_v9 = vadd.f32 %v8394_v6, %v8360_v3 }
 0x2a5   : > { %v8433_v29 = vpack.c.bf16 %v2894_v23, %v2882_v38  ;;  %5086 = vmatpush1.bf16.msra.mxu0 %v7495_v46  ;;  %v2600_v10 = vpop.f32.mrb[32].mxu1  ;;  %v7536_v5 = vld [vmem:[#allocation10 + $0x61c] ss:$12 sps:$4 sm:$0xff]   ;;  %v7563_v16 = vld [vmem:[#allocation10 + $0x860] ss:$12 sps:$4 sm:$0xff]  }
 0x2a6   : > { %5087 = vmatprep.subr.bf16.mxu0 %v7502_v21  ;;  %v6561_v37 = vadd.f32 %v2600_v10, %v8416_v34  ;;  %v2602_v39 = vpop.f32.mrb[33].mxu1  ;;  %v7512_v34 = vld [vmem:[#allocation10 + $0x5a4] ss:$12 sps:$4 sm:$0xff]   ;;  %v7539_v48 = vld [vmem:[#allocation10 + $0x634] ss:$12 sps:$4 sm:$0xff]  }
 0x2a7   : > { %6458 = vmatpush3.bf16.msra.mxu1 %v7503_v25  ;;  %5458 = vmatprep.mubr.bf16.mxu1 %v8433_v29  ;;  %v6562_v41 = vadd.f32 %v2602_v39, %v8418_v49  ;;  %v2604_v51 = vpop.f32.mrb[34].mxu1  ;;  %v7510_v49 = vld [vmem:[#allocation10 + $0x5a0] ss:$12 sps:$4 sm:$0xff]   ;;  %v7534_v38 = vld [vmem:[#allocation10 + $0x618] ss:$12 sps:$4 sm:$0xff]  }
 0x2a8   : > { %6459 = vmatprep.subr.bf16.mxu1 %v7504_v43  ;;  %v2605_v42 = vpop.f32.mrb[35].mxu1  ;;  %v2905_v58 = vmax.f32 %v6561_v37, 0.0  ;;  %v7564_v46 = vld [vmem:[#allocation10 + $0x7a0] ss:$12 sps:$4 sm:$0xff]   ;;  %v7568_v14 = vld [vmem:[#allocation10 + $0x878] ss:$12 sps:$4 sm:$0xff]  }
 0x2a9   : > { %5088 = vmatpush1.bf16.msra.mxu0 %v7500_v33  ;;  %v2906_v54 = vmax.f32 %v6562_v41, 0.0  ;;  %v7537_v21 = vld [vmem:[#allocation10 + $0x630] ss:$12 sps:$4 sm:$0xff]   ;;  %v7542_v23 = vld [vmem:[#allocation10 + $0x64c] ss:$12 sps:$4 sm:$0xff]   ;;  %v2907_v37 = vmax.f32 %v6571_v9, 0.0 }
 0x2aa   : > { %5459 = vmatmul.mubr.bf16.gmra.mrb[88].mxu1 %v8431_v26  ;;  %5089 = vmatprep.subr.bf16.mxu0 %v7507_v32  ;;  %v8442_v12 = vpack.c.bf16 %v2905_v58, %v2905_v58  ;;  %v7569_v55 = vld [vmem:[#allocation10 + $0x7b8] ss:$12 sps:$4 sm:$0xff]   ;;  %v7573_v25 = vld [vmem:[#allocation10 + $0x890] ss:$12 sps:$4 sm:$0xff]   ;;  %v7578_v3 = vld [vmem:[#allocation10 + $0x8a8] ss:$12 sps:$4 sm:$0xff]  }
 0x2ab   : > { %v8439_v56 = vpack.c.bf16 %v2906_v54, %v2906_v54  ;;  %6460 = vmatpush3.bf16.msra.mxu1 %v7508_v35  ;;  %v7545_v33 = vld [vmem:[#allocation10 + $0x664] ss:$12 sps:$4 sm:$0xff]   ;;  %v7543_v6 = vld [vmem:[#allocation10 + $0x660] ss:$12 sps:$4 sm:$0xff]   ;;  %v7579_v39 = vld [vmem:[#allocation10 + $0x7e8] ss:$12 sps:$4 sm:$0xff]   ;;  %v8460_v32 = vpack.c.bf16 %v2907_v37, %v2907_v37 }
 0x2ac   : > { %6461 = vmatprep.subr.bf16.mxu1 %v7509_v4  ;;  %v7574_v10 = vld [vmem:[#allocation10 + $0x7d0] ss:$12 sps:$4 sm:$0xff]   ;;  %v7583_v41 = vld [vmem:[#allocation10 + $0x8c0] ss:$12 sps:$4 sm:$0xff]   ;;  %v7546_v35 = vld [vmem:[#allocation10 + $0x678] ss:$12 sps:$4 sm:$0xff]  }
 0x2ad   : > { %5090 = vmatpush1.bf16.msra.mxu0 %v7505_v52  ;;  %5466 = vmatprep.mubr.bf16.mxu1 %v8439_v56  ;;  %v7551_v51 = vld [vmem:[#allocation10 + $0x694] ss:$12 sps:$4 sm:$0xff]   ;;  %v7588_v4 = vld [vmem:[#allocation10 + $0x8d8] ss:$12 sps:$4 sm:$0xff]   ;;  %v7549_v54 = vld [vmem:[#allocation10 + $0x690] ss:$12 sps:$4 sm:$0xff]  }
 0x2ae   : > { %5091 = vmatprep.subr.bf16.mxu0 %v7512_v34  ;;  %v7584_v42 = vld [vmem:[#allocation10 + $0x800] ss:$12 sps:$4 sm:$0xff]   ;;  %v7589_v58 = vld [vmem:[#allocation10 + $0x818] ss:$12 sps:$4 sm:$0xff]   ;;  %v7593_v34 = vld [vmem:[#allocation10 + $0x8f0] ss:$12 sps:$4 sm:$0xff]  }
 0x2af   : > { %6462 = vmatpush3.bf16.msra.mxu1 %v7513_v57  ;;  %v7554_v52 = vld [vmem:[#allocation10 + $0x6ac] ss:$12 sps:$4 sm:$0xff]   ;;  %v7594_v57 = vld [vmem:[#allocation10 + $0x830] ss:$12 sps:$4 sm:$0xff]  }
 0x2b0   : > { %6463 = vmatprep.subr.bf16.mxu1 %v7514_v19  ;;  %v7555_v19 = vld [vmem:[#allocation10 + $0x6c0] ss:$12 sps:$4 sm:$0xff]  }
 0x2b1   : > { %5092 = vmatpush1.bf16.msra.mxu0 %v7510_v49  ;;  %v7562_v49 = vld [vmem:[#allocation10 + $0x6dc] ss:$12 sps:$4 sm:$0xff]  }
 0x2b2   : > { %5467 = vmatmul.mubr.bf16.gmra.mrb[92].mxu1 %v8442_v12  ;;  %5093 = vmatprep.subr.bf16.mxu0 %v7517_v59  ;;  %v7567_v59 = vld [vmem:[#allocation10 + $0x6f4] ss:$12 sps:$4 sm:$0xff]  }
 0x2b3   : > { %6464 = vmatpush3.bf16.msra.mxu1 %v7518_v11  ;;  %5506 = vmatprep.mubr.bf16.mxu1 %v8383_v36  ;;  %v7565_v11 = vld [vmem:[#allocation10 + $0x6f0] ss:$12 sps:$4 sm:$0xff]  }
 0x2b4   : > { %6465 = vmatprep.subr.bf16.mxu1 %v7519_v8  ;;  %v7572_v8 = vld [vmem:[#allocation10 + $0x70c] ss:$12 sps:$4 sm:$0xff]  }
 0x2b5   : > { %5094 = vmatpush1.bf16.msra.mxu0 %v7515_v60  ;;  %v7570_v60 = vld [vmem:[#allocation10 + $0x708] ss:$12 sps:$4 sm:$0xff]  }
 0x2b6   : > { %5095 = vmatprep.subr.bf16.mxu0 %v7522_v61  ;;  %v7577_v61 = vld [vmem:[#allocation10 + $0x724] ss:$12 sps:$4 sm:$0xff]  }
 0x2b7   : > { %6466 = vmatpush3.bf16.msra.mxu1 %v7523_v62  ;;  %v7575_v62 = vld [vmem:[#allocation10 + $0x720] ss:$12 sps:$4 sm:$0xff]  }
 0x2b8   : > { %6467 = vmatprep.subr.bf16.mxu1 %v7524_v30  ;;  %v7582_v30 = vld [vmem:[#allocation10 + $0x73c] ss:$12 sps:$4 sm:$0xff]  }
 0x2b9   : > { %5096 = vmatpush1.bf16.msra.mxu0 %v7520_v2  ;;  %v7580_v2 = vld [vmem:[#allocation10 + $0x738] ss:$12 sps:$4 sm:$0xff]  }
 0x2ba   : > { %5097 = vmatprep.subr.bf16.mxu0 %v7527_v7  ;;  %v662_v7 = vrot.slane %v8351_v45, %v8319_v44 }
 0x2bb   : > { %6468 = vmatpush3.bf16.msra.mxu1 %v7528_v63  ;;  %v7587_v63 = vld [vmem:[#allocation10 + $0x754] ss:$12 sps:$4 sm:$0xff]  }
 0x2bc   : > { %6469 = vmatprep.subr.bf16.mxu1 %v7529_v40  ;;  %v666_v40 = vrot.slane %v8351_v45, %v633_v50 }
 0x2bd   : > { %5098 = vmatpush1.bf16.msra.mxu0 %v7525_v20 }
 0x2be   : > { %5128 = vmatprep.subr.bf16.mxu0 %v7532_v1  ;;  %v7585_v1 = vld [vmem:[#allocation10 + $0x750] ss:$12 sps:$4 sm:$0xff]  }
 0x2bf   : > { %6470 = vmatpush3.bf16.msra.mxu1 %v7533_v13 }
 0x2c0   : > { %5100 = vmatmul.mubr.bf16.vlgmr.msra.gmra.mrb[24].mxu0 %v8424_v0  ;;  %6489 = vmatprep.subr.bf16.mxu1 %v7558_v18  ;;  %v2908_v0 = vmax.f32 %v6572_v17, 0.0 }
 0x2c1   : > { %5109 = vmatprep.mubr.bf16.mxu0 %v8433_v29  ;;  %5129 = vmatpush1.bf16.msra.mxu0 %v7530_v15  ;;  %v7540_v29 = vld [vmem:[#allocation10 + $0x648] ss:$12 sps:$4 sm:$0xff]   ;;  %v7592_v15 = vld [vmem:[#allocation10 + $0x76c] ss:$12 sps:$4 sm:$0xff]  }
 0x2c2   : > { %5507 = vmatmul.mubr.bf16.vlgmr.msra.gmra.mrb[96].mxu1 %v8380_v24  ;;  %5130 = vmatprep.subr.bf16.mxu0 %v7536_v5  ;;  %v8455_v43 = vpack.c.bf16 %v2908_v0, %v2908_v0 }
 0x2c3   : > { %5514 = vmatprep.mubr.bf16.mxu1 %v8392_v27  ;;  %6490 = vmatpush3.bf16.msra.mxu1 %v7559_v47 }
 0x2c4   : > { %6491 = vmatprep.subr.bf16.mxu1 %v7563_v16 }
 0x2c5   : > { %5131 = vmatpush1.bf16.msra.mxu0 %v7534_v38 }
 0x2c6   : > { %5132 = vmatprep.subr.bf16.mxu0 %v7539_v48 }
 0x2c7   : > { %6492 = vmatpush3.bf16.msra.mxu1 %v7564_v46 }
 0x2c8   : > { %5110 = vmatmul.mubr.bf16.gmra.mrb[28].mxu0 %v8431_v26  ;;  %6493 = vmatprep.subr.bf16.mxu1 %v7568_v14  ;;  %v7548_v26 = vld [vmem:[#allocation10 + $0x67c] ss:$12 sps:$4 sm:$0xff]  }
 0x2c9   : > { %5119 = vmatprep.mubr.bf16.mxu0 %v8439_v56  ;;  %5133 = vmatpush1.bf16.msra.mxu0 %v7537_v21  ;;  %v7552_v56 = vld [vmem:[#allocation10 + $0x6a8] ss:$12 sps:$4 sm:$0xff]  }
 0x2ca   : > { %5515 = vmatmul.mubr.bf16.gmra.mrb[100].mxu1 %v8390_v53  ;;  %5134 = vmatprep.subr.bf16.mxu0 %v7542_v23  ;;  %v7590_v14 = vld [vmem:[#allocation10 + $0x768] ss:$12 sps:$4 sm:$0xff]  }
 0x2cb   : > { %5522 = vmatprep.mubr.bf16.mxu1 %v8455_v43  ;;  %6494 = vmatpush3.bf16.msra.mxu1 %v7569_v55  ;;  %v7595_v55 = vld [vmem:[#allocation10 + $0x780] ss:$12 sps:$4 sm:$0xff]  }
 0x2cc   : > { %6495 = vmatprep.subr.bf16.mxu1 %v7573_v25 }
 0x2cd   : > { %5135 = vmatpush1.bf16.msra.mxu0 %v7540_v29  ;;  %v7600_v29 = vld [vmem:[#allocation10 + $0x79c] ss:$12 sps:$4 sm:$0xff]  }
 0x2ce   : > { %5136 = vmatprep.subr.bf16.mxu0 %v7545_v33 }
 0x2cf   : > { %6496 = vmatpush3.bf16.msra.mxu1 %v7574_v10 }
 0x2d0   : > { %5120 = vmatmul.mubr.bf16.gmra.mrb[32].mxu0 %v8442_v12  ;;  %6497 = vmatprep.subr.bf16.mxu1 %v7578_v3  ;;  %v7560_v12 = vld [vmem:[#allocation10 + $0x6d8] ss:$12 sps:$4 sm:$0xff]  }
 0x2d1   : > { %5137 = vmatpush1.bf16.msra.mxu0 %v7543_v6  ;;  %5160 = vmatprep.mubr.bf16.mxu0 %v8383_v36  ;;  %v7557_v36 = vld [vmem:[#allocation10 + $0x6c4] ss:$12 sps:$4 sm:$0xff]  }
 0x2d2   : > { %5523 = vmatmul.mubr.bf16.gmra.mrb[104].mxu1 %v8460_v32  ;;  %5138 = vmatprep.subr.bf16.mxu0 %v7548_v26 }
 0x2d3   : > { %6498 = vmatpush3.bf16.msra.mxu1 %v7579_v39 }
 0x2d4   : > { %6499 = vmatprep.subr.bf16.mxu1 %v7583_v41  ;;  %v7598_v41 = vld [vmem:[#allocation10 + $0x798] ss:$12 sps:$4 sm:$0xff]  }
 0x2d5   : > { %5139 = vmatpush1.bf16.msra.mxu0 %v7546_v35 }
 0x2d6   : > { %5140 = vmatprep.subr.bf16.mxu0 %v7551_v51  ;;  %v7603_v51 = vld [vmem:[#allocation10 + $0x7b4] ss:$12 sps:$4 sm:$0xff]  }
 0x2d7   : > { %6500 = vmatpush3.bf16.msra.mxu1 %v7584_v42 }
 0x2d8   : > { %6501 = vmatprep.subr.bf16.mxu1 %v7588_v4 }
 0x2d9   : > { %5141 = vmatpush1.bf16.msra.mxu0 %v7549_v54 }
 0x2da   : > { %5142 = vmatprep.subr.bf16.mxu0 %v7554_v52 }
 0x2db   : > { %6502 = vmatpush3.bf16.msra.mxu1 %v7589_v58 }
 0x2dc   : > { %6503 = vmatprep.subr.bf16.mxu1 %v7593_v34 }
 0x2dd   : > { %5143 = vmatpush1.bf16.msra.mxu0 %v7552_v56  ;;  %v7606_v56 = vld [vmem:[#allocation10 + $0x7cc] ss:$12 sps:$4 sm:$0xff]  }
 0x2de   : > { %5144 = vmatprep.subr.bf16.mxu0 %v7557_v36 }
 0x2df   : > { %6504 = vmatpush3.bf16.msra.mxu1 %v7594_v57 }
 0x2e1   : > { %5145 = vmatpush1.bf16.msra.mxu0 %v7555_v19 }
 0x2e2   : > { %5146 = vmatprep.subr.bf16.mxu0 %v7562_v49 }
 0x2e5   : > { %5147 = vmatpush1.bf16.msra.mxu0 %v7560_v12  ;;  %v7604_v12 = vld [vmem:[#allocation10 + $0x7c8] ss:$12 sps:$4 sm:$0xff]  }
 0x2e6   : > { %5148 = vmatprep.subr.bf16.mxu0 %v7567_v59  ;;  %v7609_v59 = vld [vmem:[#allocation10 + $0x7e4] ss:$12 sps:$4 sm:$0xff]  }
 0x2e9   : > { %5149 = vmatpush1.bf16.msra.mxu0 %v7565_v11 }
 0x2ea   : > { %5150 = vmatprep.subr.bf16.mxu0 %v7572_v8 }
 0x2ed   : > { %5151 = vmatpush1.bf16.msra.mxu0 %v7570_v60  ;;  %v7607_v60 = vld [vmem:[#allocation10 + $0x7e0] ss:$12 sps:$4 sm:$0xff]  }
 0x2ee   : > { %5152 = vmatprep.subr.bf16.mxu0 %v7577_v61  ;;  %v7615_v61 = vld [vmem:[#allocation10 + $0x814] ss:$12 sps:$4 sm:$0xff]  }
 0x2f1   : > { %5153 = vmatpush1.bf16.msra.mxu0 %v7575_v62 }
 0x2f2   : > { %5154 = vmatprep.subr.bf16.mxu0 %v7582_v30  ;;  %v7613_v30 = vld [vmem:[#allocation10 + $0x810] ss:$12 sps:$4 sm:$0xff]  }
 0x2f5   : > { %5155 = vmatpush1.bf16.msra.mxu0 %v7580_v2  ;;  %v2824_v20 = vpop.f32.mrb[36].mxu1 }
 0x2f6   : > { %v6573_v13 = vadd.f32 %v2824_v20, %v662_v7  ;;  %v2826_v18 = vpop.f32.mrb[37].mxu1  ;;  %5156 = vmatprep.subr.bf16.mxu0 %v7587_v63 }
 0x2f7   : > { %v6574_v5 = vadd.f32 %v2826_v18, %v666_v40  ;;  %v2828_v47 = vpop.f32.mrb[38].mxu1 }
 0x2f8   : > { %v2861_v16 = vmax.f32 %v6573_v13, 0.0  ;;  %v6575_v17 = vadd.f32 %v2828_v47, %v662_v7  ;;  %v2830_v38 = vpop.f32.mrb[39].mxu1  ;;  %v7616_v13 = vld [vmem:[#allocation10 + $0x828] ss:$12 sps:$4 sm:$0xff]  }
 0x2f9   : > { %v2862_v48 = vmax.f32 %v6574_v5, 0.0  ;;  %v6576_v46 = vadd.f32 %v2830_v38, %v666_v40  ;;  %5157 = vmatpush1.bf16.msra.mxu0 %v7585_v1  ;;  %v7624_v47 = vld [vmem:[#allocation10 + $0x85c] ss:$12 sps:$4 sm:$0xff]  }
 0x2fa   : > { %v2873_v0 = vmax.f32 %v6575_v17, 0.0  ;;  %5158 = vmatprep.subr.bf16.mxu0 %v7592_v15  ;;  %v7619_v15 = vld [vmem:[#allocation10 + $0x840] ss:$12 sps:$4 sm:$0xff]  }
 0x2fb   : > { %v2874_v50 = vmax.f32 %v6576_v46, 0.0  ;;  %v7622_v46 = vld [vmem:[#allocation10 + $0x858] ss:$12 sps:$4 sm:$0xff]  }
 0x2fc   : > { %v8470_v45 = vpack.c.bf16 %v2873_v0, %v2861_v16 }
 0x2fd   : > { %v2922_v21 = vpack.c.bf16 %v2874_v50, %v2862_v48  ;;  %5159 = vmatpush1.bf16.msra.mxu0 %v7590_v14  ;;  %v2834_v23 = vpop.f32.mrb[40].mxu1  ;;  %v7627_v14 = vld [vmem:[#allocation10 + $0x874] ss:$12 sps:$4 sm:$0xff]  }
 0x2fe   : > { %v6577_v9 = vadd.f32 %v2834_v23, %v662_v7  ;;  %v2836_v25 = vpop.f32.mrb[41].mxu1  ;;  %5189 = vmatprep.subr.bf16.mxu0 %v7597_v22  ;;  %v7625_v22 = vld [vmem:[#allocation10 + $0x870] ss:$12 sps:$4 sm:$0xff]  }
 0x2ff   : > { %v6578_v33 = vadd.f32 %v2836_v25, %v666_v40  ;;  %v2838_v10 = vpop.f32.mrb[42].mxu1  ;;  %5562 = vmatprep.mubr.bf16.mxu1 %v2922_v21  ;;  %v7628_v25 = vld [vmem:[#allocation10 + $0x888] ss:$12 sps:$4 sm:$0xff]  }
 0x300   : > { %v2885_v37 = vmax.f32 %v6577_v9, 0.0  ;;  %v6579_v3 = vadd.f32 %v2838_v10, %v662_v7  ;;  %5161 = vmatmul.mubr.bf16.vlgmr.msra.gmra.mrb[24].mxu0 %v8380_v24  ;;  %v2840_v6 = vpop.f32.mrb[43].mxu1  ;;  %5563 = vmatmul.mubr.bf16.vlgmr.msra.gmra.mrb[108].mxu1 %v8470_v45  ;;  %v7601_v24 = vld [vmem:[#allocation10 + $0x7b0] ss:$12 sps:$4 sm:$0xff]  }
 0x301   : > { %v2886_v26 = vmax.f32 %v6578_v33, 0.0  ;;  %v6580_v39 = vadd.f32 %v2840_v6, %v666_v40  ;;  %5170 = vmatprep.mubr.bf16.mxu0 %v8392_v27  ;;  %5190 = vmatpush1.bf16.msra.mxu0 %v7595_v55  ;;  %v7631_v33 = vld [vmem:[#allocation10 + $0x8a0] ss:$12 sps:$4 sm:$0xff]   ;;  %v7636_v10 = vld [vmem:[#allocation10 + $0x8bc] ss:$12 sps:$4 sm:$0xff]  }
 0x302   : > { %v2897_v35 = vmax.f32 %v6579_v3, 0.0  ;;  %5191 = vmatprep.subr.bf16.mxu0 %v7600_v29  ;;  %v7633_v29 = vld [vmem:[#allocation10 + $0x8a4] ss:$12 sps:$4 sm:$0xff]   ;;  %v7639_v6 = vld [vmem:[#allocation10 + $0x8d4] ss:$12 sps:$4 sm:$0xff]  }
 0x303   : > { %v2898_v42 = vmax.f32 %v6580_v39, 0.0  ;;  %v7634_v3 = vld [vmem:[#allocation10 + $0x8b8] ss:$12 sps:$4 sm:$0xff]  }
 0x304   : > { %v8475_v4 = vpack.c.bf16 %v2897_v35, %v2885_v37  ;;  %v8490_v37 = vld [vmem:[#allocation12] sm:$0x7] }
 0x305   : > { %v8477_v54 = vpack.c.bf16 %v2898_v42, %v2886_v26  ;;  %5192 = vmatpush1.bf16.msra.mxu0 %v7598_v41  ;;  %v2844_v52 = vpop.f32.mrb[44].mxu1  ;;  %v3344_v26 = vrot.slane %v8490_v37, %v8319_v44  ;;  %v7637_v41 = vld [vmem:[#allocation10 + $0x8d0] ss:$12 sps:$4 sm:$0xff]  }
 0x306   : > { %v6581_v58 = vadd.f32 %v2844_v52, %v662_v7  ;;  %5193 = vmatprep.subr.bf16.mxu0 %v7603_v51  ;;  %v2846_v34 = vpop.f32.mrb[45].mxu1  ;;  %v7618_v7 = vld [vmem:[#allocation10 + $0x82c] ss:$12 sps:$4 sm:$0xff]  }
 0x307   : > { %5570 = vmatprep.mubr.bf16.mxu1 %v8477_v54  ;;  %v6582_v27 = vadd.f32 %v2846_v34, %v666_v40  ;;  %v2848_v36 = vpop.f32.mrb[46].mxu1  ;;  %v7642_v51 = vld [vmem:[#allocation10 + $0x8ec] ss:$12 sps:$4 sm:$0xff]  }
 0x308   : > { %v2909_v57 = vmax.f32 %v6581_v58, 0.0  ;;  %5171 = vmatmul.mubr.bf16.gmra.mrb[28].mxu0 %v8390_v53  ;;  %5571 = vmatmul.mubr.bf16.gmra.mrb[112].mxu1 %v8475_v4  ;;  %v2849_v19 = vpop.f32.mrb[47].mxu1  ;;  %v7612_v53 = vld [vmem:[#allocation10 + $0x7fc] ss:$12 sps:$4 sm:$0xff]  }
 0x309   : > { %v2910_v49 = vmax.f32 %v6582_v27, 0.0  ;;  %5180 = vmatprep.mubr.bf16.mxu0 %v8455_v43  ;;  %5194 = vmatpush1.bf16.msra.mxu0 %v7601_v24  ;;  %v7610_v43 = vld [vmem:[#allocation10 + $0x7f8] ss:$12 sps:$4 sm:$0xff]   ;;  %v7640_v36 = vld [vmem:[#allocation10 + $0x8e8] ss:$12 sps:$4 sm:$0xff]  }
 0x30a   : > { %5195 = vmatprep.subr.bf16.mxu0 %v7606_v56  ;;  %v8485_v8 = vpack.c.bf16 %v2909_v57, %v2909_v57 }
 0x30b   : > { %v8483_v11 = vpack.c.bf16 %v2910_v49, %v2910_v49 }
 0x30d   : > { %5196 = vmatpush1.bf16.msra.mxu0 %v7604_v12  ;;  %5578 = vmatprep.mubr.bf16.mxu1 %v8483_v11 }
 0x30e   : > { %5197 = vmatprep.subr.bf16.mxu0 %v7609_v59 }
 0x310   : > { %5181 = vmatmul.mubr.bf16.gmra.mrb[32].mxu0 %v8460_v32  ;;  %5579 = vmatmul.mubr.bf16.gmra.mrb[116].mxu1 %v8485_v8  ;;  %v7621_v32 = vld [vmem:[#allocation10 + $0x844] ss:$12 sps:$4 sm:$0xff]  }
 0x311   : > { %5198 = vmatpush1.bf16.msra.mxu0 %v7607_v60  ;;  %5221 = vmatprep.mubr.bf16.mxu0 %v2922_v21  ;;  %v7630_v21 = vld [vmem:[#allocation10 + $0x88c] ss:$12 sps:$4 sm:$0xff]  }
 0x312   : > { %5199 = vmatprep.subr.bf16.mxu0 %v7612_v53 }
 0x315   : > { %5200 = vmatpush1.bf16.msra.mxu0 %v7610_v43  ;;  %v6335_v62 = vpop.f32.mrb[48].mxu1 }
 0x316   : > { %v6336_v2 = vpop.f32.mrb[49].mxu1  ;;  %5201 = vmatprep.subr.bf16.mxu0 %v7615_v61 }
 0x317   : > { %v6337_v63 = vadd.f32 %v6336_v2, %v6335_v62  ;;  %v6338_v40 = vpop.f32.mrb[50].mxu1 }
 0x318   : > { %v6339_v20 = vpop.f32.mrb[51].mxu1 }
 0x319   : > { %5202 = vmatpush1.bf16.msra.mxu0 %v7613_v30  ;;  %v6340_v1 = vadd.f32 %v6339_v20, %v6338_v40  ;;  %v5285_v42 = vadd.f32 %v6337_v63, %v3344_v26 }
 0x31a   : > { %5203 = vmatprep.subr.bf16.mxu0 %v7618_v7 }
 0x31b   : > { %v5288_v34 = vadd.f32 %v6340_v1, %v3344_v26 }
 0x31d   : > { %5204 = vmatpush1.bf16.msra.mxu0 %v7616_v13  ;;  %v6341_v18 = vpop.f32.mrb[52].mxu1 }
 0x31e   : > { %v6342_v5 = vpop.f32.mrb[53].mxu1  ;;  %5205 = vmatprep.subr.bf16.mxu0 %v7621_v32 }
 0x31f   : > { %v6343_v16 = vadd.f32 %v6342_v5, %v6341_v18  ;;  %v6344_v17 = vpop.f32.mrb[54].mxu1 }
 0x320   : > { %v6345_v38 = vpop.f32.mrb[55].mxu1 }
 0x321   : > { %5206 = vmatpush1.bf16.msra.mxu0 %v7619_v15  ;;  %v6346_v48 = vadd.f32 %v6345_v38, %v6344_v17  ;;  %v5293_v49 = vadd.f32 %v6343_v16, %v3344_v26 }
 0x322   : > { %5207 = vmatprep.subr.bf16.mxu0 %v7624_v47 }
 0x323   : > { %v5296_v53 = vadd.f32 %v6346_v48, %v3344_v26 }
 0x325   : > { %5208 = vmatpush1.bf16.msra.mxu0 %v7622_v46  ;;  %v6347_v0 = vpop.f32.mrb[56].mxu1 }
 0x326   : > { %v6348_v50 = vpop.f32.mrb[57].mxu1  ;;  %5209 = vmatprep.subr.bf16.mxu0 %v7627_v14 }
 0x327   : > { %v6349_v23 = vadd.f32 %v6348_v50, %v6347_v0  ;;  %v6350_v55 = vpop.f32.mrb[58].mxu1 }
 0x328   : > { %v6351_v9 = vpop.f32.mrb[59].mxu1 }
 0x329   : > { %5210 = vmatpush1.bf16.msra.mxu0 %v7625_v22  ;;  %v5301_v7 = vadd.f32 %v6349_v23, %v3344_v26 }
 0x32a   : > { %5211 = vmatprep.subr.bf16.mxu0 %v7630_v21 }
 0x32d   : > { %5212 = vmatpush1.bf16.msra.mxu0 %v7628_v25 }
 0x32e   : > { %5213 = vmatprep.subr.bf16.mxu0 %v7633_v29 }
 0x331   : > { %5214 = vmatpush1.bf16.msra.mxu0 %v7631_v33 }
 0x332   : > { %5215 = vmatprep.subr.bf16.mxu0 %v7636_v10 }
 0x335   : > { %5216 = vmatpush1.bf16.msra.mxu0 %v7634_v3  ;;  %v6369_v39 = vpop.f32.mrb[60].mxu1 }
 0x336   : > { %v6370_v35 = vpop.f32.mrb[61].mxu1  ;;  %5217 = vmatprep.subr.bf16.mxu0 %v7639_v6 }
 0x337   : > { %v6371_v52 = vadd.f32 %v6370_v35, %v6369_v39  ;;  %v6372_v24 = vpop.f32.mrb[62].mxu1 }
 0x338   : > { %v6373_v58 = vpop.f32.mrb[63].mxu1 }
 0x339   : > { %v5341_v56 = vadd.f32 %v6371_v52, %v5285_v42  ;;  %5218 = vmatpush1.bf16.msra.mxu0 %v7637_v41  ;;  %v6374_v27 = vadd.f32 %v6373_v58, %v6372_v24 }
 0x33a   : > { %5219 = vmatprep.subr.bf16.mxu0 %v7642_v51 }
 0x33b   : > { %v5344_v57 = vadd.f32 %v6374_v27, %v5288_v34 }
 0x33d   : > { %5220 = vmatpush1.bf16.msra.mxu0 %v7640_v36  ;;  %v6375_v19 = vpop.f32.mrb[64].mxu1 }
 0x33e   : > { %v6376_v44 = vpop.f32.mrb[65].mxu1 }
 0x33f   : > { %v6377_v12 = vadd.f32 %v6376_v44, %v6375_v19  ;;  %v6378_v59 = vpop.f32.mrb[66].mxu1 }
 0x340   : > { %5222 = vmatmul.mubr.bf16.vlgmr.msra.gmra.mrb[24].mxu0 %v8470_v45  ;;  %v6379_v60 = vpop.f32.mrb[67].mxu1 }
 0x341   : > { %v5349_v43 = vadd.f32 %v6377_v12, %v5293_v49  ;;  %5231 = vmatprep.mubr.bf16.mxu0 %v8477_v54  ;;  %v6380_v61 = vadd.f32 %v6379_v60, %v6378_v59 }
 0x343   : > { %v5352_v62 = vadd.f32 %v6380_v61, %v5296_v53 }
 0x345   : > { %v6381_v30 = vpop.f32.mrb[68].mxu1 }
 0x346   : > { %v6382_v2 = vpop.f32.mrb[69].mxu1 }
 0x347   : > { %v6383_v63 = vadd.f32 %v6382_v2, %v6381_v30  ;;  %v6384_v40 = vpop.f32.mrb[70].mxu1 }
 0x348   : > { %5232 = vmatmul.mubr.bf16.gmra.mrb[28].mxu0 %v8475_v4  ;;  %v6385_v20 = vpop.f32.mrb[71].mxu1 }
 0x349   : > { %v5357_v1 = vadd.f32 %v6383_v63, %v5301_v7  ;;  %5241 = vmatprep.mubr.bf16.mxu0 %v8483_v11 }
 0x350   : > { %5242 = vmatmul.mubr.bf16.gmra.mrb[32].mxu0 %v8485_v8 }
 0x355   : > { %v6403_v45 = vpop.f32.mrb[72].mxu1 }
 0x356   : > { %v6404_v13 = vpop.f32.mrb[73].mxu1 }
 0x357   : > { %v6405_v32 = vadd.f32 %v6404_v13, %v6403_v45  ;;  %v6406_v18 = vpop.f32.mrb[74].mxu1 }
 0x358   : > { %v6407_v54 = vpop.f32.mrb[75].mxu1 }
 0x359   : > { %v5397_v15 = vadd.f32 %v6405_v32, %v5341_v56  ;;  %v6408_v5 = vadd.f32 %v6407_v54, %v6406_v18 }
 0x35b   : > { %v5400_v47 = vadd.f32 %v6408_v5, %v5344_v57 }
 0x35d   : > { %v6409_v16 = vpop.f32.mrb[76].mxu1 }
 0x35e   : > { %v6410_v17 = vpop.f32.mrb[77].mxu1 }
 0x35f   : > { %v6411_v38 = vadd.f32 %v6410_v17, %v6409_v16  ;;  %v6412_v48 = vpop.f32.mrb[78].mxu1 }
 0x360   : > { %v6413_v46 = vpop.f32.mrb[79].mxu1 }
 0x361   : > { %v5405_v4 = vadd.f32 %v6411_v38, %v5349_v43  ;;  %v6414_v14 = vadd.f32 %v6413_v46, %v6412_v48 }
 0x363   : > { %v5408_v0 = vadd.f32 %v6414_v14, %v5352_v62 }
 0x365   : > { %v6415_v22 = vpop.f32.mrb[80].mxu1 }
 0x366   : > { %v6416_v11 = vpop.f32.mrb[81].mxu1 }
 0x367   : > { %v6417_v50 = vadd.f32 %v6416_v11, %v6415_v22  ;;  %v6418_v8 = vpop.f32.mrb[82].mxu1 }
 0x368   : > { %v6419_v21 = vpop.f32.mrb[83].mxu1 }
 0x369   : > { %v5413_v23 = vadd.f32 %v6417_v50, %v5357_v1 }
 0x375   : > { %v6437_v55 = vpop.f32.mrb[84].mxu1 }
 0x376   : > { %v6438_v9 = vpop.f32.mrb[85].mxu1 }
 0x377   : > { %v6439_v25 = vadd.f32 %v6438_v9, %v6437_v55  ;;  %v6440_v29 = vpop.f32.mrb[86].mxu1 }
 0x378   : > { %v6441_v33 = vpop.f32.mrb[87].mxu1 }
 0x379   : > { %v5453_v10 = vadd.f32 %v6439_v25, %v5397_v15  ;;  %v6442_v3 = vadd.f32 %v6441_v33, %v6440_v29 }
 0x37b   : > { %v5456_v6 = vadd.f32 %v6442_v3, %v5400_v47  ;;  %v3340_v3 = vrot.slane %v8490_v37, %v8240_v31 }
 0x37d   : > { %v6443_v26 = vpop.f32.mrb[88].mxu1 }
 0x37e   : > { %v6444_v39 = vpop.f32.mrb[89].mxu1 }
 0x37f   : > { %v6445_v41 = vadd.f32 %v6444_v39, %v6443_v26  ;;  %v6446_v35 = vpop.f32.mrb[90].mxu1 }
 0x380   : > { %v6447_v51 = vpop.f32.mrb[91].mxu1 }
 0x381   : > { %v5461_v42 = vadd.f32 %v6445_v41, %v5405_v4  ;;  %v6448_v52 = vadd.f32 %v6447_v51, %v6446_v35 }
 0x383   : > { %v5464_v24 = vadd.f32 %v6448_v52, %v5408_v0 }
 0x385   : > { %v6449_v58 = vpop.f32.mrb[92].mxu1 }
 0x386   : > { %v6450_v34 = vpop.f32.mrb[93].mxu1 }
 0x387   : > { %v6451_v56 = vadd.f32 %v6450_v34, %v6449_v58  ;;  %v6452_v27 = vpop.f32.mrb[94].mxu1 }
 0x388   : > { %v6453_v36 = vpop.f32.mrb[95].mxu1 }
 0x389   : > { %v5469_v57 = vadd.f32 %v6451_v56, %v5413_v23 }
 0x395   : > { %v6471_v19 = vpop.f32.mrb[96].mxu1 }
 0x396   : > { %v6472_v44 = vpop.f32.mrb[97].mxu1 }
 0x397   : > { %v6473_v49 = vadd.f32 %v6472_v44, %v6471_v19  ;;  %v6474_v12 = vpop.f32.mrb[98].mxu1 }
 0x398   : > { %v6475_v59 = vpop.f32.mrb[99].mxu1 }
 0x399   : > { %v5509_v60 = vadd.f32 %v6473_v49, %v5453_v10  ;;  %v6476_v53 = vadd.f32 %v6475_v59, %v6474_v12  ;;  %v3336_v10 = vrot.slane %v8490_v37, %v8237_v28 }
 0x39b   : > { %v5512_v43 = vadd.f32 %v6476_v53, %v5456_v6 }
 0x39d   : > { %v6477_v61 = vpop.f32.mrb[100].mxu1 }
 0x39e   : > { %v6478_v62 = vpop.f32.mrb[101].mxu1 }
 0x39f   : > { %v6479_v30 = vadd.f32 %v6478_v62, %v6477_v61  ;;  %v6480_v2 = vpop.f32.mrb[102].mxu1 }
 0x3a0   : > { %v6481_v7 = vpop.f32.mrb[103].mxu1 }
 0x3a1   : > { %v5517_v63 = vadd.f32 %v6479_v30, %v5461_v42  ;;  %v6482_v40 = vadd.f32 %v6481_v7, %v6480_v2 }
 0x3a3   : > { %v5520_v20 = vadd.f32 %v6482_v40, %v5464_v24 }
 0x3a5   : > { %v6483_v1 = vpop.f32.mrb[104].mxu1 }
 0x3a6   : > { %v6484_v45 = vpop.f32.mrb[105].mxu1 }
 0x3a7   : > { %v6485_v13 = vadd.f32 %v6484_v45, %v6483_v1  ;;  %v6486_v32 = vpop.f32.mrb[106].mxu1 }
 0x3a8   : > { %v6487_v18 = vpop.f32.mrb[107].mxu1 }
 0x3a9   : > { %v5525_v54 = vadd.f32 %v6485_v13, %v5469_v57 }
 0x3d3   : > { %v6505_v15 = vpop.f32.mrb[108].mxu1 }
 0x3d4   : > { %v6506_v5 = vpop.f32.mrb[109].mxu1 }
 0x3d5   : > { %v6507_v47 = vadd.f32 %v6506_v5, %v6505_v15  ;;  %v6508_v16 = vpop.f32.mrb[110].mxu1 }
 0x3d6   : > { %v6509_v17 = vpop.f32.mrb[111].mxu1 }
 0x3d7   : > { %v5565_v38 = vadd.f32 %v6507_v47, %v5509_v60  ;;  %v6510_v48 = vadd.f32 %v6509_v17, %v6508_v16 }
 0x3d9   : > { %5588 = vst [vmem:[%s8501_s26 + $0x10] sm:$0xff] %v5565_v38  ;;  %v5568_v46 = vadd.f32 %v6510_v48, %v5512_v43 }
 0x3db   : > { %5591 = vst [vmem:[%s8501_s26 + $0x28] sm:$0xff] %v5568_v46  ;;  %v6511_v4 = vpop.f32.mrb[112].mxu1 }
 0x3dc   : > { %v6512_v14 = vpop.f32.mrb[113].mxu1 }
 0x3dd   : > { %v6513_v0 = vadd.f32 %v6512_v14, %v6511_v4  ;;  %v6514_v22 = vpop.f32.mrb[114].mxu1 }
 0x3de   : > { %v6515_v11 = vpop.f32.mrb[115].mxu1 }
 0x3df   : > { %v5573_v50 = vadd.f32 %v6513_v0, %v5517_v63  ;;  %v6516_v8 = vadd.f32 %v6515_v11, %v6514_v22 }
 0x3e1   : > { %5594 = vst [vmem:[%s8501_s26 + $0x40] sm:$0xff] %v5573_v50  ;;  %v5576_v21 = vadd.f32 %v6516_v8, %v5520_v20 }
 0x3e3   : > { %5597 = vst [vmem:[%s8501_s26 + $0x58] sm:$0xff] %v5576_v21  ;;  %v6517_v23 = vpop.f32.mrb[116].mxu1 }
 0x3e4   : > { %v6518_v55 = vpop.f32.mrb[117].mxu1 }
 0x3e5   : > { %v6519_v9 = vadd.f32 %v6518_v55, %v6517_v23  ;;  %v6520_v25 = vpop.f32.mrb[118].mxu1 }
 0x3e6   : > { %v6521_v29 = vpop.f32.mrb[119].mxu1 }
 0x3e7   : > { %v5581_v33 = vadd.f32 %v6519_v9, %v5525_v54 }
 0x3e9   : > { %5600 = vst [vmem:[%s8501_s26 + $0x70] sm:$0xff] %v5581_v33 }
 0x413   : > { %v5223_v6 = vpop.f32.mrb[24].mxu0 }
 0x414   : > { %v6583_v26 = vadd.f32 %v5223_v6, %v3336_v10  ;;  %v5225_v39 = vpop.f32.mrb[25].mxu0 }
 0x415   : > { %v6584_v41 = vadd.f32 %v5225_v39, %v3340_v3  ;;  %v5227_v35 = vpop.f32.mrb[26].mxu0 }
 0x416   : > { %5586 = vst [vmem:[%s8501_s26] sm:$0xff] %v6583_v26  ;;  %v6585_v51 = vadd.f32 %v5227_v35, %v3336_v10  ;;  %v5229_v42 = vpop.f32.mrb[27].mxu0 }
 0x417   : > { %5587 = vst [vmem:[%s8501_s26 + $0x8] sm:$0xff] %v6584_v41  ;;  %v6586_v52 = vadd.f32 %v5229_v42, %v3340_v3 }
 0x418   : > { %5589 = vst [vmem:[%s8501_s26 + $0x18] sm:$0xff] %v6585_v51 }
 0x419   : > { %5590 = vst [vmem:[%s8501_s26 + $0x20] sm:$0xff] %v6586_v52 }
 0x41b   : > { %v5233_v28 = vpop.f32.mrb[28].mxu0 }
 0x41c   : > { %v6587_v31 = vadd.f32 %v5233_v28, %v3336_v10  ;;  %v5235_v37 = vpop.f32.mrb[29].mxu0 }
 0x41d   : > { %v6588_v24 = vadd.f32 %v5235_v37, %v3340_v3  ;;  %v5237_v58 = vpop.f32.mrb[30].mxu0 }
 0x41e   : > { %5592 = vst [vmem:[%s8501_s26 + $0x30] sm:$0xff] %v6587_v31  ;;  %v6589_v34 = vadd.f32 %v5237_v58, %v3336_v10  ;;  %v5239_v56 = vpop.f32.mrb[31].mxu0 }
 0x41f   : > { %5593 = vst [vmem:[%s8501_s26 + $0x38] sm:$0xff] %v6588_v24  ;;  %v6590_v27 = vadd.f32 %v5239_v56, %v3340_v3 }
 0x420   : > { %5595 = vst [vmem:[%s8501_s26 + $0x48] sm:$0xff] %v6589_v34 }
 0x421   : > { %5596 = vst [vmem:[%s8501_s26 + $0x50] sm:$0xff] %v6590_v27 }
 0x423   : > { %v5243_v36 = vpop.f32.mrb[32].mxu0 }
 0x424   : > { %v6591_v57 = vadd.f32 %v5243_v36, %v3336_v10  ;;  %v5245_v19 = vpop.f32.mrb[33].mxu0 }
 0x425   : > { %v6592_v44 = vadd.f32 %v5245_v19, %v3340_v3  ;;  %v5247_v49 = vpop.f32.mrb[34].mxu0 }
 0x426   : > { %5598 = vst [vmem:[%s8501_s26 + $0x60] sm:$0xff] %v6591_v57  ;;  %v5248_v12 = vpop.f32.mrb[35].mxu0 }
 0x427   : > { %5599 = vst [vmem:[%s8501_s26 + $0x68] sm:$0xff] %v6592_v44 }
 0x428   : > { %7799 = shalt.err (!%p7796_p13)
}
 0x429   : > { %s7800_s20 = scalar_lea.hbm %s8525_s13, 1920  ;;  %s7804_s16 = scalar_lea.hbm %s8579_s6, 3840 }
 0x42a   : > { %p7801_p9 = scmp.ne.s32.totalorder %s8525_s13, %s7800_s20  ;;  %p7805_p6 = scmp.lt.u32.totalorder %s8525_s13, %s8579_s6 }
 0x42b   : > { %p7806_p10 = scmp.lt.u32.totalorder %s7804_s16, %s7800_s20  ;;  %p7808_p8 = scmp.lt.u32.totalorder %s7800_s20, %s8525_s13 }
 0x42c   : > { %p7802_p0 = pnand %p7801_p9, %p8072_p5 }
 0x42d   : > { %p7807_p4 = por %p7806_p10, %p7805_p6 }
 0x42e   : > { %p7803_p11 = pneg %p7802_p0 }
 0x42f   : > { %p7809_p3 = por %p7808_p8, %p7807_p4 }
 0x431   : > { %p7810_p7 = pnand %p7809_p3, %p7803_p11 }
 0x433   : > { %7813 = shalt.err (!%p7810_p7)
}
 0x434   : > { %s7875_s26 = smov 384   ;;  %s7876_s28 = smov 24  }
 0x435   : > { %6747 = dma.vmem_to_hbm [thread:$0]  (%p8072_p5), %s8527_s25, 1920, %s8525_s13, %s5602_s24, %s7875_s26, %s7875_s26, %s7876_s28  }
 0x436 PF: > { %s5631_s8 = sand.u32 1, %s7848_s0   ;;  %p8599_p12 = scmp.ne.s32.totalorder %s8585_s27, 0 }
 0x437   : > { %p8600_p2 = scmp.ge.s32.totalorder %s7860_s23, 2  ;;  %s5632_s12 = scalar_lea.sflag [#allocation6], %s5631_s8 }
 0x439   : > { %p6767_p1 = pnand %p8600_p2, %p8599_p12 }
 0x43b   : > { %7843 = dma.done.wait (!%p6767_p1), %s5632_s12, 1920  }
 0x43c   : > { %7845 = vsyncadd (!%p6767_p1), %s5632_s12, 4294965376  ;;  %p22_p13 = scmp.ge.s32.totalorder %s8058_s15, 4   ;;  %s8601_s0 = smov %s7852_s21 }
 0x43d   : > { %s8602_s21 = smov %s7856_s22  ;;  %s8603_s22 = smov %s8068_s9 }
 0x43e   : > { %s8604_s23 = smov %s8058_s15  ;;  %24 = sbr.rel (!%p22_p13) target bundleno = 9 (0x9), region = 101 }
 0x445   :  { %5637 = vsyncpa [#allocation5], 1 }
 0x446   :  { %5639 = vsyncpa [#allocation5 + $0x1], 1 }
 0x447   :  { %5640 = vsyncpa [#allocation8], 1 }
 0x448   :  { %5641 = vsyncpa [#allocation11], 1 }
 0x449   :  { %5642 = vsyncpa [#allocation6], 1 }
 0x44a   :  { %5644 = vsyncpa [#allocation6 + $0x1], 1 }

</bundles_post_ra>
